<compile_context>
chip_gen: v5e
topology: v5e:2x2
jax: 0.10.0
libtpu: 0.0.40
codegen_flags: <defaults>
</compile_context>

<pallas_src>
import functools
import math

import jax
import jax.numpy as jnp
from jax.experimental import pallas as pl
from jax.experimental.pallas import tpu as pltpu

# ----------------------------- small-model config -----------------------------
CFG = dict(
    conv_dim=(32, 32, 32),      # feature-extractor channels (real HuBERT: (512,)*7)
    conv_kernel=(4, 3, 3),      # real HuBERT: (10,3,3,3,3,2,2)
    conv_stride=(2, 2, 2),      # real HuBERT: (5,2,2,2,2,2,2)
    hidden=128,                 # lane-dense toy hidden (real: 768)
    heads=4,                    # real: 12
    ffn=256,                    # real: 3072
    layers=2,                   # truncated encoder layers (ctor arg `layer`, real default 22)
    pos_conv_kernel=4,          # real: 128 (even -> SamePad trims one frame)
    pos_conv_groups=2,          # real: 16
    n_clusters=16,              # real: size of the k-means codebook (e.g. 500)
)

LN_EPS = 1e-5
LANE = 128


def _gelu(x):
    # TODO(synk): HF Hubert uses exact (erf) GELU; tanh approximation kept for Mosaic-safe lowering.
    return jax.nn.gelu(x, approximate=True)


def _layer_norm_f32(x, g, b, eps=LN_EPS):
    mu = jnp.mean(x, axis=-1, keepdims=True)
    var = jnp.mean(jnp.square(x - mu), axis=-1, keepdims=True)
    return (x - mu) * jax.lax.rsqrt(var + eps) * g + b


def _bf16(x):
    return x.astype(jnp.bfloat16)


# ------------------------------ the fused kernel -------------------------------
def _hubert_fused_kernel(
        # inputs -------------------------------------------------------------
        x_ref,                                   # [T0, 1]  raw samples, time on sublanes
        c0w_ref,                                 # [K0, C0] conv0 taps (Cin == 1), f32
        gng_ref, gnb_ref,                        # [1, C0]  GroupNorm affine
        crw_ref,                                 # [sum(K_rest), C, C] remaining conv taps, f32
        fplg_ref, fplb_ref,                      # [1, C]   feature-projection LayerNorm
        fpw_ref, fpb_ref,                        # [C, D] bf16 / [1, D]
        posw_ref, posb_ref,                      # [Kp, D, D] bf16 block-diag taps / [1, D]
        qkvw_ref, qkvb_ref,                      # [L, D, 3D] bf16 (scale folded into Q) / [L,1,3D]
        ow_ref, ob_ref,                          # [L, D, D] bf16 / [L, 1, D]
        l1g_ref, l1b_ref,                        # [L, 1, D]
        w1_ref, b1_ref, w2_ref, b2_ref,          # FFN: [L,D,F] bf16, [L,1,F], [L,F,D] bf16, [L,1,D]
        l2g_ref, l2b_ref,                        # [L, 1, D]
        kmc_ref, kmn_ref,                        # [D, Vp] f32 / [1, Vp] f32 (padded codebook)
        # outputs ------------------------------------------------------------
        o_ref,                                   # [1, T, Vp]
        # scratch ------------------------------------------------------------
        *scratch,
        cfg, t_list, eps):
    """Whole HubertLabeler forward for ONE batch element, fully resident in VMEM."""
    conv_k, conv_s = cfg["conv_kernel"], cfg["conv_stride"]
    n_conv = len(conv_k)
    heads, layers = cfg["heads"], cfg["layers"]
    D = cfg["hidden"]
    Kp = cfg["pos_conv_kernel"]
    T = t_list[-1]

    conv_bufs = scratch[:n_conv - 1]
    s_pos = scratch[-1]

    # ---- conv layer 0 (Cin=1): K0 shifted VPU MACs over strided windows of the input ref ----
    w0 = c0w_ref[...]                                              # [K0, C0] f32
    h = jnp.zeros((t_list[1], cfg["conv_dim"][0]), jnp.float32)
    for k in range(conv_k[0]):
        xk = x_ref[pl.ds(k, t_list[1], stride=conv_s[0]), :]       # [T1, 1]
        h = h + xk * w0[k:k + 1, :]
    # GroupNorm(num_groups=C) over time (per-channel stats via ones-row MXU matmuls), then GELU.
    ones = jnp.ones((1, t_list[1]), jnp.float32)
    inv_t = 1.0 / float(t_list[1])
    mu = jnp.dot(ones, h, preferred_element_type=jnp.float32) * inv_t
    xc = h - mu
    var = jnp.dot(ones, xc * xc, preferred_element_type=jnp.float32) * inv_t
    h = _gelu(xc * jax.lax.rsqrt(var + eps) * gng_ref[...] + gnb_ref[...])
    conv_bufs[0][...] = h

    # ---- conv layers 1..: in-VMEM strided im2col (per-tap matmuls) + GELU, no HBM round trips ----
    for i in range(1, n_conv):
        src = conv_bufs[i - 1]
        t_out = t_list[i + 1]
        tap_off = int(sum(conv_k[1:i]))
        acc = jnp.zeros((t_out, cfg["conv_dim"][i]), jnp.float32)
        for k in range(conv_k[i]):
            xk = src[pl.ds(k, t_out, stride=conv_s[i]), :]         # [t_out, Cin]
            acc = acc + jnp.dot(xk, crw_ref[tap_off + k],
                                preferred_element_type=jnp.float32)
        h = _gelu(acc)
        if i < n_conv - 1:
            conv_bufs[i][...] = h

    # ---- feature projection: LayerNorm fused into the Linear prologue (bf16 MXU) ----
    y = _layer_norm_f32(h, fplg_ref[...], fplb_ref[...], eps)
    h = jnp.dot(_bf16(y), fpw_ref[...],
                preferred_element_type=jnp.float32) + fpb_ref[...]            # [T, D] f32

    # ---- positional conv (grouped, block-diag taps) + SamePad trim + GELU + residual ----
    s_pos[...] = jnp.zeros_like(s_pos)
    pad = Kp // 2
    s_pos[pad:pad + T, :] = h
    acc = jnp.zeros((T, D), jnp.float32)
    for k in range(Kp):
        acc = acc + jnp.dot(_bf16(s_pos[k:k + T, :]), posw_ref[k],
                            preferred_element_type=jnp.float32)
    h = h + _gelu(acc + posb_ref[...])
    # encoder.layer_norm was replaced with nn.Identity() in HubertLabeler.__init__ -> skipped.

    # ---- transformer encoder layers (post-LN), weights resident, bf16 MXU / f32 epilogues ----
    dh = D // heads
    for l in range(layers):
        xb = _bf16(h)
        qkv = jnp.dot(xb, qkvw_ref[l], preferred_element_type=jnp.float32) + qkvb_ref[l]
        qkv16 = _bf16(qkv)                         # single cast shared by every head
        wo = ow_ref[l]                             # bf16 [D, D], loaded once per layer
        attn = jnp.zeros((T, D), jnp.float32)
        # TODO(synk): dh=32 lane slices still relayout per head; a heads-batched dot_general
        # layout would remove them (bigger win at real head counts).
        for hh in range(heads):
            q = qkv16[:, hh * dh:(hh + 1) * dh]                # 1/sqrt(dh) folded into qkv_w
            kk = qkv16[:, D + hh * dh:D + (hh + 1) * dh]
            v = qkv16[:, 2 * D + hh * dh:2 * D + (hh + 1) * dh]
            s = jax.lax.dot_general(q, kk, (((1,), (1,)), ((), ())),
                                    preferred_element_type=jnp.float32)       # [T, T]
            m = jnp.max(s, axis=-1, keepdims=True)
            e = jnp.exp(s - m)
            p = e * pl.reciprocal(jnp.sum(e, axis=-1, keepdims=True), approx=True)
            oh = jnp.dot(_bf16(p), v, preferred_element_type=jnp.float32)     # [T, dh]
            attn = attn + jnp.dot(_bf16(oh), wo[hh * dh:(hh + 1) * dh, :],
                                  preferred_element_type=jnp.float32)
        h = _layer_norm_f32(h + attn + ob_ref[l], l1g_ref[l], l1b_ref[l], eps)

        f = _gelu(jnp.dot(_bf16(h), w1_ref[l],
                          preferred_element_type=jnp.float32) + b1_ref[l])
        y = jnp.dot(_bf16(f), w2_ref[l], preferred_element_type=jnp.float32) + b2_ref[l]
        h = _layer_norm_f32(h + y, l2g_ref[l], l2b_ref[l], eps)

    # ---- K-means distances: ||x||^2 - 2 xC + ||C||^2, f32 (cancellation), lane-dense codebook ----
    xsq = jnp.sum(h * h, axis=-1, keepdims=True)
    xc2 = jnp.dot(h, kmc_ref[...], preferred_element_type=jnp.float32)
    o_ref[0] = (xsq - 2.0 * xc2 + kmn_ref[...]).astype(o_ref.dtype)


# ----------------------------------- wrapper -----------------------------------
def _frame_lengths(t0):
    t = [t0]
    for k, s in zip(CFG["conv_kernel"], CFG["conv_stride"]):
        t.append((t[-1] - k) // s + 1)
    return tuple(t)


def hubert_labeler_forward(params, batch, attention_mask=None):
    """HubertLabeler.forward: raw samples [B, T0] -> K-means distances [B, T', n_clusters]."""
    # TODO(synk): attention_mask / _get_feature_vector_attention_mask path not implemented (None only).
    del attention_mask
    B, T0 = batch.shape
    t_list = _frame_lengths(T0)
    T = t_list[-1]
    D, F, L, H = CFG["hidden"], CFG["ffn"], CFG["layers"], CFG["heads"]
    C0 = CFG["conv_dim"][0]
    Kp = CFG["pos_conv_kernel"]
    n_rest = len(CFG["conv_dim"]) - 1
    k_rest = int(sum(CFG["conv_kernel"][1:]))
    Vp = params["km_C"].shape[1]

    def wspec(shape):
        n = len(shape)
        if n == 2:
            return pl.BlockSpec(shape, lambda b: (0, 0))
        if n == 3:
            return pl.BlockSpec(shape, lambda b: (0, 0, 0))
        return pl.BlockSpec(shape, lambda b: (0, 0, 0, 0))

    in_specs = [
        pl.BlockSpec((pl.Squeezed(), T0, 1), lambda b: (b, 0, 0)),
        wspec((CFG["conv_kernel"][0], C0)),
        wspec((1, C0)), wspec((1, C0)),
        wspec((k_rest, C0, C0)),
        wspec((1, C0)), wspec((1, C0)),
        wspec((C0, D)), wspec((1, D)),
        wspec((Kp, D, D)), wspec((1, D)),
        wspec((L, D, 3 * D)), wspec((L, 1, 3 * D)),
        wspec((L, D, D)), wspec((L, 1, D)),
        wspec((L, 1, D)), wspec((L, 1, D)),
        wspec((L, D, F)), wspec((L, 1, F)),
        wspec((L, F, D)), wspec((L, 1, D)),
        wspec((L, 1, D)), wspec((L, 1, D)),
        wspec((D, Vp)), wspec((1, Vp)),
    ]
    scratch_shapes = (
        [pltpu.VMEM((t_list[i + 1], CFG["conv_dim"][i]), jnp.float32) for i in range(n_rest)]
        + [pltpu.VMEM((T + 2 * (Kp // 2), D), jnp.float32)]
    )

    # advisory cost hint so XLA schedules the few remaining host-side ops around the custom call
    param_bytes = sum(int(v.size) * v.dtype.itemsize for v in jax.tree_util.tree_leaves(params))
    flops_per_b = (
        2 * t_list[1] * CFG["conv_kernel"][0] * C0
        + sum(2 * t_list[i + 1] * CFG["conv_kernel"][i] * C0 * C0
              for i in range(1, len(CFG["conv_kernel"])))
        + 2 * T * C0 * D + 2 * T * Kp * D * D
        + L * (2 * T * D * 3 * D + 4 * T * T * D + 2 * T * D * D + 4 * T * D * F)
        + 2 * T * D * Vp)
    cost = pl.CostEstimate(
        flops=B * flops_per_b,
        transcendentals=B * (T * (D + L * F) + L * H * T * T + sum(t_list[1:]) * C0),
        bytes_accessed=param_bytes + B * T0 * 4 + B * T * Vp * 4)

    dist = pl.pallas_call(
        functools.partial(_hubert_fused_kernel, cfg=CFG, t_list=t_list, eps=LN_EPS),
        out_shape=jax.ShapeDtypeStruct((B, T, Vp), jnp.float32),
        grid=(B,),
        in_specs=in_specs,
        out_specs=pl.BlockSpec((1, T, Vp), lambda b: (b, 0, 0)),
        scratch_shapes=scratch_shapes,
        compiler_params=pltpu.CompilerParams(dimension_semantics=("parallel",)),
        cost_estimate=cost,
    )(
        batch.reshape(B, T0, 1),
        params["conv0_w"], params["conv0_gn_g"], params["conv0_gn_b"],
        params["conv_rest_w"],
        params["fp_ln_g"], params["fp_ln_b"], params["fp_w"], params["fp_b"],
        params["pos_conv_w"], params["pos_conv_b"],
        params["qkv_w"], params["qkv_b"], params["o_w"], params["o_b"],
        params["ln1_g"], params["ln1_b"],
        params["ff_w1"], params["ff_b1"], params["ff_w2"], params["ff_b2"],
        params["ln2_g"], params["ln2_b"],
        params["km_C"], params["km_Cnorm"],
    )
    return dist[:, :, :CFG["n_clusters"]]


# ----------------------------- deterministic init ------------------------------
def init_params(key):
    """Synthetic parameters, pre-packed into the kernel's compute layouts.

    All per-forward weight preprocessing is hoisted here (conv tap repacking, block-diagonal
    grouped pos-conv weights, 1/sqrt(dh) folded into Q, padded K-means codebook); MXU weights
    are stored in bf16, norm/bias params in f32."""
    keys = iter(jax.random.split(key, 64))

    def nrm(shape, std=0.02):
        return std * jax.random.normal(next(keys), shape, dtype=jnp.float32)

    D, F, L, H = CFG["hidden"], CFG["ffn"], CFG["layers"], CFG["heads"]
    C0 = CFG["conv_dim"][0]
    assert len(set(CFG["conv_dim"])) == 1, "stacked conv taps assume homogeneous channels"
    p = {}

    # feature-extractor convs: init in PyTorch Conv1d layout [Cout, Cin, K], repacked ONCE here.
    conv_w, cin = [], 1
    for cout, k in zip(CFG["conv_dim"], CFG["conv_kernel"]):
        conv_w.append(nrm((cout, cin, k), std=0.1))
        cin = cout
    p["conv0_w"] = jnp.transpose(conv_w[0][:, 0, :], (1, 0))                       # [K0, C0]
    p["conv_rest_w"] = jnp.concatenate(
        [jnp.transpose(w, (2, 1, 0)) for w in conv_w[1:]], axis=0)                 # [sumK, Ci, Co]
    p["conv0_gn_g"] = jnp.ones((1, C0), jnp.float32)
    p["conv0_gn_b"] = jnp.zeros((1, C0), jnp.float32)

    p["fp_ln_g"] = jnp.ones((1, C0), jnp.float32)
    p["fp_ln_b"] = jnp.zeros((1, C0), jnp.float32)
    p["fp_w"] = nrm((C0, D)).astype(jnp.bfloat16)
    p["fp_b"] = jnp.zeros((1, D), jnp.float32)

    # positional conv: block-diagonal per-tap weights [Kp, Din, Dout] (grouped conv), bf16.
    # TODO(synk): real checkpoints apply weight_norm to pos_conv; ignored for synthetic init.
    G, Kp = CFG["pos_conv_groups"], CFG["pos_conv_kernel"]
    cpg = D // G
    pw = nrm((D, cpg, Kp), std=0.1)                                  # PyTorch grouped Conv1d layout
    wt = jnp.transpose(pw, (2, 1, 0))                                # [Kp, cpg, Dout]
    din = jnp.arange(D)
    wf = wt[:, din % cpg, :]                                         # [Kp, Din, Dout]
    same = ((din[:, None] // cpg) == (din[None, :] // cpg)).astype(jnp.float32)
    p["pos_conv_w"] = (wf * same[None]).astype(jnp.bfloat16)
    p["pos_conv_b"] = jnp.zeros((1, D), jnp.float32)

    # encoder layers, stacked on a leading L axis; 1/sqrt(dh) folded into the Q projection (+bias).
    scale = 1.0 / math.sqrt(D // H)

    def stack(fn):
        return jnp.stack([fn() for _ in range(L)])

    qkv = stack(lambda: nrm((D, 3 * D)))
    p["qkv_w"] = qkv.at[:, :, :D].multiply(scale).astype(jnp.bfloat16)
    qkv_b = jnp.zeros((L, 1, 3 * D), jnp.float32)
    p["qkv_b"] = qkv_b.at[:, :, :D].multiply(scale)
    p["o_w"] = stack(lambda: nrm((D, D))).astype(jnp.bfloat16)
    p["o_b"] = jnp.zeros((L, 1, D), jnp.float32)
    p["ln1_g"] = jnp.ones((L, 1, D), jnp.float32)
    p["ln1_b"] = jnp.zeros((L, 1, D), jnp.float32)
    p["ff_w1"] = stack(lambda: nrm((D, F))).astype(jnp.bfloat16)
    p["ff_b1"] = jnp.zeros((L, 1, F), jnp.float32)
    p["ff_w2"] = stack(lambda: nrm((F, D))).astype(jnp.bfloat16)
    p["ff_b2"] = jnp.zeros((L, 1, D), jnp.float32)
    p["ln2_g"] = jnp.ones((L, 1, D), jnp.float32)
    p["ln2_b"] = jnp.zeros((L, 1, D), jnp.float32)

    # K-means codebook: C = cluster_centers_.T [D, V], padded to a lane-dense Vp once here.
    V = CFG["n_clusters"]
    Vp = ((V + LANE - 1) // LANE) * LANE
    C = nrm((D, V), std=1.0)
    p["km_C"] = jnp.pad(C, ((0, 0), (0, Vp - V)))
    p["km_Cnorm"] = jnp.pad(jnp.sum(C * C, axis=0, keepdims=True), ((0, 0), (0, Vp - V)))
    return p


# ----------------------------------- main --------------------------------------
if __name__ == "__main__":
    key = jax.random.PRNGKey(0)
    pkey, xkey = jax.random.split(key)
    params = init_params(pkey)

    B, T_samples = 2, 136          # 136 samples -> 67 -> 33 -> 16 frames with strides (2,2,2)
    batch = jax.random.normal(xkey, (B, T_samples), dtype=jnp.float32)

    forward = jax.jit(hubert_labeler_forward)
    dist = forward(params, batch)
    dist = jax.block_until_ready(dist)

    assert dist.shape == (B, 16, CFG["n_clusters"]), dist.shape
    assert dist.dtype == jnp.float32
    assert bool(jnp.all(jnp.isfinite(dist)))
    print("KERNEL_OK")
</pallas_src>

<mosaic_0001>
module attributes {stable_mosaic.version = 11 : i64} {
  func.func @_hubert_fused_kernel(%arg0: i32, %arg1: memref<1x136x1xf32, #tpu.memory_space<vmem>>, %arg2: memref<4x32xf32, #tpu.memory_space<vmem>>, %arg3: memref<1x32xf32, #tpu.memory_space<vmem>>, %arg4: memref<1x32xf32, #tpu.memory_space<vmem>>, %arg5: memref<6x32x32xf32, #tpu.memory_space<vmem>>, %arg6: memref<1x32xf32, #tpu.memory_space<vmem>>, %arg7: memref<1x32xf32, #tpu.memory_space<vmem>>, %arg8: memref<32x128xbf16, #tpu.memory_space<vmem>>, %arg9: memref<1x128xf32, #tpu.memory_space<vmem>>, %arg10: memref<4x128x128xbf16, #tpu.memory_space<vmem>>, %arg11: memref<1x128xf32, #tpu.memory_space<vmem>>, %arg12: memref<2x128x384xbf16, #tpu.memory_space<vmem>>, %arg13: memref<2x1x384xf32, #tpu.memory_space<vmem>>, %arg14: memref<2x128x128xbf16, #tpu.memory_space<vmem>>, %arg15: memref<2x1x128xf32, #tpu.memory_space<vmem>>, %arg16: memref<2x1x128xf32, #tpu.memory_space<vmem>>, %arg17: memref<2x1x128xf32, #tpu.memory_space<vmem>>, %arg18: memref<2x128x256xbf16, #tpu.memory_space<vmem>>, %arg19: memref<2x1x256xf32, #tpu.memory_space<vmem>>, %arg20: memref<2x256x128xbf16, #tpu.memory_space<vmem>>, %arg21: memref<2x1x128xf32, #tpu.memory_space<vmem>>, %arg22: memref<2x1x128xf32, #tpu.memory_space<vmem>>, %arg23: memref<2x1x128xf32, #tpu.memory_space<vmem>>, %arg24: memref<128x128xf32, #tpu.memory_space<vmem>>, %arg25: memref<1x128xf32, #tpu.memory_space<vmem>>, %arg26: memref<1x16x128xf32, #tpu.memory_space<vmem>>, %arg27: memref<67x32xf32, #tpu.memory_space<vmem>>, %arg28: memref<33x32xf32, #tpu.memory_space<vmem>>, %arg29: memref<20x128xf32, #tpu.memory_space<vmem>>) attributes {dimension_semantics = [#tpu.dimension_semantics<parallel>], iteration_bounds = array<i64: 2>, scalar_prefetch = 0 : i64, scratch_operands = 3 : i64, tpu.core_type = #tpu.core_type<tc>, window_params = [{transform_indices = @transform_0, window_bounds = array<i64: 1, 136, 1>}, {pipeline_mode = #tpu.pipeline_mode<synchronous>, transform_indices = @transform_1, window_bounds = array<i64: 4, 32>}, {pipeline_mode = #tpu.pipeline_mode<synchronous>, transform_indices = @transform_2, window_bounds = array<i64: 1, 32>}, {pipeline_mode = #tpu.pipeline_mode<synchronous>, transform_indices = @transform_3, window_bounds = array<i64: 1, 32>}, {pipeline_mode = #tpu.pipeline_mode<synchronous>, transform_indices = @transform_4, window_bounds = array<i64: 6, 32, 32>}, {pipeline_mode = #tpu.pipeline_mode<synchronous>, transform_indices = @transform_5, window_bounds = array<i64: 1, 32>}, {pipeline_mode = #tpu.pipeline_mode<synchronous>, transform_indices = @transform_6, window_bounds = array<i64: 1, 32>}, {pipeline_mode = #tpu.pipeline_mode<synchronous>, transform_indices = @transform_7, window_bounds = array<i64: 32, 128>}, {pipeline_mode = #tpu.pipeline_mode<synchronous>, transform_indices = @transform_8, window_bounds = array<i64: 1, 128>}, {pipeline_mode = #tpu.pipeline_mode<synchronous>, transform_indices = @transform_9, window_bounds = array<i64: 4, 128, 128>}, {pipeline_mode = #tpu.pipeline_mode<synchronous>, transform_indices = @transform_10, window_bounds = array<i64: 1, 128>}, {pipeline_mode = #tpu.pipeline_mode<synchronous>, transform_indices = @transform_11, window_bounds = array<i64: 2, 128, 384>}, {pipeline_mode = #tpu.pipeline_mode<synchronous>, transform_indices = @transform_12, window_bounds = array<i64: 2, 1, 384>}, {pipeline_mode = #tpu.pipeline_mode<synchronous>, transform_indices = @transform_13, window_bounds = array<i64: 2, 128, 128>}, {pipeline_mode = #tpu.pipeline_mode<synchronous>, transform_indices = @transform_14, window_bounds = array<i64: 2, 1, 128>}, {pipeline_mode = #tpu.pipeline_mode<synchronous>, transform_indices = @transform_15, window_bounds = array<i64: 2, 1, 128>}, {pipeline_mode = #tpu.pipeline_mode<synchronous>, transform_indices = @transform_16, window_bounds = array<i64: 2, 1, 128>}, {pipeline_mode = #tpu.pipeline_mode<synchronous>, transform_indices = @transform_17, window_bounds = array<i64: 2, 128, 256>}, {pipeline_mode = #tpu.pipeline_mode<synchronous>, transform_indices = @transform_18, window_bounds = array<i64: 2, 1, 256>}, {pipeline_mode = #tpu.pipeline_mode<synchronous>, transform_indices = @transform_19, window_bounds = array<i64: 2, 256, 128>}, {pipeline_mode = #tpu.pipeline_mode<synchronous>, transform_indices = @transform_20, window_bounds = array<i64: 2, 1, 128>}, {pipeline_mode = #tpu.pipeline_mode<synchronous>, transform_indices = @transform_21, window_bounds = array<i64: 2, 1, 128>}, {pipeline_mode = #tpu.pipeline_mode<synchronous>, transform_indices = @transform_22, window_bounds = array<i64: 2, 1, 128>}, {pipeline_mode = #tpu.pipeline_mode<synchronous>, transform_indices = @transform_23, window_bounds = array<i64: 128, 128>}, {pipeline_mode = #tpu.pipeline_mode<synchronous>, transform_indices = @transform_24, window_bounds = array<i64: 1, 128>}, {transform_indices = @transform_25, window_bounds = array<i64: 1, 16, 128>}]} {
    %c0 = arith.constant 0 : index
    %c0_0 = arith.constant 0 : index
    %0 = vector.load %arg2[%c0, %c0_0] : memref<4x32xf32, #tpu.memory_space<vmem>>, vector<4x32xf32>
    %cst = arith.constant 0.000000e+00 : f32
    %1 = vector.broadcast %cst : f32 to vector<67x32xf32>
    %c0_1 = arith.constant 0 : index
    %c0_2 = arith.constant 0 : index
    %c0_3 = arith.constant 0 : index
    %2 = tpu.strided_load %arg1[%c0_1, %c0_2, %c0_3] {strides = array<i32: 1, 2, 1>} : memref<1x136x1xf32, #tpu.memory_space<vmem>>, vector<1x67x1xf32>
    %3 = vector.shape_cast %2 : vector<1x67x1xf32> to vector<67x1xf32>
    %4 = vector.extract_strided_slice %0 {offsets = [0, 0], sizes = [1, 32], strides = [1, 1]} : vector<4x32xf32> to vector<1x32xf32>
    %5 = vector.broadcast %3 : vector<67x1xf32> to vector<67x32xf32>
    %6 = vector.broadcast %4 : vector<1x32xf32> to vector<67x32xf32>
    %7 = arith.mulf %5, %6 : vector<67x32xf32>
    %8 = arith.addf %1, %7 : vector<67x32xf32>
    %c0_4 = arith.constant 0 : index
    %c1 = arith.constant 1 : index
    %c0_5 = arith.constant 0 : index
    %9 = tpu.strided_load %arg1[%c0_4, %c1, %c0_5] {strides = array<i32: 1, 2, 1>} : memref<1x136x1xf32, #tpu.memory_space<vmem>>, vector<1x67x1xf32>
    %10 = vector.shape_cast %9 : vector<1x67x1xf32> to vector<67x1xf32>
    %11 = vector.extract_strided_slice %0 {offsets = [1, 0], sizes = [1, 32], strides = [1, 1]} : vector<4x32xf32> to vector<1x32xf32>
    %12 = vector.broadcast %10 : vector<67x1xf32> to vector<67x32xf32>
    %13 = vector.broadcast %11 : vector<1x32xf32> to vector<67x32xf32>
    %14 = arith.mulf %12, %13 : vector<67x32xf32>
    %15 = arith.addf %8, %14 : vector<67x32xf32>
    %c0_6 = arith.constant 0 : index
    %c2 = arith.constant 2 : index
    %c0_7 = arith.constant 0 : index
    %16 = tpu.strided_load %arg1[%c0_6, %c2, %c0_7] {strides = array<i32: 1, 2, 1>} : memref<1x136x1xf32, #tpu.memory_space<vmem>>, vector<1x67x1xf32>
    %17 = vector.shape_cast %16 : vector<1x67x1xf32> to vector<67x1xf32>
    %18 = vector.extract_strided_slice %0 {offsets = [2, 0], sizes = [1, 32], strides = [1, 1]} : vector<4x32xf32> to vector<1x32xf32>
    %19 = vector.broadcast %17 : vector<67x1xf32> to vector<67x32xf32>
    %20 = vector.broadcast %18 : vector<1x32xf32> to vector<67x32xf32>
    %21 = arith.mulf %19, %20 : vector<67x32xf32>
    %22 = arith.addf %15, %21 : vector<67x32xf32>
    %c0_8 = arith.constant 0 : index
    %c3 = arith.constant 3 : index
    %c0_9 = arith.constant 0 : index
    %23 = tpu.strided_load %arg1[%c0_8, %c3, %c0_9] {strides = array<i32: 1, 2, 1>} : memref<1x136x1xf32, #tpu.memory_space<vmem>>, vector<1x67x1xf32>
    %24 = vector.shape_cast %23 : vector<1x67x1xf32> to vector<67x1xf32>
    %25 = vector.extract_strided_slice %0 {offsets = [3, 0], sizes = [1, 32], strides = [1, 1]} : vector<4x32xf32> to vector<1x32xf32>
    %26 = vector.broadcast %24 : vector<67x1xf32> to vector<67x32xf32>
    %27 = vector.broadcast %25 : vector<1x32xf32> to vector<67x32xf32>
    %28 = arith.mulf %26, %27 : vector<67x32xf32>
    %29 = arith.addf %22, %28 : vector<67x32xf32>
    %cst_10 = arith.constant 1.000000e+00 : f32
    %30 = vector.broadcast %cst_10 : f32 to vector<1x67xf32>
    %cst_11 = arith.constant dense<0.000000e+00> : vector<1x32xf32>
    %31 = tpu.matmul %30, %29, %cst_11 {dimension_numbers = #tpu.dot_dimension_numbers<[1], [0], [0], [1], [0, 0, 1, 1], [], []>} : vector<1x67xf32>, vector<67x32xf32>, vector<1x32xf32> -> vector<1x32xf32>
    %cst_12 = arith.constant 0.0149253728 : f32
    %32 = vector.broadcast %cst_12 : f32 to vector<1x32xf32>
    %33 = arith.mulf %31, %32 : vector<1x32xf32>
    %34 = vector.broadcast %33 : vector<1x32xf32> to vector<67x32xf32>
    %35 = arith.subf %29, %34 : vector<67x32xf32>
    %36 = arith.mulf %35, %35 : vector<67x32xf32>
    %cst_13 = arith.constant dense<0.000000e+00> : vector<1x32xf32>
    %37 = tpu.matmul %30, %36, %cst_13 {dimension_numbers = #tpu.dot_dimension_numbers<[1], [0], [0], [1], [0, 0, 1, 1], [], []>} : vector<1x67xf32>, vector<67x32xf32>, vector<1x32xf32> -> vector<1x32xf32>
    %cst_14 = arith.constant 0.0149253728 : f32
    %38 = vector.broadcast %cst_14 : f32 to vector<1x32xf32>
    %39 = arith.mulf %37, %38 : vector<1x32xf32>
    %cst_15 = arith.constant 9.99999974E-6 : f32
    %40 = vector.broadcast %cst_15 : f32 to vector<1x32xf32>
    %41 = arith.addf %39, %40 : vector<1x32xf32>
    %42 = math.rsqrt %41 : vector<1x32xf32>
    %43 = vector.broadcast %42 : vector<1x32xf32> to vector<67x32xf32>
    %44 = arith.mulf %35, %43 : vector<67x32xf32>
    %c0_16 = arith.constant 0 : index
    %c0_17 = arith.constant 0 : index
    %45 = vector.load %arg3[%c0_16, %c0_17] : memref<1x32xf32, #tpu.memory_space<vmem>>, vector<1x32xf32>
    %46 = vector.broadcast %45 : vector<1x32xf32> to vector<67x32xf32>
    %47 = arith.mulf %44, %46 : vector<67x32xf32>
    %c0_18 = arith.constant 0 : index
    %c0_19 = arith.constant 0 : index
    %48 = vector.load %arg4[%c0_18, %c0_19] : memref<1x32xf32, #tpu.memory_space<vmem>>, vector<1x32xf32>
    %49 = vector.broadcast %48 : vector<1x32xf32> to vector<67x32xf32>
    %50 = arith.addf %47, %49 : vector<67x32xf32>
    %51 = arith.mulf %50, %50 : vector<67x32xf32>
    %52 = arith.mulf %50, %51 : vector<67x32xf32>
    %cst_20 = arith.constant 4.471500e-02 : f32
    %53 = vector.broadcast %cst_20 : f32 to vector<67x32xf32>
    %54 = arith.mulf %53, %52 : vector<67x32xf32>
    %55 = arith.addf %50, %54 : vector<67x32xf32>
    %cst_21 = arith.constant 0.797884583 : f32
    %56 = vector.broadcast %cst_21 : f32 to vector<67x32xf32>
    %57 = arith.mulf %56, %55 : vector<67x32xf32>
    %58 = math.tanh %57 : vector<67x32xf32>
    %cst_22 = arith.constant 1.000000e+00 : f32
    %59 = vector.broadcast %cst_22 : f32 to vector<67x32xf32>
    %60 = arith.addf %59, %58 : vector<67x32xf32>
    %cst_23 = arith.constant 5.000000e-01 : f32
    %61 = vector.broadcast %cst_23 : f32 to vector<67x32xf32>
    %62 = arith.mulf %61, %60 : vector<67x32xf32>
    %63 = arith.mulf %50, %62 : vector<67x32xf32>
    %c0_24 = arith.constant 0 : index
    %c0_25 = arith.constant 0 : index
    %64 = vector.load %arg27[%c0_24, %c0_25] : memref<67x32xf32, #tpu.memory_space<vmem>>, vector<67x32xf32>
    tpu.vector_store %arg27[%c0_24, %c0_25], %63 {strides = array<i32>} : memref<67x32xf32, #tpu.memory_space<vmem>>, vector<67x32xf32>,
    %cst_26 = arith.constant 0.000000e+00 : f32
    %65 = vector.broadcast %cst_26 : f32 to vector<33x32xf32>
    %c0_27 = arith.constant 0 : index
    %c0_28 = arith.constant 0 : index
    %66 = tpu.strided_load %arg27[%c0_27, %c0_28] {strides = array<i32: 2, 1>} : memref<67x32xf32, #tpu.memory_space<vmem>>, vector<33x32xf32>
    %c0_29 = arith.constant 0 : index
    %c0_30 = arith.constant 0 : index
    %c0_31 = arith.constant 0 : index
    %67 = vector.load %arg5[%c0_29, %c0_30, %c0_31] : memref<6x32x32xf32, #tpu.memory_space<vmem>>, vector<1x32x32xf32>
    %68 = vector.shape_cast %67 : vector<1x32x32xf32> to vector<32x32xf32>
    %cst_32 = arith.constant dense<0.000000e+00> : vector<33x32xf32>
    %69 = tpu.matmul %66, %68, %cst_32 {dimension_numbers = #tpu.dot_dimension_numbers<[1], [0], [0], [1], [0, 0, 1, 1], [], []>} : vector<33x32xf32>, vector<32x32xf32>, vector<33x32xf32> -> vector<33x32xf32>
    %70 = arith.addf %65, %69 : vector<33x32xf32>
    %c1_33 = arith.constant 1 : index
    %c0_34 = arith.constant 0 : index
    %71 = tpu.strided_load %arg27[%c1_33, %c0_34] {strides = array<i32: 2, 1>} : memref<67x32xf32, #tpu.memory_space<vmem>>, vector<33x32xf32>
    %c1_35 = arith.constant 1 : index
    %c0_36 = arith.constant 0 : index
    %c0_37 = arith.constant 0 : index
    %72 = vector.load %arg5[%c1_35, %c0_36, %c0_37] : memref<6x32x32xf32, #tpu.memory_space<vmem>>, vector<1x32x32xf32>
    %73 = vector.shape_cast %72 : vector<1x32x32xf32> to vector<32x32xf32>
    %cst_38 = arith.constant dense<0.000000e+00> : vector<33x32xf32>
    %74 = tpu.matmul %71, %73, %cst_38 {dimension_numbers = #tpu.dot_dimension_numbers<[1], [0], [0], [1], [0, 0, 1, 1], [], []>} : vector<33x32xf32>, vector<32x32xf32>, vector<33x32xf32> -> vector<33x32xf32>
    %75 = arith.addf %70, %74 : vector<33x32xf32>
    %c2_39 = arith.constant 2 : index
    %c0_40 = arith.constant 0 : index
    %76 = tpu.strided_load %arg27[%c2_39, %c0_40] {strides = array<i32: 2, 1>} : memref<67x32xf32, #tpu.memory_space<vmem>>, vector<33x32xf32>
    %c2_41 = arith.constant 2 : index
    %c0_42 = arith.constant 0 : index
    %c0_43 = arith.constant 0 : index
    %77 = vector.load %arg5[%c2_41, %c0_42, %c0_43] : memref<6x32x32xf32, #tpu.memory_space<vmem>>, vector<1x32x32xf32>
    %78 = vector.shape_cast %77 : vector<1x32x32xf32> to vector<32x32xf32>
    %cst_44 = arith.constant dense<0.000000e+00> : vector<33x32xf32>
    %79 = tpu.matmul %76, %78, %cst_44 {dimension_numbers = #tpu.dot_dimension_numbers<[1], [0], [0], [1], [0, 0, 1, 1], [], []>} : vector<33x32xf32>, vector<32x32xf32>, vector<33x32xf32> -> vector<33x32xf32>
    %80 = arith.addf %75, %79 : vector<33x32xf32>
    %81 = arith.mulf %80, %80 : vector<33x32xf32>
    %82 = arith.mulf %80, %81 : vector<33x32xf32>
    %cst_45 = arith.constant 4.471500e-02 : f32
    %83 = vector.broadcast %cst_45 : f32 to vector<33x32xf32>
    %84 = arith.mulf %83, %82 : vector<33x32xf32>
    %85 = arith.addf %80, %84 : vector<33x32xf32>
    %cst_46 = arith.constant 0.797884583 : f32
    %86 = vector.broadcast %cst_46 : f32 to vector<33x32xf32>
    %87 = arith.mulf %86, %85 : vector<33x32xf32>
    %88 = math.tanh %87 : vector<33x32xf32>
    %cst_47 = arith.constant 1.000000e+00 : f32
    %89 = vector.broadcast %cst_47 : f32 to vector<33x32xf32>
    %90 = arith.addf %89, %88 : vector<33x32xf32>
    %cst_48 = arith.constant 5.000000e-01 : f32
    %91 = vector.broadcast %cst_48 : f32 to vector<33x32xf32>
    %92 = arith.mulf %91, %90 : vector<33x32xf32>
    %93 = arith.mulf %80, %92 : vector<33x32xf32>
    %c0_49 = arith.constant 0 : index
    %c0_50 = arith.constant 0 : index
    %94 = vector.load %arg28[%c0_49, %c0_50] : memref<33x32xf32, #tpu.memory_space<vmem>>, vector<33x32xf32>
    tpu.vector_store %arg28[%c0_49, %c0_50], %93 {strides = array<i32>} : memref<33x32xf32, #tpu.memory_space<vmem>>, vector<33x32xf32>,
    %cst_51 = arith.constant 0.000000e+00 : f32
    %95 = vector.broadcast %cst_51 : f32 to vector<16x32xf32>
    %c0_52 = arith.constant 0 : index
    %c0_53 = arith.constant 0 : index
    %96 = tpu.strided_load %arg28[%c0_52, %c0_53] {strides = array<i32: 2, 1>} : memref<33x32xf32, #tpu.memory_space<vmem>>, vector<16x32xf32>
    %c3_54 = arith.constant 3 : index
    %c0_55 = arith.constant 0 : index
    %c0_56 = arith.constant 0 : index
    %97 = vector.load %arg5[%c3_54, %c0_55, %c0_56] : memref<6x32x32xf32, #tpu.memory_space<vmem>>, vector<1x32x32xf32>
    %98 = vector.shape_cast %97 : vector<1x32x32xf32> to vector<32x32xf32>
    %cst_57 = arith.constant dense<0.000000e+00> : vector<16x32xf32>
    %99 = tpu.matmul %96, %98, %cst_57 {dimension_numbers = #tpu.dot_dimension_numbers<[1], [0], [0], [1], [0, 0, 1, 1], [], []>} : vector<16x32xf32>, vector<32x32xf32>, vector<16x32xf32> -> vector<16x32xf32>
    %100 = arith.addf %95, %99 : vector<16x32xf32>
    %c1_58 = arith.constant 1 : index
    %c0_59 = arith.constant 0 : index
    %101 = tpu.strided_load %arg28[%c1_58, %c0_59] {strides = array<i32: 2, 1>} : memref<33x32xf32, #tpu.memory_space<vmem>>, vector<16x32xf32>
    %c4 = arith.constant 4 : index
    %c0_60 = arith.constant 0 : index
    %c0_61 = arith.constant 0 : index
    %102 = vector.load %arg5[%c4, %c0_60, %c0_61] : memref<6x32x32xf32, #tpu.memory_space<vmem>>, vector<1x32x32xf32>
    %103 = vector.shape_cast %102 : vector<1x32x32xf32> to vector<32x32xf32>
    %cst_62 = arith.constant dense<0.000000e+00> : vector<16x32xf32>
    %104 = tpu.matmul %101, %103, %cst_62 {dimension_numbers = #tpu.dot_dimension_numbers<[1], [0], [0], [1], [0, 0, 1, 1], [], []>} : vector<16x32xf32>, vector<32x32xf32>, vector<16x32xf32> -> vector<16x32xf32>
    %105 = arith.addf %100, %104 : vector<16x32xf32>
    %c2_63 = arith.constant 2 : index
    %c0_64 = arith.constant 0 : index
    %106 = tpu.strided_load %arg28[%c2_63, %c0_64] {strides = array<i32: 2, 1>} : memref<33x32xf32, #tpu.memory_space<vmem>>, vector<16x32xf32>
    %c5 = arith.constant 5 : index
    %c0_65 = arith.constant 0 : index
    %c0_66 = arith.constant 0 : index
    %107 = vector.load %arg5[%c5, %c0_65, %c0_66] : memref<6x32x32xf32, #tpu.memory_space<vmem>>, vector<1x32x32xf32>
    %108 = vector.shape_cast %107 : vector<1x32x32xf32> to vector<32x32xf32>
    %cst_67 = arith.constant dense<0.000000e+00> : vector<16x32xf32>
    %109 = tpu.matmul %106, %108, %cst_67 {dimension_numbers = #tpu.dot_dimension_numbers<[1], [0], [0], [1], [0, 0, 1, 1], [], []>} : vector<16x32xf32>, vector<32x32xf32>, vector<16x32xf32> -> vector<16x32xf32>
    %110 = arith.addf %105, %109 : vector<16x32xf32>
    %111 = arith.mulf %110, %110 : vector<16x32xf32>
    %112 = arith.mulf %110, %111 : vector<16x32xf32>
    %cst_68 = arith.constant 4.471500e-02 : f32
    %113 = vector.broadcast %cst_68 : f32 to vector<16x32xf32>
    %114 = arith.mulf %113, %112 : vector<16x32xf32>
    %115 = arith.addf %110, %114 : vector<16x32xf32>
    %cst_69 = arith.constant 0.797884583 : f32
    %116 = vector.broadcast %cst_69 : f32 to vector<16x32xf32>
    %117 = arith.mulf %116, %115 : vector<16x32xf32>
    %118 = math.tanh %117 : vector<16x32xf32>
    %cst_70 = arith.constant 1.000000e+00 : f32
    %119 = vector.broadcast %cst_70 : f32 to vector<16x32xf32>
    %120 = arith.addf %119, %118 : vector<16x32xf32>
    %cst_71 = arith.constant 5.000000e-01 : f32
    %121 = vector.broadcast %cst_71 : f32 to vector<16x32xf32>
    %122 = arith.mulf %121, %120 : vector<16x32xf32>
    %123 = arith.mulf %110, %122 : vector<16x32xf32>
    %c0_72 = arith.constant 0 : index
    %c0_73 = arith.constant 0 : index
    %124 = vector.load %arg6[%c0_72, %c0_73] : memref<1x32xf32, #tpu.memory_space<vmem>>, vector<1x32xf32>
    %c0_74 = arith.constant 0 : index
    %c0_75 = arith.constant 0 : index
    %125 = vector.load %arg7[%c0_74, %c0_75] : memref<1x32xf32, #tpu.memory_space<vmem>>, vector<1x32xf32>
    %cst_76 = arith.constant dense<0.000000e+00> : vector<16xf32>
    %126 = vector.multi_reduction <add>, %123, %cst_76 [1] : vector<16x32xf32> to vector<16xf32>
    %127 = vector.shape_cast %126 : vector<16xf32> to vector<16x1xf32>
    %cst_77 = arith.constant 3.200000e+01 : f32
    %128 = vector.broadcast %cst_77 : f32 to vector<16x1xf32>
    %129 = arith.divf %127, %128 : vector<16x1xf32>
    %130 = vector.broadcast %129 : vector<16x1xf32> to vector<16x32xf32>
    %131 = arith.subf %123, %130 : vector<16x32xf32>
    %132 = arith.mulf %131, %131 : vector<16x32xf32>
    %cst_78 = arith.constant dense<0.000000e+00> : vector<16xf32>
    %133 = vector.multi_reduction <add>, %132, %cst_78 [1] : vector<16x32xf32> to vector<16xf32>
    %134 = vector.shape_cast %133 : vector<16xf32> to vector<16x1xf32>
    %cst_79 = arith.constant 3.200000e+01 : f32
    %135 = vector.broadcast %cst_79 : f32 to vector<16x1xf32>
    %136 = arith.divf %134, %135 : vector<16x1xf32>
    %137 = vector.broadcast %129 : vector<16x1xf32> to vector<16x32xf32>
    %138 = arith.subf %123, %137 : vector<16x32xf32>
    %cst_80 = arith.constant 9.99999974E-6 : f32
    %139 = vector.broadcast %cst_80 : f32 to vector<16x1xf32>
    %140 = arith.addf %136, %139 : vector<16x1xf32>
    %141 = math.rsqrt %140 : vector<16x1xf32>
    %142 = vector.broadcast %141 : vector<16x1xf32> to vector<16x32xf32>
    %143 = arith.mulf %138, %142 : vector<16x32xf32>
    %144 = vector.broadcast %124 : vector<1x32xf32> to vector<16x32xf32>
    %145 = arith.mulf %143, %144 : vector<16x32xf32>
    %146 = vector.broadcast %125 : vector<1x32xf32> to vector<16x32xf32>
    %147 = arith.addf %145, %146 : vector<16x32xf32>
    %148 = arith.truncf %147 : vector<16x32xf32> to vector<16x32xbf16>
    %c0_81 = arith.constant 0 : index
    %c0_82 = arith.constant 0 : index
    %149 = vector.load %arg8[%c0_81, %c0_82] : memref<32x128xbf16, #tpu.memory_space<vmem>>, vector<32x128xbf16>
    %cst_83 = arith.constant dense<0.000000e+00> : vector<16x128xf32>
    %150 = tpu.matmul %148, %149, %cst_83 {dimension_numbers = #tpu.dot_dimension_numbers<[1], [0], [0], [1], [0, 0, 1, 1], [], []>} : vector<16x32xbf16>, vector<32x128xbf16>, vector<16x128xf32> -> vector<16x128xf32>
    %c0_84 = arith.constant 0 : index
    %c0_85 = arith.constant 0 : index
    %151 = vector.load %arg9[%c0_84, %c0_85] : memref<1x128xf32, #tpu.memory_space<vmem>>, vector<1x128xf32>
    %152 = vector.broadcast %151 : vector<1x128xf32> to vector<16x128xf32>
    %153 = arith.addf %150, %152 : vector<16x128xf32>
    %cst_86 = arith.constant 0.000000e+00 : f32
    %154 = vector.broadcast %cst_86 : f32 to vector<20x128xf32>
    %c0_87 = arith.constant 0 : index
    %c0_88 = arith.constant 0 : index
    %155 = vector.load %arg29[%c0_87, %c0_88] : memref<20x128xf32, #tpu.memory_space<vmem>>, vector<20x128xf32>
    tpu.vector_store %arg29[%c0_87, %c0_88], %154 {strides = array<i32>} : memref<20x128xf32, #tpu.memory_space<vmem>>, vector<20x128xf32>,
    %c2_89 = arith.constant 2 : index
    %c0_90 = arith.constant 0 : index
    %156 = vector.load %arg29[%c2_89, %c0_90] : memref<20x128xf32, #tpu.memory_space<vmem>>, vector<16x128xf32>
    tpu.vector_store %arg29[%c2_89, %c0_90], %153 {strides = array<i32>} : memref<20x128xf32, #tpu.memory_space<vmem>>, vector<16x128xf32>,
    %cst_91 = arith.constant 0.000000e+00 : f32
    %157 = vector.broadcast %cst_91 : f32 to vector<16x128xf32>
    %c0_92 = arith.constant 0 : index
    %c0_93 = arith.constant 0 : index
    %158 = vector.load %arg29[%c0_92, %c0_93] : memref<20x128xf32, #tpu.memory_space<vmem>>, vector<16x128xf32>
    %159 = arith.truncf %158 : vector<16x128xf32> to vector<16x128xbf16>
    %c0_94 = arith.constant 0 : index
    %c0_95 = arith.constant 0 : index
    %c0_96 = arith.constant 0 : index
    %160 = vector.load %arg10[%c0_94, %c0_95, %c0_96] : memref<4x128x128xbf16, #tpu.memory_space<vmem>>, vector<1x128x128xbf16>
    %161 = vector.shape_cast %160 : vector<1x128x128xbf16> to vector<128x128xbf16>
    %cst_97 = arith.constant dense<0.000000e+00> : vector<16x128xf32>
    %162 = tpu.matmul %159, %161, %cst_97 {dimension_numbers = #tpu.dot_dimension_numbers<[1], [0], [0], [1], [0, 0, 1, 1], [], []>} : vector<16x128xbf16>, vector<128x128xbf16>, vector<16x128xf32> -> vector<16x128xf32>
    %163 = arith.addf %157, %162 : vector<16x128xf32>
    %c1_98 = arith.constant 1 : index
    %c0_99 = arith.constant 0 : index
    %164 = vector.load %arg29[%c1_98, %c0_99] : memref<20x128xf32, #tpu.memory_space<vmem>>, vector<16x128xf32>
    %165 = arith.truncf %164 : vector<16x128xf32> to vector<16x128xbf16>
    %c1_100 = arith.constant 1 : index
    %c0_101 = arith.constant 0 : index
    %c0_102 = arith.constant 0 : index
    %166 = vector.load %arg10[%c1_100, %c0_101, %c0_102] : memref<4x128x128xbf16, #tpu.memory_space<vmem>>, vector<1x128x128xbf16>
    %167 = vector.shape_cast %166 : vector<1x128x128xbf16> to vector<128x128xbf16>
    %cst_103 = arith.constant dense<0.000000e+00> : vector<16x128xf32>
    %168 = tpu.matmul %165, %167, %cst_103 {dimension_numbers = #tpu.dot_dimension_numbers<[1], [0], [0], [1], [0, 0, 1, 1], [], []>} : vector<16x128xbf16>, vector<128x128xbf16>, vector<16x128xf32> -> vector<16x128xf32>
    %169 = arith.addf %163, %168 : vector<16x128xf32>
    %c2_104 = arith.constant 2 : index
    %c0_105 = arith.constant 0 : index
    %170 = vector.load %arg29[%c2_104, %c0_105] : memref<20x128xf32, #tpu.memory_space<vmem>>, vector<16x128xf32>
    %171 = arith.truncf %170 : vector<16x128xf32> to vector<16x128xbf16>
    %c2_106 = arith.constant 2 : index
    %c0_107 = arith.constant 0 : index
    %c0_108 = arith.constant 0 : index
    %172 = vector.load %arg10[%c2_106, %c0_107, %c0_108] : memref<4x128x128xbf16, #tpu.memory_space<vmem>>, vector<1x128x128xbf16>
    %173 = vector.shape_cast %172 : vector<1x128x128xbf16> to vector<128x128xbf16>
    %cst_109 = arith.constant dense<0.000000e+00> : vector<16x128xf32>
    %174 = tpu.matmul %171, %173, %cst_109 {dimension_numbers = #tpu.dot_dimension_numbers<[1], [0], [0], [1], [0, 0, 1, 1], [], []>} : vector<16x128xbf16>, vector<128x128xbf16>, vector<16x128xf32> -> vector<16x128xf32>
    %175 = arith.addf %169, %174 : vector<16x128xf32>
    %c3_110 = arith.constant 3 : index
    %c0_111 = arith.constant 0 : index
    %176 = vector.load %arg29[%c3_110, %c0_111] : memref<20x128xf32, #tpu.memory_space<vmem>>, vector<16x128xf32>
    %177 = arith.truncf %176 : vector<16x128xf32> to vector<16x128xbf16>
    %c3_112 = arith.constant 3 : index
    %c0_113 = arith.constant 0 : index
    %c0_114 = arith.constant 0 : index
    %178 = vector.load %arg10[%c3_112, %c0_113, %c0_114] : memref<4x128x128xbf16, #tpu.memory_space<vmem>>, vector<1x128x128xbf16>
    %179 = vector.shape_cast %178 : vector<1x128x128xbf16> to vector<128x128xbf16>
    %cst_115 = arith.constant dense<0.000000e+00> : vector<16x128xf32>
    %180 = tpu.matmul %177, %179, %cst_115 {dimension_numbers = #tpu.dot_dimension_numbers<[1], [0], [0], [1], [0, 0, 1, 1], [], []>} : vector<16x128xbf16>, vector<128x128xbf16>, vector<16x128xf32> -> vector<16x128xf32>
    %181 = arith.addf %175, %180 : vector<16x128xf32>
    %c0_116 = arith.constant 0 : index
    %c0_117 = arith.constant 0 : index
    %182 = vector.load %arg11[%c0_116, %c0_117] : memref<1x128xf32, #tpu.memory_space<vmem>>, vector<1x128xf32>
    %183 = vector.broadcast %182 : vector<1x128xf32> to vector<16x128xf32>
    %184 = arith.addf %181, %183 : vector<16x128xf32>
    %185 = arith.mulf %184, %184 : vector<16x128xf32>
    %186 = arith.mulf %184, %185 : vector<16x128xf32>
    %cst_118 = arith.constant 4.471500e-02 : f32
    %187 = vector.broadcast %cst_118 : f32 to vector<16x128xf32>
    %188 = arith.mulf %187, %186 : vector<16x128xf32>
    %189 = arith.addf %184, %188 : vector<16x128xf32>
    %cst_119 = arith.constant 0.797884583 : f32
    %190 = vector.broadcast %cst_119 : f32 to vector<16x128xf32>
    %191 = arith.mulf %190, %189 : vector<16x128xf32>
    %192 = math.tanh %191 : vector<16x128xf32>
    %cst_120 = arith.constant 1.000000e+00 : f32
    %193 = vector.broadcast %cst_120 : f32 to vector<16x128xf32>
    %194 = arith.addf %193, %192 : vector<16x128xf32>
    %cst_121 = arith.constant 5.000000e-01 : f32
    %195 = vector.broadcast %cst_121 : f32 to vector<16x128xf32>
    %196 = arith.mulf %195, %194 : vector<16x128xf32>
    %197 = arith.mulf %184, %196 : vector<16x128xf32>
    %198 = arith.addf %153, %197 : vector<16x128xf32>
    %199 = arith.truncf %198 : vector<16x128xf32> to vector<16x128xbf16>
    %c0_122 = arith.constant 0 : index
    %c0_123 = arith.constant 0 : index
    %c0_124 = arith.constant 0 : index
    %200 = vector.load %arg12[%c0_122, %c0_123, %c0_124] : memref<2x128x384xbf16, #tpu.memory_space<vmem>>, vector<1x128x384xbf16>
    %201 = vector.shape_cast %200 : vector<1x128x384xbf16> to vector<128x384xbf16>
    %cst_125 = arith.constant dense<0.000000e+00> : vector<16x384xf32>
    %202 = tpu.matmul %199, %201, %cst_125 {dimension_numbers = #tpu.dot_dimension_numbers<[1], [0], [0], [1], [0, 0, 1, 1], [], []>} : vector<16x128xbf16>, vector<128x384xbf16>, vector<16x384xf32> -> vector<16x384xf32>
    %c0_126 = arith.constant 0 : index
    %c0_127 = arith.constant 0 : index
    %c0_128 = arith.constant 0 : index
    %203 = vector.load %arg13[%c0_126, %c0_127, %c0_128] : memref<2x1x384xf32, #tpu.memory_space<vmem>>, vector<1x1x384xf32>
    %204 = vector.shape_cast %203 : vector<1x1x384xf32> to vector<1x384xf32>
    %205 = vector.broadcast %204 : vector<1x384xf32> to vector<16x384xf32>
    %206 = arith.addf %202, %205 : vector<16x384xf32>
    %207 = arith.truncf %206 : vector<16x384xf32> to vector<16x384xbf16>
    %c0_129 = arith.constant 0 : index
    %c0_130 = arith.constant 0 : index
    %c0_131 = arith.constant 0 : index
    %208 = vector.load %arg14[%c0_129, %c0_130, %c0_131] : memref<2x128x128xbf16, #tpu.memory_space<vmem>>, vector<1x128x128xbf16>
    %209 = vector.shape_cast %208 : vector<1x128x128xbf16> to vector<128x128xbf16>
    %cst_132 = arith.constant 0.000000e+00 : f32
    %210 = vector.broadcast %cst_132 : f32 to vector<16x128xf32>
    %211 = vector.extract_strided_slice %207 {offsets = [0, 0], sizes = [16, 32], strides = [1, 1]} : vector<16x384xbf16> to vector<16x32xbf16>
    %212 = vector.extract_strided_slice %207 {offsets = [0, 128], sizes = [16, 32], strides = [1, 1]} : vector<16x384xbf16> to vector<16x32xbf16>
    %213 = vector.extract_strided_slice %207 {offsets = [0, 256], sizes = [16, 32], strides = [1, 1]} : vector<16x384xbf16> to vector<16x32xbf16>
    %cst_133 = arith.constant dense<0.000000e+00> : vector<16x16xf32>
    %214 = tpu.matmul %211, %212, %cst_133 {dimension_numbers = #tpu.dot_dimension_numbers<[1], [1], [0], [0], [0, 0, 1, 0], [], []>} : vector<16x32xbf16>, vector<16x32xbf16>, vector<16x16xf32> -> vector<16x16xf32>
    %cst_134 = arith.constant dense<0xFF800000> : vector<16xf32>
    %215 = vector.multi_reduction <maximumf>, %214, %cst_134 [1] : vector<16x16xf32> to vector<16xf32>
    %216 = vector.shape_cast %215 : vector<16xf32> to vector<16x1xf32>
    %217 = vector.broadcast %216 : vector<16x1xf32> to vector<16x16xf32>
    %218 = arith.subf %214, %217 : vector<16x16xf32>
    %219 = math.exp %218 : vector<16x16xf32>
    %cst_135 = arith.constant dense<0.000000e+00> : vector<16xf32>
    %220 = vector.multi_reduction <add>, %219, %cst_135 [1] : vector<16x16xf32> to vector<16xf32>
    %221 = vector.shape_cast %220 : vector<16xf32> to vector<16x1xf32>
    %222 = tpu.reciprocal %221 {approx = true} : vector<16x1xf32> -> vector<16x1xf32>
    %223 = vector.broadcast %222 : vector<16x1xf32> to vector<16x16xf32>
    %224 = arith.mulf %219, %223 : vector<16x16xf32>
    %225 = arith.truncf %224 : vector<16x16xf32> to vector<16x16xbf16>
    %cst_136 = arith.constant dense<0.000000e+00> : vector<16x32xf32>
    %226 = tpu.matmul %225, %213, %cst_136 {dimension_numbers = #tpu.dot_dimension_numbers<[1], [0], [0], [1], [0, 0, 1, 1], [], []>} : vector<16x16xbf16>, vector<16x32xbf16>, vector<16x32xf32> -> vector<16x32xf32>
    %227 = arith.truncf %226 : vector<16x32xf32> to vector<16x32xbf16>
    %228 = vector.extract_strided_slice %209 {offsets = [0, 0], sizes = [32, 128], strides = [1, 1]} : vector<128x128xbf16> to vector<32x128xbf16>
    %cst_137 = arith.constant dense<0.000000e+00> : vector<16x128xf32>
    %229 = tpu.matmul %227, %228, %cst_137 {dimension_numbers = #tpu.dot_dimension_numbers<[1], [0], [0], [1], [0, 0, 1, 1], [], []>} : vector<16x32xbf16>, vector<32x128xbf16>, vector<16x128xf32> -> vector<16x128xf32>
    %230 = arith.addf %210, %229 : vector<16x128xf32>
    %231 = vector.extract_strided_slice %207 {offsets = [0, 32], sizes = [16, 32], strides = [1, 1]} : vector<16x384xbf16> to vector<16x32xbf16>
    %232 = vector.extract_strided_slice %207 {offsets = [0, 160], sizes = [16, 32], strides = [1, 1]} : vector<16x384xbf16> to vector<16x32xbf16>
    %233 = vector.extract_strided_slice %207 {offsets = [0, 288], sizes = [16, 32], strides = [1, 1]} : vector<16x384xbf16> to vector<16x32xbf16>
    %cst_138 = arith.constant dense<0.000000e+00> : vector<16x16xf32>
    %234 = tpu.matmul %231, %232, %cst_138 {dimension_numbers = #tpu.dot_dimension_numbers<[1], [1], [0], [0], [0, 0, 1, 0], [], []>} : vector<16x32xbf16>, vector<16x32xbf16>, vector<16x16xf32> -> vector<16x16xf32>
    %cst_139 = arith.constant dense<0xFF800000> : vector<16xf32>
    %235 = vector.multi_reduction <maximumf>, %234, %cst_139 [1] : vector<16x16xf32> to vector<16xf32>
    %236 = vector.shape_cast %235 : vector<16xf32> to vector<16x1xf32>
    %237 = vector.broadcast %236 : vector<16x1xf32> to vector<16x16xf32>
    %238 = arith.subf %234, %237 : vector<16x16xf32>
    %239 = math.exp %238 : vector<16x16xf32>
    %cst_140 = arith.constant dense<0.000000e+00> : vector<16xf32>
    %240 = vector.multi_reduction <add>, %239, %cst_140 [1] : vector<16x16xf32> to vector<16xf32>
    %241 = vector.shape_cast %240 : vector<16xf32> to vector<16x1xf32>
    %242 = tpu.reciprocal %241 {approx = true} : vector<16x1xf32> -> vector<16x1xf32>
    %243 = vector.broadcast %242 : vector<16x1xf32> to vector<16x16xf32>
    %244 = arith.mulf %239, %243 : vector<16x16xf32>
    %245 = arith.truncf %244 : vector<16x16xf32> to vector<16x16xbf16>
    %cst_141 = arith.constant dense<0.000000e+00> : vector<16x32xf32>
    %246 = tpu.matmul %245, %233, %cst_141 {dimension_numbers = #tpu.dot_dimension_numbers<[1], [0], [0], [1], [0, 0, 1, 1], [], []>} : vector<16x16xbf16>, vector<16x32xbf16>, vector<16x32xf32> -> vector<16x32xf32>
    %247 = arith.truncf %246 : vector<16x32xf32> to vector<16x32xbf16>
    %248 = vector.extract_strided_slice %209 {offsets = [32, 0], sizes = [32, 128], strides = [1, 1]} : vector<128x128xbf16> to vector<32x128xbf16>
    %cst_142 = arith.constant dense<0.000000e+00> : vector<16x128xf32>
    %249 = tpu.matmul %247, %248, %cst_142 {dimension_numbers = #tpu.dot_dimension_numbers<[1], [0], [0], [1], [0, 0, 1, 1], [], []>} : vector<16x32xbf16>, vector<32x128xbf16>, vector<16x128xf32> -> vector<16x128xf32>
    %250 = arith.addf %230, %249 : vector<16x128xf32>
    %251 = vector.extract_strided_slice %207 {offsets = [0, 64], sizes = [16, 32], strides = [1, 1]} : vector<16x384xbf16> to vector<16x32xbf16>
    %252 = vector.extract_strided_slice %207 {offsets = [0, 192], sizes = [16, 32], strides = [1, 1]} : vector<16x384xbf16> to vector<16x32xbf16>
    %253 = vector.extract_strided_slice %207 {offsets = [0, 320], sizes = [16, 32], strides = [1, 1]} : vector<16x384xbf16> to vector<16x32xbf16>
    %cst_143 = arith.constant dense<0.000000e+00> : vector<16x16xf32>
    %254 = tpu.matmul %251, %252, %cst_143 {dimension_numbers = #tpu.dot_dimension_numbers<[1], [1], [0], [0], [0, 0, 1, 0], [], []>} : vector<16x32xbf16>, vector<16x32xbf16>, vector<16x16xf32> -> vector<16x16xf32>
    %cst_144 = arith.constant dense<0xFF800000> : vector<16xf32>
    %255 = vector.multi_reduction <maximumf>, %254, %cst_144 [1] : vector<16x16xf32> to vector<16xf32>
    %256 = vector.shape_cast %255 : vector<16xf32> to vector<16x1xf32>
    %257 = vector.broadcast %256 : vector<16x1xf32> to vector<16x16xf32>
    %258 = arith.subf %254, %257 : vector<16x16xf32>
    %259 = math.exp %258 : vector<16x16xf32>
    %cst_145 = arith.constant dense<0.000000e+00> : vector<16xf32>
    %260 = vector.multi_reduction <add>, %259, %cst_145 [1] : vector<16x16xf32> to vector<16xf32>
    %261 = vector.shape_cast %260 : vector<16xf32> to vector<16x1xf32>
    %262 = tpu.reciprocal %261 {approx = true} : vector<16x1xf32> -> vector<16x1xf32>
    %263 = vector.broadcast %262 : vector<16x1xf32> to vector<16x16xf32>
    %264 = arith.mulf %259, %263 : vector<16x16xf32>
    %265 = arith.truncf %264 : vector<16x16xf32> to vector<16x16xbf16>
    %cst_146 = arith.constant dense<0.000000e+00> : vector<16x32xf32>
    %266 = tpu.matmul %265, %253, %cst_146 {dimension_numbers = #tpu.dot_dimension_numbers<[1], [0], [0], [1], [0, 0, 1, 1], [], []>} : vector<16x16xbf16>, vector<16x32xbf16>, vector<16x32xf32> -> vector<16x32xf32>
    %267 = arith.truncf %266 : vector<16x32xf32> to vector<16x32xbf16>
    %268 = vector.extract_strided_slice %209 {offsets = [64, 0], sizes = [32, 128], strides = [1, 1]} : vector<128x128xbf16> to vector<32x128xbf16>
    %cst_147 = arith.constant dense<0.000000e+00> : vector<16x128xf32>
    %269 = tpu.matmul %267, %268, %cst_147 {dimension_numbers = #tpu.dot_dimension_numbers<[1], [0], [0], [1], [0, 0, 1, 1], [], []>} : vector<16x32xbf16>, vector<32x128xbf16>, vector<16x128xf32> -> vector<16x128xf32>
    %270 = arith.addf %250, %269 : vector<16x128xf32>
    %271 = vector.extract_strided_slice %207 {offsets = [0, 96], sizes = [16, 32], strides = [1, 1]} : vector<16x384xbf16> to vector<16x32xbf16>
    %272 = vector.extract_strided_slice %207 {offsets = [0, 224], sizes = [16, 32], strides = [1, 1]} : vector<16x384xbf16> to vector<16x32xbf16>
    %273 = vector.extract_strided_slice %207 {offsets = [0, 352], sizes = [16, 32], strides = [1, 1]} : vector<16x384xbf16> to vector<16x32xbf16>
    %cst_148 = arith.constant dense<0.000000e+00> : vector<16x16xf32>
    %274 = tpu.matmul %271, %272, %cst_148 {dimension_numbers = #tpu.dot_dimension_numbers<[1], [1], [0], [0], [0, 0, 1, 0], [], []>} : vector<16x32xbf16>, vector<16x32xbf16>, vector<16x16xf32> -> vector<16x16xf32>
    %cst_149 = arith.constant dense<0xFF800000> : vector<16xf32>
    %275 = vector.multi_reduction <maximumf>, %274, %cst_149 [1] : vector<16x16xf32> to vector<16xf32>
    %276 = vector.shape_cast %275 : vector<16xf32> to vector<16x1xf32>
    %277 = vector.broadcast %276 : vector<16x1xf32> to vector<16x16xf32>
    %278 = arith.subf %274, %277 : vector<16x16xf32>
    %279 = math.exp %278 : vector<16x16xf32>
    %cst_150 = arith.constant dense<0.000000e+00> : vector<16xf32>
    %280 = vector.multi_reduction <add>, %279, %cst_150 [1] : vector<16x16xf32> to vector<16xf32>
    %281 = vector.shape_cast %280 : vector<16xf32> to vector<16x1xf32>
    %282 = tpu.reciprocal %281 {approx = true} : vector<16x1xf32> -> vector<16x1xf32>
    %283 = vector.broadcast %282 : vector<16x1xf32> to vector<16x16xf32>
    %284 = arith.mulf %279, %283 : vector<16x16xf32>
    %285 = arith.truncf %284 : vector<16x16xf32> to vector<16x16xbf16>
    %cst_151 = arith.constant dense<0.000000e+00> : vector<16x32xf32>
    %286 = tpu.matmul %285, %273, %cst_151 {dimension_numbers = #tpu.dot_dimension_numbers<[1], [0], [0], [1], [0, 0, 1, 1], [], []>} : vector<16x16xbf16>, vector<16x32xbf16>, vector<16x32xf32> -> vector<16x32xf32>
    %287 = arith.truncf %286 : vector<16x32xf32> to vector<16x32xbf16>
    %288 = vector.extract_strided_slice %209 {offsets = [96, 0], sizes = [32, 128], strides = [1, 1]} : vector<128x128xbf16> to vector<32x128xbf16>
    %cst_152 = arith.constant dense<0.000000e+00> : vector<16x128xf32>
    %289 = tpu.matmul %287, %288, %cst_152 {dimension_numbers = #tpu.dot_dimension_numbers<[1], [0], [0], [1], [0, 0, 1, 1], [], []>} : vector<16x32xbf16>, vector<32x128xbf16>, vector<16x128xf32> -> vector<16x128xf32>
    %290 = arith.addf %270, %289 : vector<16x128xf32>
    %291 = arith.addf %198, %290 : vector<16x128xf32>
    %c0_153 = arith.constant 0 : index
    %c0_154 = arith.constant 0 : index
    %c0_155 = arith.constant 0 : index
    %292 = vector.load %arg15[%c0_153, %c0_154, %c0_155] : memref<2x1x128xf32, #tpu.memory_space<vmem>>, vector<1x1x128xf32>
    %293 = vector.shape_cast %292 : vector<1x1x128xf32> to vector<1x128xf32>
    %294 = vector.broadcast %293 : vector<1x128xf32> to vector<16x128xf32>
    %295 = arith.addf %291, %294 : vector<16x128xf32>
    %c0_156 = arith.constant 0 : index
    %c0_157 = arith.constant 0 : index
    %c0_158 = arith.constant 0 : index
    %296 = vector.load %arg16[%c0_156, %c0_157, %c0_158] : memref<2x1x128xf32, #tpu.memory_space<vmem>>, vector<1x1x128xf32>
    %297 = vector.shape_cast %296 : vector<1x1x128xf32> to vector<1x128xf32>
    %c0_159 = arith.constant 0 : index
    %c0_160 = arith.constant 0 : index
    %c0_161 = arith.constant 0 : index
    %298 = vector.load %arg17[%c0_159, %c0_160, %c0_161] : memref<2x1x128xf32, #tpu.memory_space<vmem>>, vector<1x1x128xf32>
    %299 = vector.shape_cast %298 : vector<1x1x128xf32> to vector<1x128xf32>
    %cst_162 = arith.constant dense<0.000000e+00> : vector<16xf32>
    %300 = vector.multi_reduction <add>, %295, %cst_162 [1] : vector<16x128xf32> to vector<16xf32>
    %301 = vector.shape_cast %300 : vector<16xf32> to vector<16x1xf32>
    %cst_163 = arith.constant 1.280000e+02 : f32
    %302 = vector.broadcast %cst_163 : f32 to vector<16x1xf32>
    %303 = arith.divf %301, %302 : vector<16x1xf32>
    %304 = vector.broadcast %303 : vector<16x1xf32> to vector<16x128xf32>
    %305 = arith.subf %295, %304 : vector<16x128xf32>
    %306 = arith.mulf %305, %305 : vector<16x128xf32>
    %cst_164 = arith.constant dense<0.000000e+00> : vector<16xf32>
    %307 = vector.multi_reduction <add>, %306, %cst_164 [1] : vector<16x128xf32> to vector<16xf32>
    %308 = vector.shape_cast %307 : vector<16xf32> to vector<16x1xf32>
    %cst_165 = arith.constant 1.280000e+02 : f32
    %309 = vector.broadcast %cst_165 : f32 to vector<16x1xf32>
    %310 = arith.divf %308, %309 : vector<16x1xf32>
    %311 = vector.broadcast %303 : vector<16x1xf32> to vector<16x128xf32>
    %312 = arith.subf %295, %311 : vector<16x128xf32>
    %cst_166 = arith.constant 9.99999974E-6 : f32
    %313 = vector.broadcast %cst_166 : f32 to vector<16x1xf32>
    %314 = arith.addf %310, %313 : vector<16x1xf32>
    %315 = math.rsqrt %314 : vector<16x1xf32>
    %316 = vector.broadcast %315 : vector<16x1xf32> to vector<16x128xf32>
    %317 = arith.mulf %312, %316 : vector<16x128xf32>
    %318 = vector.broadcast %297 : vector<1x128xf32> to vector<16x128xf32>
    %319 = arith.mulf %317, %318 : vector<16x128xf32>
    %320 = vector.broadcast %299 : vector<1x128xf32> to vector<16x128xf32>
    %321 = arith.addf %319, %320 : vector<16x128xf32>
    %322 = arith.truncf %321 : vector<16x128xf32> to vector<16x128xbf16>
    %c0_167 = arith.constant 0 : index
    %c0_168 = arith.constant 0 : index
    %c0_169 = arith.constant 0 : index
    %323 = vector.load %arg18[%c0_167, %c0_168, %c0_169] : memref<2x128x256xbf16, #tpu.memory_space<vmem>>, vector<1x128x256xbf16>
    %324 = vector.shape_cast %323 : vector<1x128x256xbf16> to vector<128x256xbf16>
    %cst_170 = arith.constant dense<0.000000e+00> : vector<16x256xf32>
    %325 = tpu.matmul %322, %324, %cst_170 {dimension_numbers = #tpu.dot_dimension_numbers<[1], [0], [0], [1], [0, 0, 1, 1], [], []>} : vector<16x128xbf16>, vector<128x256xbf16>, vector<16x256xf32> -> vector<16x256xf32>
    %c0_171 = arith.constant 0 : index
    %c0_172 = arith.constant 0 : index
    %c0_173 = arith.constant 0 : index
    %326 = vector.load %arg19[%c0_171, %c0_172, %c0_173] : memref<2x1x256xf32, #tpu.memory_space<vmem>>, vector<1x1x256xf32>
    %327 = vector.shape_cast %326 : vector<1x1x256xf32> to vector<1x256xf32>
    %328 = vector.broadcast %327 : vector<1x256xf32> to vector<16x256xf32>
    %329 = arith.addf %325, %328 : vector<16x256xf32>
    %330 = arith.mulf %329, %329 : vector<16x256xf32>
    %331 = arith.mulf %329, %330 : vector<16x256xf32>
    %cst_174 = arith.constant 4.471500e-02 : f32
    %332 = vector.broadcast %cst_174 : f32 to vector<16x256xf32>
    %333 = arith.mulf %332, %331 : vector<16x256xf32>
    %334 = arith.addf %329, %333 : vector<16x256xf32>
    %cst_175 = arith.constant 0.797884583 : f32
    %335 = vector.broadcast %cst_175 : f32 to vector<16x256xf32>
    %336 = arith.mulf %335, %334 : vector<16x256xf32>
    %337 = math.tanh %336 : vector<16x256xf32>
    %cst_176 = arith.constant 1.000000e+00 : f32
    %338 = vector.broadcast %cst_176 : f32 to vector<16x256xf32>
    %339 = arith.addf %338, %337 : vector<16x256xf32>
    %cst_177 = arith.constant 5.000000e-01 : f32
    %340 = vector.broadcast %cst_177 : f32 to vector<16x256xf32>
    %341 = arith.mulf %340, %339 : vector<16x256xf32>
    %342 = arith.mulf %329, %341 : vector<16x256xf32>
    %343 = arith.truncf %342 : vector<16x256xf32> to vector<16x256xbf16>
    %c0_178 = arith.constant 0 : index
    %c0_179 = arith.constant 0 : index
    %c0_180 = arith.constant 0 : index
    %344 = vector.load %arg20[%c0_178, %c0_179, %c0_180] : memref<2x256x128xbf16, #tpu.memory_space<vmem>>, vector<1x256x128xbf16>
    %345 = vector.shape_cast %344 : vector<1x256x128xbf16> to vector<256x128xbf16>
    %cst_181 = arith.constant dense<0.000000e+00> : vector<16x128xf32>
    %346 = tpu.matmul %343, %345, %cst_181 {dimension_numbers = #tpu.dot_dimension_numbers<[1], [0], [0], [1], [0, 0, 1, 1], [], []>} : vector<16x256xbf16>, vector<256x128xbf16>, vector<16x128xf32> -> vector<16x128xf32>
    %c0_182 = arith.constant 0 : index
    %c0_183 = arith.constant 0 : index
    %c0_184 = arith.constant 0 : index
    %347 = vector.load %arg21[%c0_182, %c0_183, %c0_184] : memref<2x1x128xf32, #tpu.memory_space<vmem>>, vector<1x1x128xf32>
    %348 = vector.shape_cast %347 : vector<1x1x128xf32> to vector<1x128xf32>
    %349 = vector.broadcast %348 : vector<1x128xf32> to vector<16x128xf32>
    %350 = arith.addf %346, %349 : vector<16x128xf32>
    %351 = arith.addf %321, %350 : vector<16x128xf32>
    %c0_185 = arith.constant 0 : index
    %c0_186 = arith.constant 0 : index
    %c0_187 = arith.constant 0 : index
    %352 = vector.load %arg22[%c0_185, %c0_186, %c0_187] : memref<2x1x128xf32, #tpu.memory_space<vmem>>, vector<1x1x128xf32>
    %353 = vector.shape_cast %352 : vector<1x1x128xf32> to vector<1x128xf32>
    %c0_188 = arith.constant 0 : index
    %c0_189 = arith.constant 0 : index
    %c0_190 = arith.constant 0 : index
    %354 = vector.load %arg23[%c0_188, %c0_189, %c0_190] : memref<2x1x128xf32, #tpu.memory_space<vmem>>, vector<1x1x128xf32>
    %355 = vector.shape_cast %354 : vector<1x1x128xf32> to vector<1x128xf32>
    %cst_191 = arith.constant dense<0.000000e+00> : vector<16xf32>
    %356 = vector.multi_reduction <add>, %351, %cst_191 [1] : vector<16x128xf32> to vector<16xf32>
    %357 = vector.shape_cast %356 : vector<16xf32> to vector<16x1xf32>
    %cst_192 = arith.constant 1.280000e+02 : f32
    %358 = vector.broadcast %cst_192 : f32 to vector<16x1xf32>
    %359 = arith.divf %357, %358 : vector<16x1xf32>
    %360 = vector.broadcast %359 : vector<16x1xf32> to vector<16x128xf32>
    %361 = arith.subf %351, %360 : vector<16x128xf32>
    %362 = arith.mulf %361, %361 : vector<16x128xf32>
    %cst_193 = arith.constant dense<0.000000e+00> : vector<16xf32>
    %363 = vector.multi_reduction <add>, %362, %cst_193 [1] : vector<16x128xf32> to vector<16xf32>
    %364 = vector.shape_cast %363 : vector<16xf32> to vector<16x1xf32>
    %cst_194 = arith.constant 1.280000e+02 : f32
    %365 = vector.broadcast %cst_194 : f32 to vector<16x1xf32>
    %366 = arith.divf %364, %365 : vector<16x1xf32>
    %367 = vector.broadcast %359 : vector<16x1xf32> to vector<16x128xf32>
    %368 = arith.subf %351, %367 : vector<16x128xf32>
    %cst_195 = arith.constant 9.99999974E-6 : f32
    %369 = vector.broadcast %cst_195 : f32 to vector<16x1xf32>
    %370 = arith.addf %366, %369 : vector<16x1xf32>
    %371 = math.rsqrt %370 : vector<16x1xf32>
    %372 = vector.broadcast %371 : vector<16x1xf32> to vector<16x128xf32>
    %373 = arith.mulf %368, %372 : vector<16x128xf32>
    %374 = vector.broadcast %353 : vector<1x128xf32> to vector<16x128xf32>
    %375 = arith.mulf %373, %374 : vector<16x128xf32>
    %376 = vector.broadcast %355 : vector<1x128xf32> to vector<16x128xf32>
    %377 = arith.addf %375, %376 : vector<16x128xf32>
    %378 = arith.truncf %377 : vector<16x128xf32> to vector<16x128xbf16>
    %c1_196 = arith.constant 1 : index
    %c0_197 = arith.constant 0 : index
    %c0_198 = arith.constant 0 : index
    %379 = vector.load %arg12[%c1_196, %c0_197, %c0_198] : memref<2x128x384xbf16, #tpu.memory_space<vmem>>, vector<1x128x384xbf16>
    %380 = vector.shape_cast %379 : vector<1x128x384xbf16> to vector<128x384xbf16>
    %cst_199 = arith.constant dense<0.000000e+00> : vector<16x384xf32>
    %381 = tpu.matmul %378, %380, %cst_199 {dimension_numbers = #tpu.dot_dimension_numbers<[1], [0], [0], [1], [0, 0, 1, 1], [], []>} : vector<16x128xbf16>, vector<128x384xbf16>, vector<16x384xf32> -> vector<16x384xf32>
    %c1_200 = arith.constant 1 : index
    %c0_201 = arith.constant 0 : index
    %c0_202 = arith.constant 0 : index
    %382 = vector.load %arg13[%c1_200, %c0_201, %c0_202] : memref<2x1x384xf32, #tpu.memory_space<vmem>>, vector<1x1x384xf32>
    %383 = vector.shape_cast %382 : vector<1x1x384xf32> to vector<1x384xf32>
    %384 = vector.broadcast %383 : vector<1x384xf32> to vector<16x384xf32>
    %385 = arith.addf %381, %384 : vector<16x384xf32>
    %386 = arith.truncf %385 : vector<16x384xf32> to vector<16x384xbf16>
    %c1_203 = arith.constant 1 : index
    %c0_204 = arith.constant 0 : index
    %c0_205 = arith.constant 0 : index
    %387 = vector.load %arg14[%c1_203, %c0_204, %c0_205] : memref<2x128x128xbf16, #tpu.memory_space<vmem>>, vector<1x128x128xbf16>
    %388 = vector.shape_cast %387 : vector<1x128x128xbf16> to vector<128x128xbf16>
    %cst_206 = arith.constant 0.000000e+00 : f32
    %389 = vector.broadcast %cst_206 : f32 to vector<16x128xf32>
    %390 = vector.extract_strided_slice %386 {offsets = [0, 0], sizes = [16, 32], strides = [1, 1]} : vector<16x384xbf16> to vector<16x32xbf16>
    %391 = vector.extract_strided_slice %386 {offsets = [0, 128], sizes = [16, 32], strides = [1, 1]} : vector<16x384xbf16> to vector<16x32xbf16>
    %392 = vector.extract_strided_slice %386 {offsets = [0, 256], sizes = [16, 32], strides = [1, 1]} : vector<16x384xbf16> to vector<16x32xbf16>
    %cst_207 = arith.constant dense<0.000000e+00> : vector<16x16xf32>
    %393 = tpu.matmul %390, %391, %cst_207 {dimension_numbers = #tpu.dot_dimension_numbers<[1], [1], [0], [0], [0, 0, 1, 0], [], []>} : vector<16x32xbf16>, vector<16x32xbf16>, vector<16x16xf32> -> vector<16x16xf32>
    %cst_208 = arith.constant dense<0xFF800000> : vector<16xf32>
    %394 = vector.multi_reduction <maximumf>, %393, %cst_208 [1] : vector<16x16xf32> to vector<16xf32>
    %395 = vector.shape_cast %394 : vector<16xf32> to vector<16x1xf32>
    %396 = vector.broadcast %395 : vector<16x1xf32> to vector<16x16xf32>
    %397 = arith.subf %393, %396 : vector<16x16xf32>
    %398 = math.exp %397 : vector<16x16xf32>
    %cst_209 = arith.constant dense<0.000000e+00> : vector<16xf32>
    %399 = vector.multi_reduction <add>, %398, %cst_209 [1] : vector<16x16xf32> to vector<16xf32>
    %400 = vector.shape_cast %399 : vector<16xf32> to vector<16x1xf32>
    %401 = tpu.reciprocal %400 {approx = true} : vector<16x1xf32> -> vector<16x1xf32>
    %402 = vector.broadcast %401 : vector<16x1xf32> to vector<16x16xf32>
    %403 = arith.mulf %398, %402 : vector<16x16xf32>
    %404 = arith.truncf %403 : vector<16x16xf32> to vector<16x16xbf16>
    %cst_210 = arith.constant dense<0.000000e+00> : vector<16x32xf32>
    %405 = tpu.matmul %404, %392, %cst_210 {dimension_numbers = #tpu.dot_dimension_numbers<[1], [0], [0], [1], [0, 0, 1, 1], [], []>} : vector<16x16xbf16>, vector<16x32xbf16>, vector<16x32xf32> -> vector<16x32xf32>
    %406 = arith.truncf %405 : vector<16x32xf32> to vector<16x32xbf16>
    %407 = vector.extract_strided_slice %388 {offsets = [0, 0], sizes = [32, 128], strides = [1, 1]} : vector<128x128xbf16> to vector<32x128xbf16>
    %cst_211 = arith.constant dense<0.000000e+00> : vector<16x128xf32>
    %408 = tpu.matmul %406, %407, %cst_211 {dimension_numbers = #tpu.dot_dimension_numbers<[1], [0], [0], [1], [0, 0, 1, 1], [], []>} : vector<16x32xbf16>, vector<32x128xbf16>, vector<16x128xf32> -> vector<16x128xf32>
    %409 = arith.addf %389, %408 : vector<16x128xf32>
    %410 = vector.extract_strided_slice %386 {offsets = [0, 32], sizes = [16, 32], strides = [1, 1]} : vector<16x384xbf16> to vector<16x32xbf16>
    %411 = vector.extract_strided_slice %386 {offsets = [0, 160], sizes = [16, 32], strides = [1, 1]} : vector<16x384xbf16> to vector<16x32xbf16>
    %412 = vector.extract_strided_slice %386 {offsets = [0, 288], sizes = [16, 32], strides = [1, 1]} : vector<16x384xbf16> to vector<16x32xbf16>
    %cst_212 = arith.constant dense<0.000000e+00> : vector<16x16xf32>
    %413 = tpu.matmul %410, %411, %cst_212 {dimension_numbers = #tpu.dot_dimension_numbers<[1], [1], [0], [0], [0, 0, 1, 0], [], []>} : vector<16x32xbf16>, vector<16x32xbf16>, vector<16x16xf32> -> vector<16x16xf32>
    %cst_213 = arith.constant dense<0xFF800000> : vector<16xf32>
    %414 = vector.multi_reduction <maximumf>, %413, %cst_213 [1] : vector<16x16xf32> to vector<16xf32>
    %415 = vector.shape_cast %414 : vector<16xf32> to vector<16x1xf32>
    %416 = vector.broadcast %415 : vector<16x1xf32> to vector<16x16xf32>
    %417 = arith.subf %413, %416 : vector<16x16xf32>
    %418 = math.exp %417 : vector<16x16xf32>
    %cst_214 = arith.constant dense<0.000000e+00> : vector<16xf32>
    %419 = vector.multi_reduction <add>, %418, %cst_214 [1] : vector<16x16xf32> to vector<16xf32>
    %420 = vector.shape_cast %419 : vector<16xf32> to vector<16x1xf32>
    %421 = tpu.reciprocal %420 {approx = true} : vector<16x1xf32> -> vector<16x1xf32>
    %422 = vector.broadcast %421 : vector<16x1xf32> to vector<16x16xf32>
    %423 = arith.mulf %418, %422 : vector<16x16xf32>
    %424 = arith.truncf %423 : vector<16x16xf32> to vector<16x16xbf16>
    %cst_215 = arith.constant dense<0.000000e+00> : vector<16x32xf32>
    %425 = tpu.matmul %424, %412, %cst_215 {dimension_numbers = #tpu.dot_dimension_numbers<[1], [0], [0], [1], [0, 0, 1, 1], [], []>} : vector<16x16xbf16>, vector<16x32xbf16>, vector<16x32xf32> -> vector<16x32xf32>
    %426 = arith.truncf %425 : vector<16x32xf32> to vector<16x32xbf16>
    %427 = vector.extract_strided_slice %388 {offsets = [32, 0], sizes = [32, 128], strides = [1, 1]} : vector<128x128xbf16> to vector<32x128xbf16>
    %cst_216 = arith.constant dense<0.000000e+00> : vector<16x128xf32>
    %428 = tpu.matmul %426, %427, %cst_216 {dimension_numbers = #tpu.dot_dimension_numbers<[1], [0], [0], [1], [0, 0, 1, 1], [], []>} : vector<16x32xbf16>, vector<32x128xbf16>, vector<16x128xf32> -> vector<16x128xf32>
    %429 = arith.addf %409, %428 : vector<16x128xf32>
    %430 = vector.extract_strided_slice %386 {offsets = [0, 64], sizes = [16, 32], strides = [1, 1]} : vector<16x384xbf16> to vector<16x32xbf16>
    %431 = vector.extract_strided_slice %386 {offsets = [0, 192], sizes = [16, 32], strides = [1, 1]} : vector<16x384xbf16> to vector<16x32xbf16>
    %432 = vector.extract_strided_slice %386 {offsets = [0, 320], sizes = [16, 32], strides = [1, 1]} : vector<16x384xbf16> to vector<16x32xbf16>
    %cst_217 = arith.constant dense<0.000000e+00> : vector<16x16xf32>
    %433 = tpu.matmul %430, %431, %cst_217 {dimension_numbers = #tpu.dot_dimension_numbers<[1], [1], [0], [0], [0, 0, 1, 0], [], []>} : vector<16x32xbf16>, vector<16x32xbf16>, vector<16x16xf32> -> vector<16x16xf32>
    %cst_218 = arith.constant dense<0xFF800000> : vector<16xf32>
    %434 = vector.multi_reduction <maximumf>, %433, %cst_218 [1] : vector<16x16xf32> to vector<16xf32>
    %435 = vector.shape_cast %434 : vector<16xf32> to vector<16x1xf32>
    %436 = vector.broadcast %435 : vector<16x1xf32> to vector<16x16xf32>
    %437 = arith.subf %433, %436 : vector<16x16xf32>
    %438 = math.exp %437 : vector<16x16xf32>
    %cst_219 = arith.constant dense<0.000000e+00> : vector<16xf32>
    %439 = vector.multi_reduction <add>, %438, %cst_219 [1] : vector<16x16xf32> to vector<16xf32>
    %440 = vector.shape_cast %439 : vector<16xf32> to vector<16x1xf32>
    %441 = tpu.reciprocal %440 {approx = true} : vector<16x1xf32> -> vector<16x1xf32>
    %442 = vector.broadcast %441 : vector<16x1xf32> to vector<16x16xf32>
    %443 = arith.mulf %438, %442 : vector<16x16xf32>
    %444 = arith.truncf %443 : vector<16x16xf32> to vector<16x16xbf16>
    %cst_220 = arith.constant dense<0.000000e+00> : vector<16x32xf32>
    %445 = tpu.matmul %444, %432, %cst_220 {dimension_numbers = #tpu.dot_dimension_numbers<[1], [0], [0], [1], [0, 0, 1, 1], [], []>} : vector<16x16xbf16>, vector<16x32xbf16>, vector<16x32xf32> -> vector<16x32xf32>
    %446 = arith.truncf %445 : vector<16x32xf32> to vector<16x32xbf16>
    %447 = vector.extract_strided_slice %388 {offsets = [64, 0], sizes = [32, 128], strides = [1, 1]} : vector<128x128xbf16> to vector<32x128xbf16>
    %cst_221 = arith.constant dense<0.000000e+00> : vector<16x128xf32>
    %448 = tpu.matmul %446, %447, %cst_221 {dimension_numbers = #tpu.dot_dimension_numbers<[1], [0], [0], [1], [0, 0, 1, 1], [], []>} : vector<16x32xbf16>, vector<32x128xbf16>, vector<16x128xf32> -> vector<16x128xf32>
    %449 = arith.addf %429, %448 : vector<16x128xf32>
    %450 = vector.extract_strided_slice %386 {offsets = [0, 96], sizes = [16, 32], strides = [1, 1]} : vector<16x384xbf16> to vector<16x32xbf16>
    %451 = vector.extract_strided_slice %386 {offsets = [0, 224], sizes = [16, 32], strides = [1, 1]} : vector<16x384xbf16> to vector<16x32xbf16>
    %452 = vector.extract_strided_slice %386 {offsets = [0, 352], sizes = [16, 32], strides = [1, 1]} : vector<16x384xbf16> to vector<16x32xbf16>
    %cst_222 = arith.constant dense<0.000000e+00> : vector<16x16xf32>
    %453 = tpu.matmul %450, %451, %cst_222 {dimension_numbers = #tpu.dot_dimension_numbers<[1], [1], [0], [0], [0, 0, 1, 0], [], []>} : vector<16x32xbf16>, vector<16x32xbf16>, vector<16x16xf32> -> vector<16x16xf32>
    %cst_223 = arith.constant dense<0xFF800000> : vector<16xf32>
    %454 = vector.multi_reduction <maximumf>, %453, %cst_223 [1] : vector<16x16xf32> to vector<16xf32>
    %455 = vector.shape_cast %454 : vector<16xf32> to vector<16x1xf32>
    %456 = vector.broadcast %455 : vector<16x1xf32> to vector<16x16xf32>
    %457 = arith.subf %453, %456 : vector<16x16xf32>
    %458 = math.exp %457 : vector<16x16xf32>
    %cst_224 = arith.constant dense<0.000000e+00> : vector<16xf32>
    %459 = vector.multi_reduction <add>, %458, %cst_224 [1] : vector<16x16xf32> to vector<16xf32>
    %460 = vector.shape_cast %459 : vector<16xf32> to vector<16x1xf32>
    %461 = tpu.reciprocal %460 {approx = true} : vector<16x1xf32> -> vector<16x1xf32>
    %462 = vector.broadcast %461 : vector<16x1xf32> to vector<16x16xf32>
    %463 = arith.mulf %458, %462 : vector<16x16xf32>
    %464 = arith.truncf %463 : vector<16x16xf32> to vector<16x16xbf16>
    %cst_225 = arith.constant dense<0.000000e+00> : vector<16x32xf32>
    %465 = tpu.matmul %464, %452, %cst_225 {dimension_numbers = #tpu.dot_dimension_numbers<[1], [0], [0], [1], [0, 0, 1, 1], [], []>} : vector<16x16xbf16>, vector<16x32xbf16>, vector<16x32xf32> -> vector<16x32xf32>
    %466 = arith.truncf %465 : vector<16x32xf32> to vector<16x32xbf16>
    %467 = vector.extract_strided_slice %388 {offsets = [96, 0], sizes = [32, 128], strides = [1, 1]} : vector<128x128xbf16> to vector<32x128xbf16>
    %cst_226 = arith.constant dense<0.000000e+00> : vector<16x128xf32>
    %468 = tpu.matmul %466, %467, %cst_226 {dimension_numbers = #tpu.dot_dimension_numbers<[1], [0], [0], [1], [0, 0, 1, 1], [], []>} : vector<16x32xbf16>, vector<32x128xbf16>, vector<16x128xf32> -> vector<16x128xf32>
    %469 = arith.addf %449, %468 : vector<16x128xf32>
    %470 = arith.addf %377, %469 : vector<16x128xf32>
    %c1_227 = arith.constant 1 : index
    %c0_228 = arith.constant 0 : index
    %c0_229 = arith.constant 0 : index
    %471 = vector.load %arg15[%c1_227, %c0_228, %c0_229] : memref<2x1x128xf32, #tpu.memory_space<vmem>>, vector<1x1x128xf32>
    %472 = vector.shape_cast %471 : vector<1x1x128xf32> to vector<1x128xf32>
    %473 = vector.broadcast %472 : vector<1x128xf32> to vector<16x128xf32>
    %474 = arith.addf %470, %473 : vector<16x128xf32>
    %c1_230 = arith.constant 1 : index
    %c0_231 = arith.constant 0 : index
    %c0_232 = arith.constant 0 : index
    %475 = vector.load %arg16[%c1_230, %c0_231, %c0_232] : memref<2x1x128xf32, #tpu.memory_space<vmem>>, vector<1x1x128xf32>
    %476 = vector.shape_cast %475 : vector<1x1x128xf32> to vector<1x128xf32>
    %c1_233 = arith.constant 1 : index
    %c0_234 = arith.constant 0 : index
    %c0_235 = arith.constant 0 : index
    %477 = vector.load %arg17[%c1_233, %c0_234, %c0_235] : memref<2x1x128xf32, #tpu.memory_space<vmem>>, vector<1x1x128xf32>
    %478 = vector.shape_cast %477 : vector<1x1x128xf32> to vector<1x128xf32>
    %cst_236 = arith.constant dense<0.000000e+00> : vector<16xf32>
    %479 = vector.multi_reduction <add>, %474, %cst_236 [1] : vector<16x128xf32> to vector<16xf32>
    %480 = vector.shape_cast %479 : vector<16xf32> to vector<16x1xf32>
    %cst_237 = arith.constant 1.280000e+02 : f32
    %481 = vector.broadcast %cst_237 : f32 to vector<16x1xf32>
    %482 = arith.divf %480, %481 : vector<16x1xf32>
    %483 = vector.broadcast %482 : vector<16x1xf32> to vector<16x128xf32>
    %484 = arith.subf %474, %483 : vector<16x128xf32>
    %485 = arith.mulf %484, %484 : vector<16x128xf32>
    %cst_238 = arith.constant dense<0.000000e+00> : vector<16xf32>
    %486 = vector.multi_reduction <add>, %485, %cst_238 [1] : vector<16x128xf32> to vector<16xf32>
    %487 = vector.shape_cast %486 : vector<16xf32> to vector<16x1xf32>
    %cst_239 = arith.constant 1.280000e+02 : f32
    %488 = vector.broadcast %cst_239 : f32 to vector<16x1xf32>
    %489 = arith.divf %487, %488 : vector<16x1xf32>
    %490 = vector.broadcast %482 : vector<16x1xf32> to vector<16x128xf32>
    %491 = arith.subf %474, %490 : vector<16x128xf32>
    %cst_240 = arith.constant 9.99999974E-6 : f32
    %492 = vector.broadcast %cst_240 : f32 to vector<16x1xf32>
    %493 = arith.addf %489, %492 : vector<16x1xf32>
    %494 = math.rsqrt %493 : vector<16x1xf32>
    %495 = vector.broadcast %494 : vector<16x1xf32> to vector<16x128xf32>
    %496 = arith.mulf %491, %495 : vector<16x128xf32>
    %497 = vector.broadcast %476 : vector<1x128xf32> to vector<16x128xf32>
    %498 = arith.mulf %496, %497 : vector<16x128xf32>
    %499 = vector.broadcast %478 : vector<1x128xf32> to vector<16x128xf32>
    %500 = arith.addf %498, %499 : vector<16x128xf32>
    %501 = arith.truncf %500 : vector<16x128xf32> to vector<16x128xbf16>
    %c1_241 = arith.constant 1 : index
    %c0_242 = arith.constant 0 : index
    %c0_243 = arith.constant 0 : index
    %502 = vector.load %arg18[%c1_241, %c0_242, %c0_243] : memref<2x128x256xbf16, #tpu.memory_space<vmem>>, vector<1x128x256xbf16>
    %503 = vector.shape_cast %502 : vector<1x128x256xbf16> to vector<128x256xbf16>
    %cst_244 = arith.constant dense<0.000000e+00> : vector<16x256xf32>
    %504 = tpu.matmul %501, %503, %cst_244 {dimension_numbers = #tpu.dot_dimension_numbers<[1], [0], [0], [1], [0, 0, 1, 1], [], []>} : vector<16x128xbf16>, vector<128x256xbf16>, vector<16x256xf32> -> vector<16x256xf32>
    %c1_245 = arith.constant 1 : index
    %c0_246 = arith.constant 0 : index
    %c0_247 = arith.constant 0 : index
    %505 = vector.load %arg19[%c1_245, %c0_246, %c0_247] : memref<2x1x256xf32, #tpu.memory_space<vmem>>, vector<1x1x256xf32>
    %506 = vector.shape_cast %505 : vector<1x1x256xf32> to vector<1x256xf32>
    %507 = vector.broadcast %506 : vector<1x256xf32> to vector<16x256xf32>
    %508 = arith.addf %504, %507 : vector<16x256xf32>
    %509 = arith.mulf %508, %508 : vector<16x256xf32>
    %510 = arith.mulf %508, %509 : vector<16x256xf32>
    %cst_248 = arith.constant 4.471500e-02 : f32
    %511 = vector.broadcast %cst_248 : f32 to vector<16x256xf32>
    %512 = arith.mulf %511, %510 : vector<16x256xf32>
    %513 = arith.addf %508, %512 : vector<16x256xf32>
    %cst_249 = arith.constant 0.797884583 : f32
    %514 = vector.broadcast %cst_249 : f32 to vector<16x256xf32>
    %515 = arith.mulf %514, %513 : vector<16x256xf32>
    %516 = math.tanh %515 : vector<16x256xf32>
    %cst_250 = arith.constant 1.000000e+00 : f32
    %517 = vector.broadcast %cst_250 : f32 to vector<16x256xf32>
    %518 = arith.addf %517, %516 : vector<16x256xf32>
    %cst_251 = arith.constant 5.000000e-01 : f32
    %519 = vector.broadcast %cst_251 : f32 to vector<16x256xf32>
    %520 = arith.mulf %519, %518 : vector<16x256xf32>
    %521 = arith.mulf %508, %520 : vector<16x256xf32>
    %522 = arith.truncf %521 : vector<16x256xf32> to vector<16x256xbf16>
    %c1_252 = arith.constant 1 : index
    %c0_253 = arith.constant 0 : index
    %c0_254 = arith.constant 0 : index
    %523 = vector.load %arg20[%c1_252, %c0_253, %c0_254] : memref<2x256x128xbf16, #tpu.memory_space<vmem>>, vector<1x256x128xbf16>
    %524 = vector.shape_cast %523 : vector<1x256x128xbf16> to vector<256x128xbf16>
    %cst_255 = arith.constant dense<0.000000e+00> : vector<16x128xf32>
    %525 = tpu.matmul %522, %524, %cst_255 {dimension_numbers = #tpu.dot_dimension_numbers<[1], [0], [0], [1], [0, 0, 1, 1], [], []>} : vector<16x256xbf16>, vector<256x128xbf16>, vector<16x128xf32> -> vector<16x128xf32>
    %c1_256 = arith.constant 1 : index
    %c0_257 = arith.constant 0 : index
    %c0_258 = arith.constant 0 : index
    %526 = vector.load %arg21[%c1_256, %c0_257, %c0_258] : memref<2x1x128xf32, #tpu.memory_space<vmem>>, vector<1x1x128xf32>
    %527 = vector.shape_cast %526 : vector<1x1x128xf32> to vector<1x128xf32>
    %528 = vector.broadcast %527 : vector<1x128xf32> to vector<16x128xf32>
    %529 = arith.addf %525, %528 : vector<16x128xf32>
    %530 = arith.addf %500, %529 : vector<16x128xf32>
    %c1_259 = arith.constant 1 : index
    %c0_260 = arith.constant 0 : index
    %c0_261 = arith.constant 0 : index
    %531 = vector.load %arg22[%c1_259, %c0_260, %c0_261] : memref<2x1x128xf32, #tpu.memory_space<vmem>>, vector<1x1x128xf32>
    %532 = vector.shape_cast %531 : vector<1x1x128xf32> to vector<1x128xf32>
    %c1_262 = arith.constant 1 : index
    %c0_263 = arith.constant 0 : index
    %c0_264 = arith.constant 0 : index
    %533 = vector.load %arg23[%c1_262, %c0_263, %c0_264] : memref<2x1x128xf32, #tpu.memory_space<vmem>>, vector<1x1x128xf32>
    %534 = vector.shape_cast %533 : vector<1x1x128xf32> to vector<1x128xf32>
    %cst_265 = arith.constant dense<0.000000e+00> : vector<16xf32>
    %535 = vector.multi_reduction <add>, %530, %cst_265 [1] : vector<16x128xf32> to vector<16xf32>
    %536 = vector.shape_cast %535 : vector<16xf32> to vector<16x1xf32>
    %cst_266 = arith.constant 1.280000e+02 : f32
    %537 = vector.broadcast %cst_266 : f32 to vector<16x1xf32>
    %538 = arith.divf %536, %537 : vector<16x1xf32>
    %539 = vector.broadcast %538 : vector<16x1xf32> to vector<16x128xf32>
    %540 = arith.subf %530, %539 : vector<16x128xf32>
    %541 = arith.mulf %540, %540 : vector<16x128xf32>
    %cst_267 = arith.constant dense<0.000000e+00> : vector<16xf32>
    %542 = vector.multi_reduction <add>, %541, %cst_267 [1] : vector<16x128xf32> to vector<16xf32>
    %543 = vector.shape_cast %542 : vector<16xf32> to vector<16x1xf32>
    %cst_268 = arith.constant 1.280000e+02 : f32
    %544 = vector.broadcast %cst_268 : f32 to vector<16x1xf32>
    %545 = arith.divf %543, %544 : vector<16x1xf32>
    %546 = vector.broadcast %538 : vector<16x1xf32> to vector<16x128xf32>
    %547 = arith.subf %530, %546 : vector<16x128xf32>
    %cst_269 = arith.constant 9.99999974E-6 : f32
    %548 = vector.broadcast %cst_269 : f32 to vector<16x1xf32>
    %549 = arith.addf %545, %548 : vector<16x1xf32>
    %550 = math.rsqrt %549 : vector<16x1xf32>
    %551 = vector.broadcast %550 : vector<16x1xf32> to vector<16x128xf32>
    %552 = arith.mulf %547, %551 : vector<16x128xf32>
    %553 = vector.broadcast %532 : vector<1x128xf32> to vector<16x128xf32>
    %554 = arith.mulf %552, %553 : vector<16x128xf32>
    %555 = vector.broadcast %534 : vector<1x128xf32> to vector<16x128xf32>
    %556 = arith.addf %554, %555 : vector<16x128xf32>
    %557 = arith.mulf %556, %556 : vector<16x128xf32>
    %cst_270 = arith.constant dense<0.000000e+00> : vector<16xf32>
    %558 = vector.multi_reduction <add>, %557, %cst_270 [1] : vector<16x128xf32> to vector<16xf32>
    %559 = vector.shape_cast %558 : vector<16xf32> to vector<16x1xf32>
    %c0_271 = arith.constant 0 : index
    %c0_272 = arith.constant 0 : index
    %560 = vector.load %arg24[%c0_271, %c0_272] : memref<128x128xf32, #tpu.memory_space<vmem>>, vector<128x128xf32>
    %cst_273 = arith.constant dense<0.000000e+00> : vector<16x128xf32>
    %561 = tpu.matmul %556, %560, %cst_273 {dimension_numbers = #tpu.dot_dimension_numbers<[1], [0], [0], [1], [0, 0, 1, 1], [], []>} : vector<16x128xf32>, vector<128x128xf32>, vector<16x128xf32> -> vector<16x128xf32>
    %cst_274 = arith.constant 2.000000e+00 : f32
    %562 = vector.broadcast %cst_274 : f32 to vector<16x128xf32>
    %563 = arith.mulf %562, %561 : vector<16x128xf32>
    %564 = vector.broadcast %559 : vector<16x1xf32> to vector<16x128xf32>
    %565 = arith.subf %564, %563 : vector<16x128xf32>
    %c0_275 = arith.constant 0 : index
    %c0_276 = arith.constant 0 : index
    %566 = vector.load %arg25[%c0_275, %c0_276] : memref<1x128xf32, #tpu.memory_space<vmem>>, vector<1x128xf32>
    %567 = vector.broadcast %566 : vector<1x128xf32> to vector<16x128xf32>
    %568 = arith.addf %565, %567 : vector<16x128xf32>
    %c0_277 = arith.constant 0 : index
    %c0_278 = arith.constant 0 : index
    %c0_279 = arith.constant 0 : index
    %569 = vector.load %arg26[%c0_277, %c0_278, %c0_279] : memref<1x16x128xf32, #tpu.memory_space<vmem>>, vector<1x16x128xf32>
    %570 = vector.shape_cast %569 : vector<1x16x128xf32> to vector<16x128xf32>
    %571 = vector.shape_cast %568 : vector<16x128xf32> to vector<1x16x128xf32>
    tpu.vector_store %arg26[%c0_277, %c0_278, %c0_279], %571 {strides = array<i32>} : memref<1x16x128xf32, #tpu.memory_space<vmem>>, vector<1x16x128xf32>,
    return
  }
  func.func @transform_0(%arg0: i32) -> (i32, i32, i32) {
    %c0_i32 = arith.constant 0 : i32
    %c0_i32_0 = arith.constant 0 : i32
    %c0_i32_1 = arith.constant 0 : i32
    return %arg0, %c0_i32, %c0_i32_0 : i32, i32, i32
  }
  func.func @transform_1(%arg0: i32) -> (i32, i32) {
    %c0_i32 = arith.constant 0 : i32
    %c0_i32_0 = arith.constant 0 : i32
    %c0_i32_1 = arith.constant 0 : i32
    return %c0_i32, %c0_i32_0 : i32, i32
  }
  func.func @transform_2(%arg0: i32) -> (i32, i32) {
    %c0_i32 = arith.constant 0 : i32
    %c0_i32_0 = arith.constant 0 : i32
    %c0_i32_1 = arith.constant 0 : i32
    return %c0_i32, %c0_i32_0 : i32, i32
  }
  func.func @transform_3(%arg0: i32) -> (i32, i32) {
    %c0_i32 = arith.constant 0 : i32
    %c0_i32_0 = arith.constant 0 : i32
    %c0_i32_1 = arith.constant 0 : i32
    return %c0_i32, %c0_i32_0 : i32, i32
  }
  func.func @transform_4(%arg0: i32) -> (i32, i32, i32) {
    %c0_i32 = arith.constant 0 : i32
    %c0_i32_0 = arith.constant 0 : i32
    %c0_i32_1 = arith.constant 0 : i32
    %c0_i32_2 = arith.constant 0 : i32
    return %c0_i32, %c0_i32_0, %c0_i32_1 : i32, i32, i32
  }
  func.func @transform_5(%arg0: i32) -> (i32, i32) {
    %c0_i32 = arith.constant 0 : i32
    %c0_i32_0 = arith.constant 0 : i32
    %c0_i32_1 = arith.constant 0 : i32
    return %c0_i32, %c0_i32_0 : i32, i32
  }
  func.func @transform_6(%arg0: i32) -> (i32, i32) {
    %c0_i32 = arith.constant 0 : i32
    %c0_i32_0 = arith.constant 0 : i32
    %c0_i32_1 = arith.constant 0 : i32
    return %c0_i32, %c0_i32_0 : i32, i32
  }
  func.func @transform_7(%arg0: i32) -> (i32, i32) {
    %c0_i32 = arith.constant 0 : i32
    %c0_i32_0 = arith.constant 0 : i32
    %c0_i32_1 = arith.constant 0 : i32
    return %c0_i32, %c0_i32_0 : i32, i32
  }
  func.func @transform_8(%arg0: i32) -> (i32, i32) {
    %c0_i32 = arith.constant 0 : i32
    %c0_i32_0 = arith.constant 0 : i32
    %c0_i32_1 = arith.constant 0 : i32
    return %c0_i32, %c0_i32_0 : i32, i32
  }
  func.func @transform_9(%arg0: i32) -> (i32, i32, i32) {
    %c0_i32 = arith.constant 0 : i32
    %c0_i32_0 = arith.constant 0 : i32
    %c0_i32_1 = arith.constant 0 : i32
    %c0_i32_2 = arith.constant 0 : i32
    return %c0_i32, %c0_i32_0, %c0_i32_1 : i32, i32, i32
  }
  func.func @transform_10(%arg0: i32) -> (i32, i32) {
    %c0_i32 = arith.constant 0 : i32
    %c0_i32_0 = arith.constant 0 : i32
    %c0_i32_1 = arith.constant 0 : i32
    return %c0_i32, %c0_i32_0 : i32, i32
  }
  func.func @transform_11(%arg0: i32) -> (i32, i32, i32) {
    %c0_i32 = arith.constant 0 : i32
    %c0_i32_0 = arith.constant 0 : i32
    %c0_i32_1 = arith.constant 0 : i32
    %c0_i32_2 = arith.constant 0 : i32
    return %c0_i32, %c0_i32_0, %c0_i32_1 : i32, i32, i32
  }
  func.func @transform_12(%arg0: i32) -> (i32, i32, i32) {
    %c0_i32 = arith.constant 0 : i32
    %c0_i32_0 = arith.constant 0 : i32
    %c0_i32_1 = arith.constant 0 : i32
    %c0_i32_2 = arith.constant 0 : i32
    return %c0_i32, %c0_i32_0, %c0_i32_1 : i32, i32, i32
  }
  func.func @transform_13(%arg0: i32) -> (i32, i32, i32) {
    %c0_i32 = arith.constant 0 : i32
    %c0_i32_0 = arith.constant 0 : i32
    %c0_i32_1 = arith.constant 0 : i32
    %c0_i32_2 = arith.constant 0 : i32
    return %c0_i32, %c0_i32_0, %c0_i32_1 : i32, i32, i32
  }
  func.func @transform_14(%arg0: i32) -> (i32, i32, i32) {
    %c0_i32 = arith.constant 0 : i32
    %c0_i32_0 = arith.constant 0 : i32
    %c0_i32_1 = arith.constant 0 : i32
    %c0_i32_2 = arith.constant 0 : i32
    return %c0_i32, %c0_i32_0, %c0_i32_1 : i32, i32, i32
  }
  func.func @transform_15(%arg0: i32) -> (i32, i32, i32) {
    %c0_i32 = arith.constant 0 : i32
    %c0_i32_0 = arith.constant 0 : i32
    %c0_i32_1 = arith.constant 0 : i32
    %c0_i32_2 = arith.constant 0 : i32
    return %c0_i32, %c0_i32_0, %c0_i32_1 : i32, i32, i32
  }
  func.func @transform_16(%arg0: i32) -> (i32, i32, i32) {
    %c0_i32 = arith.constant 0 : i32
    %c0_i32_0 = arith.constant 0 : i32
    %c0_i32_1 = arith.constant 0 : i32
    %c0_i32_2 = arith.constant 0 : i32
    return %c0_i32, %c0_i32_0, %c0_i32_1 : i32, i32, i32
  }
  func.func @transform_17(%arg0: i32) -> (i32, i32, i32) {
    %c0_i32 = arith.constant 0 : i32
    %c0_i32_0 = arith.constant 0 : i32
    %c0_i32_1 = arith.constant 0 : i32
    %c0_i32_2 = arith.constant 0 : i32
    return %c0_i32, %c0_i32_0, %c0_i32_1 : i32, i32, i32
  }
  func.func @transform_18(%arg0: i32) -> (i32, i32, i32) {
    %c0_i32 = arith.constant 0 : i32
    %c0_i32_0 = arith.constant 0 : i32
    %c0_i32_1 = arith.constant 0 : i32
    %c0_i32_2 = arith.constant 0 : i32
    return %c0_i32, %c0_i32_0, %c0_i32_1 : i32, i32, i32
  }
  func.func @transform_19(%arg0: i32) -> (i32, i32, i32) {
    %c0_i32 = arith.constant 0 : i32
    %c0_i32_0 = arith.constant 0 : i32
    %c0_i32_1 = arith.constant 0 : i32
    %c0_i32_2 = arith.constant 0 : i32
    return %c0_i32, %c0_i32_0, %c0_i32_1 : i32, i32, i32
  }
  func.func @transform_20(%arg0: i32) -> (i32, i32, i32) {
    %c0_i32 = arith.constant 0 : i32
    %c0_i32_0 = arith.constant 0 : i32
    %c0_i32_1 = arith.constant 0 : i32
    %c0_i32_2 = arith.constant 0 : i32
    return %c0_i32, %c0_i32_0, %c0_i32_1 : i32, i32, i32
  }
  func.func @transform_21(%arg0: i32) -> (i32, i32, i32) {
    %c0_i32 = arith.constant 0 : i32
    %c0_i32_0 = arith.constant 0 : i32
    %c0_i32_1 = arith.constant 0 : i32
    %c0_i32_2 = arith.constant 0 : i32
    return %c0_i32, %c0_i32_0, %c0_i32_1 : i32, i32, i32
  }
  func.func @transform_22(%arg0: i32) -> (i32, i32, i32) {
    %c0_i32 = arith.constant 0 : i32
    %c0_i32_0 = arith.constant 0 : i32
    %c0_i32_1 = arith.constant 0 : i32
    %c0_i32_2 = arith.constant 0 : i32
    return %c0_i32, %c0_i32_0, %c0_i32_1 : i32, i32, i32
  }
  func.func @transform_23(%arg0: i32) -> (i32, i32) {
    %c0_i32 = arith.constant 0 : i32
    %c0_i32_0 = arith.constant 0 : i32
    %c0_i32_1 = arith.constant 0 : i32
    return %c0_i32, %c0_i32_0 : i32, i32
  }
  func.func @transform_24(%arg0: i32) -> (i32, i32) {
    %c0_i32 = arith.constant 0 : i32
    %c0_i32_0 = arith.constant 0 : i32
    %c0_i32_1 = arith.constant 0 : i32
    return %c0_i32, %c0_i32_0 : i32, i32
  }
  func.func @transform_25(%arg0: i32) -> (i32, i32, i32) {
    %c0_i32 = arith.constant 0 : i32
    %c0_i32_0 = arith.constant 0 : i32
    %c0_i32_1 = arith.constant 0 : i32
    return %arg0, %c0_i32, %c0_i32_0 : i32, i32, i32
  }
}

</mosaic_0001>

<bundles_post_ra>
// kernel: hubert_labeler_forward.1
= control target key start
LH: loop header
LB: loop body
LE: loop exit
PB: predicated region body
PF: predicated region fallthrough
CT: control target
= control target key end

     0   :  { %s7753_s0 = inlined_call_operand.vmem [shape: f32[2,136,1], index: 0, kind: input, shape index: {}]   ;;  %s7754_s1 = inlined_call_operand.vmem [shape: f32[4,32], index: 1, kind: input, shape index: {}]   ;;  %s7755_s2 = inlined_call_operand.hbm [shape: f32[1,32], index: 2, kind: input, shape index: {}]   ;;  %s7756_s3 = inlined_call_operand.hbm [shape: f32[1,32], index: 3, kind: input, shape index: {}]   ;;  %s7757_s4 = inlined_call_operand.hbm [shape: f32[6,32,32], index: 4, kind: input, shape index: {}]   ;;  %s7758_s5 = inlined_call_operand.hbm [shape: f32[1,32], index: 5, kind: input, shape index: {}]   ;;  %s7759_s6 = inlined_call_operand.hbm [shape: f32[1,32], index: 6, kind: input, shape index: {}]   ;;  %s7760_s7 = inlined_call_operand.vmem [shape: bf16[32,128], index: 7, kind: input, shape index: {}]   ;;  %s7761_s8 = inlined_call_operand.hbm [shape: f32[1,128], index: 8, kind: input, shape index: {}]   ;;  %s7762_s9 = inlined_call_operand.vmem [shape: bf16[4,128,128], index: 9, kind: input, shape index: {}]   ;;  %s7763_s10 = inlined_call_operand.hbm [shape: f32[1,128], index: 10, kind: input, shape index: {}]   ;;  %s7764_s11 = inlined_call_operand.hbm [shape: bf16[2,128,384], index: 11, kind: input, shape index: {}]   ;;  %s7765_s12 = inlined_call_operand.vmem [shape: f32[2,1,384], index: 12, kind: input, shape index: {}]   ;;  %s7766_s13 = inlined_call_operand.hbm [shape: bf16[2,128,128], index: 13, kind: input, shape index: {}]   ;;  %s7767_s14 = inlined_call_operand.vmem [shape: f32[2,1,128], index: 14, kind: input, shape index: {}]   ;;  %s7768_s15 = inlined_call_operand.vmem [shape: f32[2,1,128], index: 15, kind: input, shape index: {}]   ;;  %s7769_s16 = inlined_call_operand.vmem [shape: f32[2,1,128], index: 16, kind: input, shape index: {}]   ;;  %s7770_s17 = inlined_call_operand.hbm [shape: bf16[2,128,256], index: 17, kind: input, shape index: {}]   ;;  %s7771_s18 = inlined_call_operand.vmem [shape: f32[2,1,256], index: 18, kind: input, shape index: {}]   ;;  %s7772_s19 = inlined_call_operand.hbm [shape: bf16[2,256,128], index: 19, kind: input, shape index: {}]   ;;  %s7773_s20 = inlined_call_operand.vmem [shape: f32[2,1,128], index: 20, kind: input, shape index: {}]   ;;  %s7774_s21 = inlined_call_operand.hbm [shape: f32[2,1,128], index: 21, kind: input, shape index: {}]   ;;  %s7775_s22 = inlined_call_operand.hbm [shape: f32[2,1,128], index: 22, kind: input, shape index: {}]   ;;  %s7776_s23 = inlined_call_operand.hbm [shape: f32[128,128], index: 23, kind: input, shape index: {}]   ;;  %s7777_s24 = inlined_call_operand.hbm [shape: f32[1,128], index: 24, kind: input, shape index: {}]   ;;  %s7778_s25 = inlined_call_operand.hbm [shape: f32[2,16,128], index: 25, kind: output, shape index: {}]  }
   0x1   :  { %7796 = sst [smem:[#allocation47_spill]] %s7753_s0 }
   0x2   :  { %7797 = sst [smem:[#allocation48_spill]] %s7754_s1 }
   0x3   :  { %7798 = sst [smem:[#allocation49_spill]] %s7755_s2 }
   0x4   :  { %7799 = sst [smem:[#allocation50_spill]] %s7756_s3 }
   0x5   :  { %7800 = sst [smem:[#allocation51_spill]] %s7757_s4 }
   0x6   :  { %7801 = sst [smem:[#allocation52_spill]] %s7758_s5 }
   0x7   :  { %7802 = sst [smem:[#allocation53_spill]] %s7759_s6 }
   0x8   :  { %7803 = sst [smem:[#allocation54_spill]] %s7760_s7 }
   0x9   :  { %7804 = sst [smem:[#allocation55_spill]] %s7761_s8 }
   0xa   :  { %7805 = sst [smem:[#allocation56_spill]] %s7762_s9 }
   0xb   :  { %7806 = sst [smem:[#allocation57_spill]] %s7764_s11 }
   0xc   :  { %7807 = sst [smem:[#allocation58_spill]] %s7770_s17 }
   0xd   :  { %7808 = sst [smem:[#allocation59_spill]] %s7773_s20 }
   0xe   :  { %7809 = sst [smem:[#allocation60_spill]] %s7774_s21 }
   0xf   :  { %7810 = sst [smem:[#allocation61_spill]] %s7778_s25 }
  0x10   :  { %30 = vsyncpa [#allocation6], 0 }
  0x11   :  { %31 = vsyncpa [#allocation9], 0 }
  0x12   :  { %32 = vsyncpa [#allocation12], 0 }
  0x13   :  { %33 = vsyncpa [#allocation15], 0 }
  0x14   :  { %34 = vsyncpa [#allocation18], 0 }
  0x15   :  { %35 = vsyncpa [#allocation21], 0 }
  0x16   :  { %36 = vsyncpa [#allocation24], 0 }
  0x17   :  { %37 = vsyncpa [#allocation27], 0 }
  0x18   :  { %38 = vsyncpa [#allocation7], 0 }
  0x19   :  { %40 = vsyncpa [#allocation7 + $0x1], 0  ;;  %s6896_s29 = smov 0   ;;  %s6898_s2 = smov 0  }
  0x1a   :  { %s6900_s6 = smov 0   ;;  %s6902_s30 = smov 0  }
  0x1b LB: > { %7811 = sst [smem:[#allocation39_spill]] %s6719_s29  ;;  %s6917_s7 = sadd.s32 4294967295, %s6731_s30   ;;  %s6731_s30 = sphi %s6902_s30, %s7847_s30   ;;  %s6727_s6 = sphi %s6900_s6, %s7850_s6   ;;  %s6723_s2 = sphi %s6898_s2, %s7849_s2   ;;  %s6719_s29 = sphi %s6896_s29, %s7848_s29  }
  0x1c   : > { %7812 = sst [smem:[#allocation40_spill]] %s6723_s2  ;;  %s4819_s3 = sadd.s32 4294967294, %s6731_s30  }
  0x1d   : > { %7813 = sst [smem:[#allocation41_spill]] %s6727_s6  ;;  %s6921_s26 = sadd.s32 1, %s6731_s30  }
  0x1e   : > { %7814 = sst [smem:[#allocation42_spill]] %s6731_s30  ;;  %s583_s1 = sadd.s32 1, %s6727_s6 }
  0x1f   : > { %7815 = sst [smem:[#allocation43_spill]] %s6921_s26  ;;  %s580_s8 = ssub.s32 %s6731_s30, %s6921_s26 }
  0x20   : > { %p593_p0 = scmp.ne.s32.totalorder %s6727_s6, %s6723_s2  ;;  %p581_p1 = scmp.eq.s32.totalorder %s580_s8, 0 }
  0x21   : > { %p594_p2 = scmp.eq.s32.totalorder %s6917_s7, 1  ;;  %p599_p3 = scmp.ne.s32.totalorder %s6723_s2, %s6719_s29 }
  0x22   : > { %p600_p4 = scmp.eq.s32.totalorder %s4819_s3, 1  ;;  %p4820_p7 = scmp.ge.s32.totalorder %s6731_s30, 1 }
  0x23   : > { %s6932_s27 = scalar_select %p581_p1, %s6727_s6, %s583_s1  }
  0x24   : > { %p6934_p5 = por %p594_p2, %p593_p0  ;;  %p6938_p6 = por %p600_p4, %p599_p3 }
  0x25   : > { %7816 = sst [smem:[#allocation44_spill]] %s6932_s27  ;;  %p607_p8 = scmp.lt.s32.totalorder %s6731_s30, 3 }
  0x26   : > { %s7817_s4 = scalar_select %p6934_p5, 1, 0 }
  0x27   : > { %s7819_s28 = scalar_select %p6938_p6, 1, 0 }
  0x28   : > { %7818 = sst [smem:[#allocation45_spill]] %s7817_s4  ;;  %p5927_p9 = scmp.eq.s32.totalorder %s6917_s7, 0 }
  0x29   : > { %7820 = sst [smem:[#allocation46_spill]] %s7819_s28  ;;  %p6945_p10 = pnand %p4820_p7, %p607_p8 }
  0x2a   : > { %s7822_s3 = sld [smem:[#allocation50_spill]]  ;;  %s6733_s8 = smov [#allocation8]  }
  0x2b   : > { %p5877_p11 = pneg %p6945_p10  ;;  %s636_s27 = sshll.u32 %s6733_s8, 4  ;;  %s637_s27 = int_to_ptr.vmem [resolvable:$true] %s636_s27 }
  0x2c   : > { %s7823_s28 = sld [smem:[#allocation52_spill]]  ;;  %s6734_s25 = smov [#allocation11]  }
  0x2d   : > { %p6959_p12 = pnand %p5927_p9, %p5877_p11  ;;  %s662_s8 = sshll.u32 %s6734_s25, 4  ;;  %s663_s8 = int_to_ptr.vmem [resolvable:$true] %s662_s8 }
  0x2e   : > { %s7826_s11 = sld [smem:[#allocation57_spill]]  ;;  %s6735_s2 = smov [#allocation14]  }
  0x2f   : > { %s689_s20 = sshll.u32 %s6735_s2, 4  ;;  %s6736_s5 = smov [#allocation17]   ;;  %s690_s20 = int_to_ptr.vmem [resolvable:$true] %s689_s20 }
  0x30   : > { %s634_s1 = sshll.u32 %s7822_s3, 4  ;;  %s7825_s3 = sld [smem:[#allocation55_spill]]  ;;  %s635_s1 = int_to_ptr.hbm [resolvable:$true] %s634_s1 }
  0x31   : > { %5883 = dma.hbm_to_vmem [thread:$0]  (!%p6959_p12), %s635_s1, 16, %s637_s27, [#allocation9]  }
  0x32   : > { %s660_s29 = sshll.u32 %s7823_s28, 4  ;;  %s715_s25 = sshll.u32 %s6736_s5, 4  ;;  %s661_s29 = int_to_ptr.hbm [resolvable:$true] %s660_s29  ;;  %s716_s25 = int_to_ptr.vmem [resolvable:$true] %s715_s25 }
  0x33   : > { %5889 = dma.hbm_to_vmem [thread:$0]  (!%p6959_p12), %s661_s29, 16, %s663_s8, [#allocation12]  }
  0x34   : > { %s713_s28 = sshll.u32 %s7826_s11, 4  ;;  %s6737_s0 = smov 192   ;;  %s714_s28 = int_to_ptr.hbm [resolvable:$true] %s713_s28 }
  0x35   : > { %s6738_s27 = smov 12   ;;  %s7827_s17 = sld [smem:[#allocation58_spill]] }
  0x36   : > { %s687_s4 = sshll.u32 %s7825_s3, 4  ;;  %s6739_s8 = smov [#allocation20]   ;;  %s688_s4 = int_to_ptr.hbm [resolvable:$true] %s687_s4 }
  0x37   : > { %5895 = dma.hbm_to_vmem [thread:$0]  (!%p6959_p12), %s688_s4, 16, %s690_s20, [#allocation15]  }
  0x38   : > { %5901 = dma.hbm_to_vmem [thread:$0]  (!%p6959_p12), %s714_s28, 6144, %s716_s25, [#allocation18], %s6737_s0, %s6737_s0, %s6738_s27  }
  0x39   : > { %s755_s2 = sshll.u32 %s6739_s8, 4  ;;  %s7828_s21 = sld [smem:[#allocation60_spill]]  ;;  %s756_s2 = int_to_ptr.vmem [resolvable:$true] %s755_s2 }
  0x3a   : > { %s7792_s4 = smov 128   ;;  %s6741_s5 = smov 8  }
  0x3b   : > { %s753_s3 = sshll.u32 %s7827_s17, 4  ;;  %s6742_s28 = smov [#allocation23]   ;;  %s754_s3 = int_to_ptr.hbm [resolvable:$true] %s753_s3 }
  0x3c   : > { %5907 = dma.hbm_to_vmem [thread:$0]  (!%p6959_p12), %s754_s3, 4096, %s756_s2, [#allocation21], %s7792_s4, %s7792_s4, %s6741_s5  }
  0x3d   : > { %s789_s25 = sshll.u32 %s6742_s28, 4  ;;  %s7794_s0 = smov 16   ;;  %s790_s25 = int_to_ptr.vmem [resolvable:$true] %s789_s25 }
  0x3e   : > { %s7795_s27 = smov 1   ;;  %s815_s8 = sshll.u32 %s7776_s23, 4  ;;  %s816_s8 = int_to_ptr.hbm [resolvable:$true] %s815_s8 }
  0x3f   : > { %s787_s20 = sshll.u32 %s7828_s21, 4  ;;  %s6745_s6 = smov [#allocation26]   ;;  %s788_s20 = int_to_ptr.hbm [resolvable:$true] %s787_s20 }
  0x40   : > { %5913 = dma.hbm_to_vmem [thread:$0]  (!%p6959_p12), %s788_s20, 32, %s790_s25, [#allocation24], %s7794_s0, %s7794_s0, %s7795_s27  }
  0x41   : > { %s817_s26 = sshll.u32 %s6745_s6, 4  ;;  %s7829_s28 = sld [smem:[#allocation49_spill]]  ;;  %s818_s26 = int_to_ptr.vmem [resolvable:$true] %s817_s26 }
  0x42   : > { %s7830_s11 = smov 128   ;;  %s6746_s20 = smov [#allocation5]  }
  0x43   : > { %5919 = dma.hbm_to_vmem [thread:$0]  (!%p6959_p12), %s816_s8, 2048, %s818_s26, [#allocation27], %s7830_s11, %s7830_s11, %s6741_s5  }
  0x44   : > { %s624_s25 = sshll.u32 %s6746_s20, 4  ;;  %s7831_s29 = sld [smem:[#allocation51_spill]]  ;;  %s625_s25 = int_to_ptr.vmem [resolvable:$true] %s624_s25 }
  0x45   : > { %s7832_s2 = sld [smem:[#allocation53_spill]]  ;;  %s6747_s17 = smov [#allocation10]  }
  0x46   : > { %s647_s21 = sshll.u32 %s6747_s17, 4  ;;  %s6748_s0 = smov [#allocation13]   ;;  %s648_s21 = int_to_ptr.vmem [resolvable:$true] %s647_s21 }
  0x47   : > { %s622_s4 = sshll.u32 %s7829_s28, 4  ;;  %s674_s8 = sshll.u32 %s6748_s0, 4  ;;  %s623_s4 = int_to_ptr.hbm [resolvable:$true] %s622_s4  ;;  %s675_s8 = int_to_ptr.vmem [resolvable:$true] %s674_s8 }
  0x48   : > { %5880 = dma.hbm_to_vmem [thread:$0]  (!%p6959_p12), %s623_s4, 16, %s625_s25, [#allocation6]  }
  0x49   : > { %s702_s4 = sshll.u32 %s7763_s10, 4  ;;  %s730_s1 = sshll.u32 %s7766_s13, 4  ;;  %s703_s4 = int_to_ptr.hbm [resolvable:$true] %s702_s4  ;;  %s731_s1 = int_to_ptr.hbm [resolvable:$true] %s730_s1 }
  0x4a   : > { %s645_s27 = sshll.u32 %s7831_s29, 4  ;;  %s6749_s29 = smov [#allocation16]   ;;  %s646_s27 = int_to_ptr.hbm [resolvable:$true] %s645_s27 }
  0x4b   : > { %s672_s28 = sshll.u32 %s7832_s2, 4  ;;  %s704_s6 = sshll.u32 %s6749_s29, 4  ;;  %s673_s28 = int_to_ptr.hbm [resolvable:$true] %s672_s28  ;;  %s705_s6 = int_to_ptr.vmem [resolvable:$true] %s704_s6 }
  0x4c   : > { %5886 = dma.hbm_to_vmem [thread:$0]  (!%p6959_p12), %s646_s27, 3072, %s648_s21, [#allocation9], %s7830_s11, %s7830_s11, %s6741_s5  }
  0x4d   : > { %5892 = dma.hbm_to_vmem [thread:$0]  (!%p6959_p12), %s673_s28, 16, %s675_s8, [#allocation12]  }
  0x4e   : > { %5898 = dma.hbm_to_vmem [thread:$0]  (!%p6959_p12), %s703_s4, 16, %s705_s6, [#allocation15]  }
  0x4f   : > { %s6750_s11 = smov [#allocation19]   ;;  %s6751_s5 = smov 64  }
  0x50   : > { %s732_s21 = sshll.u32 %s6750_s11, 4  ;;  %s6752_s27 = smov 4   ;;  %s733_s21 = int_to_ptr.vmem [resolvable:$true] %s732_s21 }
  0x51   : > { %5904 = dma.hbm_to_vmem [thread:$0]  (!%p6959_p12), %s731_s1, 2048, %s733_s21, [#allocation18], %s6751_s5, %s6751_s5, %s6752_s27  }
  0x52   : > { %s770_s28 = sshll.u32 %s7772_s19, 4  ;;  %s6753_s0 = smov [#allocation22]   ;;  %s771_s28 = int_to_ptr.hbm [resolvable:$true] %s770_s28 }
  0x53   : > { %s772_s8 = sshll.u32 %s6753_s0, 4  ;;  %s801_s4 = sshll.u32 %s7775_s22, 4  ;;  %s773_s8 = int_to_ptr.vmem [resolvable:$true] %s772_s8  ;;  %s802_s4 = int_to_ptr.hbm [resolvable:$true] %s801_s4 }
  0x54   : > { %5910 = dma.hbm_to_vmem [thread:$0]  (!%p6959_p12), %s771_s28, 4096, %s773_s8, [#allocation21], %s6751_s5, %s6751_s5, %s6752_s27  }
  0x55   : > { %s6754_s25 = smov [#allocation25]   ;;  %s830_s6 = sshll.u32 %s7777_s24, 4  ;;  %s831_s6 = int_to_ptr.hbm [resolvable:$true] %s830_s6 }
  0x56   : > { %s803_s17 = sshll.u32 %s6754_s25, 4  ;;  %s7833_s11 = smov 1   ;;  %s804_s17 = int_to_ptr.vmem [resolvable:$true] %s803_s17 }
  0x57   : > { %s7834_s21 = smov 16   ;;  %s6755_s3 = smov [#allocation28]  }
  0x58   : > { %5916 = dma.hbm_to_vmem [thread:$0]  (!%p6959_p12), %s802_s4, 32, %s804_s17, [#allocation24], %s7834_s21, %s7834_s21, %s7833_s11  }
  0x59   : > { %s832_s2 = sshll.u32 %s6755_s3, 4  ;;  %853 = sbr.rel (%p6945_p10) target bundleno = 6214 (0x1846), region = 120  ;;  %s833_s2 = int_to_ptr.vmem [resolvable:$true] %s832_s2 }
  0x5a   : > { %5922 = dma.hbm_to_vmem [thread:$0]  (!%p6959_p12), %s831_s6, 16, %s833_s2, [#allocation27]  }
  0x5e   : > { %6682 = dma.done.wait (%p5927_p9), [#allocation6], 16  }
  0x5f   : > { %6684 = vsyncadd (%p5927_p9), [#allocation6], 4294967280 }
  0x60   : > { %6686 = dma.done.wait (%p5927_p9), [#allocation9], 3088  }
  0x61   : > { %6688 = vsyncadd (%p5927_p9), [#allocation9], 4294964208 }
  0x62   : > { %6690 = dma.done.wait (%p5927_p9), [#allocation12], 32  }
  0x63   : > { %6692 = vsyncadd (%p5927_p9), [#allocation12], 4294967264 }
  0x64   : > { %6694 = dma.done.wait (%p5927_p9), [#allocation15], 32  }
  0x65   : > { %6696 = vsyncadd (%p5927_p9), [#allocation15], 4294967264 }
  0x66   : > { %6698 = dma.done.wait (%p5927_p9), [#allocation18], 8192  }
  0x67   : > { %6700 = vsyncadd (%p5927_p9), [#allocation18], 4294959104 }
  0x68   : > { %6702 = dma.done.wait (%p5927_p9), [#allocation21], 8192  }
  0x69   : > { %6704 = vsyncadd (%p5927_p9), [#allocation21], 4294959104 }
  0x6a   : > { %6706 = dma.done.wait (%p5927_p9), [#allocation24], 64  }
  0x6b   : > { %6708 = vsyncadd (%p5927_p9), [#allocation24], 4294967232 }
  0x6c   : > { %6710 = dma.done.wait (%p5927_p9), [#allocation27], 2064  }
  0x6d   : > { %6712 = vsyncadd (%p5927_p9), [#allocation27], 4294965232  ;;  %p992_p13 = scmp.lt.s32.totalorder %s6917_s7, 1  ;;  %v6756_v0 = vmov 0   ;;  %s7835_s28 = sld [smem:[#allocation47_spill]]  ;;  %vm1330_vm0 = vcmask 1042432  }
  0x6e   : > { %6025 = vset.pattern.permute.xlu2 %v6756_v0  ;;  %6024 = vset.pattern.permute.xlu1 %v6756_v0  ;;  %s7836_s20 = sld [smem:[#allocation48_spill]]  ;;  %vm1326_vm1 = vcmask 547840   ;;  %vm1526_vm5 = vcmask 261120   ;;  %vm1535_vm6 = vcmask 256000   ;;  %vm1775_vm7 = vcmask 253952   ;;  %s6760_s29 = smov 96  }
  0x6f   : > { %6023 = vset.pattern.permute.xlu0 %v6756_v0  ;;  %s993_s30 = scalar_select %p992_p13, %s6917_s7, 1  ;;  %vm2632_vm15 = vcmask 130048  }
  0x70   : > { %s7837_s17 = sld [smem:[#allocation54_spill]]  ;;  %s6761_s1 = smov 32  }
  0x71   : > { %s5814_s9 = smul.u32 136, %s993_s30  ;;  %s7838_s21 = sld [smem:[#allocation56_spill]] }
  0x72   : > { %s6762_s6 = smov 64   ;;  %s7839_s26 = sld [smem:[#allocation59_spill]] }
  0x73   : > { %s7086_s0 = scalar_lea.vmem %s7835_s28, %s5814_s9  ;;  %s7840_s27 = sld [smem:[#allocation40_spill]] }
  0x74   : > { %v4880_v1 = vld [vmem:[%s7086_s0 + $0x82] ss:$2 sm:$0x7]  ;;  %v4861_v3 = vld [vmem:[%s7086_s0 + $0x70] ss:$2 sm:$0xff]  ;;  %s5809_s8 = sshll.u32 %s6917_s7, 4 }
  0x75   : > { %v4862_v2 = vld [vmem:[%s7086_s0 + $0x80] ss:$2 sm:$0x7]  ;;  %1222 = vperm.xlu2 %6025, %v4880_v1   ;;  %1053 = vperm.xlu1 %6024, %v4861_v3   ;;  %v4871_v4 = vld [vmem:[%s7086_s0 + $0x81] ss:$2 sm:$0x7] }
  0x76   : > { %1058 = vperm.xlu0 %6023, %v4862_v2   ;;  %v4870_v5 = vld [vmem:[%s7086_s0 + $0x71] ss:$2 sm:$0xff]  ;;  %v4860_v6 = vld [vmem:[%s7086_s0 + $0x60] ss:$2 sm:$0xff]  ;;  %v4869_v7 = vld [vmem:[%s7086_s0 + $0x61] ss:$2 sm:$0xff] }
  0x77   : > { %v4889_v8 = vld [vmem:[%s7086_s0 + $0x83] ss:$2 sm:$0x7]  ;;  %v4879_v9 = vld [vmem:[%s7086_s0 + $0x72] ss:$2 sm:$0xff] }
  0x78   : > { %v4878_v10 = vld [vmem:[%s7086_s0 + $0x62] ss:$2 sm:$0xff]  ;;  %v4868_v12 = vld [vmem:[%s7086_s0 + $0x51] ss:$2 sm:$0xff]  ;;  %v4867_v13 = vld [vmem:[%s7086_s0 + $0x41] ss:$2 sm:$0xff] }
  0x79   : > { %v4859_v11 = vld [vmem:[%s7086_s0 + $0x50] ss:$2 sm:$0xff]  ;;  %v4888_v14 = vld [vmem:[%s7086_s0 + $0x73] ss:$2 sm:$0xff]  ;;  %v4858_v15 = vld [vmem:[%s7086_s0 + $0x40] ss:$2 sm:$0xff] }
  0x7a   : > { %v4877_v16 = vld [vmem:[%s7086_s0 + $0x52] ss:$2 sm:$0xff]  ;;  %v4887_v18 = vld [vmem:[%s7086_s0 + $0x63] ss:$2 sm:$0xff]  ;;  %v4886_v20 = vld [vmem:[%s7086_s0 + $0x53] ss:$2 sm:$0xff] }
  0x7b   : > { %v4857_v17 = vld [vmem:[%s7086_s0 + $0x30] ss:$2 sm:$0xff]  ;;  %v4866_v19 = vld [vmem:[%s7086_s0 + $0x31] ss:$2 sm:$0xff]  ;;  %v4856_v23 = vld [vmem:[%s7086_s0 + $0x20] ss:$2 sm:$0xff] }
  0x7c   : > { %v4876_v21 = vld [vmem:[%s7086_s0 + $0x42] ss:$2 sm:$0xff]  ;;  %v4875_v22 = vld [vmem:[%s7086_s0 + $0x32] ss:$2 sm:$0xff]  ;;  %v4865_v24 = vld [vmem:[%s7086_s0 + $0x21] ss:$2 sm:$0xff] }
  0x7d   : > { %1048 = vperm.xlu2 %6025, %v4860_v6   ;;  %1135 = vperm.xlu1 %6024, %v4870_v5   ;;  %v4864_v25 = vld [vmem:[%s7086_s0 + $0x11] ss:$2 sm:$0xff]  ;;  %v4855_v27 = vld [vmem:[%s7086_s0 + $0x10] ss:$2 sm:$0xff]  ;;  %v999_v29 = vld [vmem:[%s7086_s0] ss:$2 sm:$0xff] }
  0x7e   : > { %1140 = vperm.xlu0 %6023, %v4871_v4   ;;  %v4885_v26 = vld [vmem:[%s7086_s0 + $0x43] ss:$2 sm:$0xff]  ;;  %v4874_v28 = vld [vmem:[%s7086_s0 + $0x22] ss:$2 sm:$0xff]  ;;  %v4884_v30 = vld [vmem:[%s7086_s0 + $0x33] ss:$2 sm:$0xff] }
  0x7f   : > { %v4863_v31 = vld [vmem:[%s7086_s0 + $0x1] ss:$2 sm:$0xff]  ;;  %v4873_v33 = vld [vmem:[%s7086_s0 + $0x12] ss:$2 sm:$0xff]  ;;  %v4872_v34 = vld [vmem:[%s7086_s0 + $0x2] ss:$2 sm:$0xff] }
  0x80   : > { %v4883_v32 = vld [vmem:[%s7086_s0 + $0x23] ss:$2 sm:$0xff]  ;;  %v4882_v36 = vld [vmem:[%s7086_s0 + $0x13] ss:$2 sm:$0xff]  ;;  %s989_s28 = sand.u32 1, %s7840_s27  }
  0x81   : > { %v4881_v35 = vld [vmem:[%s7086_s0 + $0x3] ss:$2 sm:$0xff]  ;;  %s4853_s0 = sshll.u32 %s989_s28, 4  ;;  %s4597_s30 = scalar_lea.sflag [#allocation7], %s989_s28 }
  0x82   : > { %v998_v42 = vld [vmem:[%s7836_s20] sm:$0xf]  ;;  %s991_s20 = scalar_lea.vmem [#allocation29], %s4853_s0 }
  0x83   : > { %v7127_v44 = vperm.slane %v998_v42, 0  ;;  %v7129_v45 = vperm.slane %v998_v42, 1  ;;  %v7131_v46 = vperm.slane %v998_v42, 2  ;;  %v7133_v48 = vperm.slane %v998_v42, 3  ;;  %s4609_s3 = sshll.u32 %s991_s20, 4  ;;  %s4610_s3 = int_to_ptr.vmem [resolvable:$true] %s4609_s3 }
  0x85   : > { %1304 = vperm.xlu2 %6025, %v4889_v8   ;;  %1217 = vperm.xlu1 %6024, %v4879_v9  }
  0x86   : > { %1130 = vperm.xlu0 %6023, %v4869_v7  }
  0x8d   : > { %1212 = vperm.xlu2 %6025, %v4878_v10   ;;  %1125 = vperm.xlu1 %6024, %v4868_v12  }
  0x8e   : > { %1043 = vperm.xlu0 %6023, %v4859_v11  }
  0x95   : > { %1120 = vperm.xlu2 %6025, %v4867_v13   ;;  %1038 = vperm.xlu1 %6024, %v4858_v15  }
  0x96   : > { %1299 = vperm.xlu0 %6023, %v4888_v14  }
  0x9d   : > { %1033 = vperm.xlu2 %6025, %v4857_v17   ;;  %1294 = vperm.xlu1 %6024, %v4887_v18  }
  0x9e   : > { %1207 = vperm.xlu0 %6023, %v4877_v16  }
  0xa5   : > { %1289 = vperm.xlu2 %6025, %v4886_v20   ;;  %1202 = vperm.xlu1 %6024, %v4876_v21  }
  0xa6   : > { %1115 = vperm.xlu0 %6023, %v4866_v19  }
  0xad   : > { %1197 = vperm.xlu2 %6025, %v4875_v22   ;;  %1110 = vperm.xlu1 %6024, %v4865_v24  }
  0xae   : > { %1028 = vperm.xlu0 %6023, %v4856_v23  }
  0xb5   : > { %1105 = vperm.xlu2 %6025, %v4864_v25   ;;  %1023 = vperm.xlu1 %6024, %v4855_v27  }
  0xb6   : > { %1284 = vperm.xlu0 %6023, %v4885_v26  }
  0xbd   : > { %1018 = vperm.xlu2 %6025, %v999_v29   ;;  %1279 = vperm.xlu1 %6024, %v4884_v30  }
  0xbe   : > { %1192 = vperm.xlu0 %6023, %v4874_v28  }
  0xc5   : > { %1274 = vperm.xlu2 %6025, %v4883_v32   ;;  %1187 = vperm.xlu1 %6024, %v4873_v33  }
  0xc6   : > { %1100 = vperm.xlu0 %6023, %v4863_v31  }
  0xcd   : > { %1264 = vperm.xlu2 %6025, %v4881_v35   ;;  %1269 = vperm.xlu1 %6024, %v4882_v36  }
  0xce   : > { %1182 = vperm.xlu0 %6023, %v4872_v34  }
  0xcf   : > { %v1223_v37 = vpop.permute.xlu2 %1222 }
  0xd0   : > { %v1234_v52 = vmul.f32 %v7131_v46, %v1223_v37 }
  0xd7   : > { %v1049_v38 = vpop.permute.xlu2 %1048 }
  0xd8   : > { %v1068_v10 = vmul.f32 %v7127_v44, %v1049_v38 }
  0xdf   : > { %v1305_v39 = vpop.permute.xlu2 %1304 }
  0xe0   : > { %v1316_v55 = vmul.f32 %v7133_v48, %v1305_v39 }
  0xe7   : > { %v1054_v41 = vpop.permute.xlu1 %1053  ;;  %v1213_v43 = vpop.permute.xlu2 %1212 }
  0xe8   : > { %v1059_v40 = vpop.permute.xlu0 %1058  ;;  %v1069_v0 = vmul.f32 %v7127_v44, %v1054_v41  ;;  %v1232_v14 = vmul.f32 %v7131_v46, %v1213_v43 }
  0xe9   : > { %v1070_v49 = vmul.f32 %v7127_v44, %v1059_v40 }
  0xef   : > { %v1136_v51 = vpop.permute.xlu1 %1135  ;;  %v1121_v54 = vpop.permute.xlu2 %1120 }
  0xf0   : > { %v1141_v47 = vpop.permute.xlu0 %1140  ;;  %v1151_v63 = vmul.f32 %v7129_v45, %v1136_v51  ;;  %v1148_v32 = vmul.f32 %v7129_v45, %v1121_v54 }
  0xf1   : > { %v1152_v50 = vmul.f32 %v7129_v45, %v1141_v47 }
  0xf2   : > { %v1160_v2 = vadd.f32 %v1151_v63, %v1069_v0 }
  0xf3   : > { %v1161_v53 = vadd.f32 %v1152_v50, %v1070_v49 }
  0xf5   : > { %v1243_v56 = vadd.f32 %v1234_v52, %v1161_v53 }
  0xf7   : > { %v7139_v57 = vadd.f32 %v1316_v55, %v1243_v56  ;;  %v1218_v59 = vpop.permute.xlu1 %1217  ;;  %v1034_v60 = vpop.permute.xlu2 %1033 }
  0xf8   : > { %v1131_v58 = vpop.permute.xlu0 %1130  ;;  %v1233_v1 = vmul.f32 %v7131_v46, %v1218_v59  ;;  %v1065_v42 = vmul.f32 %v7127_v44, %v1034_v60 }
  0xf9   : > { %4890 = vmatpush.msk.msra.mxu0 %vm1330_vm0, %v7139_v57  ;;  %v1150_v8 = vmul.f32 %v7129_v45, %v1131_v58 }
  0xfa   : > { %v1242_v5 = vadd.f32 %v1233_v1, %v1160_v2 }
  0xfb   : > { %v1159_v13 = vadd.f32 %v1150_v8, %v1068_v10 }
  0xfd   : > { %v1241_v21 = vadd.f32 %v1232_v14, %v1159_v13 }
  0xff   : > { %v1126_v62 = vpop.permute.xlu1 %1125  ;;  %v1290_v3 = vpop.permute.xlu2 %1289 }
 0x100   : > { %v1044_v61 = vpop.permute.xlu0 %1043  ;;  %v1149_v11 = vmul.f32 %v7129_v45, %v1126_v62  ;;  %v1313_v22 = vmul.f32 %v7133_v48, %v1290_v3 }
 0x101   : > { %v1067_v12 = vmul.f32 %v7127_v44, %v1044_v61 }
 0x103   : > { %v1158_v16 = vadd.f32 %v1149_v11, %v1067_v12 }
 0x107   : > { %v1039_v7 = vpop.permute.xlu1 %1038  ;;  %v1198_v19 = vpop.permute.xlu2 %1197 }
 0x108   : > { %v1300_v4 = vpop.permute.xlu0 %1299  ;;  %v1066_v31 = vmul.f32 %v7127_v44, %v1039_v7  ;;  %v1229_v50 = vmul.f32 %v7131_v46, %v1198_v19 }
 0x109   : > { %v1315_v6 = vmul.f32 %v7133_v48, %v1300_v4 }
 0x10a   : > { %v1157_v35 = vadd.f32 %v1148_v32, %v1066_v31 }
 0x10b   : > { %v7148_v9 = vadd.f32 %v1315_v6, %v1242_v5 }
 0x10d   : > { %1342 = vmatpush.msra.mxu0 %v7148_v9 }
 0x10f   : > { %v1295_v18 = vpop.permute.xlu1 %1294  ;;  %v1106_v28 = vpop.permute.xlu2 %1105 }
 0x110   : > { %v1208_v15 = vpop.permute.xlu0 %1207  ;;  %v1314_v20 = vmul.f32 %v7133_v48, %v1295_v18  ;;  %v1145_v3 = vmul.f32 %v7129_v45, %v1106_v28 }
 0x111   : > { %v1231_v17 = vmul.f32 %v7131_v46, %v1208_v15 }
 0x112   : > { %v7158_v24 = vadd.f32 %v1314_v20, %v1241_v21 }
 0x113   : > { %v1240_v23 = vadd.f32 %v1231_v17, %v1158_v16 }
 0x114   : > { %1343 = vmatpush.msra.mxu0 %v7158_v24 }
 0x115   : > { %v7160_v25 = vadd.f32 %v1313_v22, %v1240_v23 }
 0x117   : > { %1344 = vmatpush.msra.mxu0 %v7160_v25  ;;  %v1203_v27 = vpop.permute.xlu1 %1202  ;;  %v1019_v34 = vpop.permute.xlu2 %1018 }
 0x118   : > { %v1116_v26 = vpop.permute.xlu0 %1115  ;;  %v1230_v33 = vmul.f32 %v7131_v46, %v1203_v27  ;;  %v1062_v5 = vmul.f32 %v7127_v44, %v1019_v34 }
 0x119   : > { %v1147_v40 = vmul.f32 %v7129_v45, %v1116_v26 }
 0x11a   : > { %v1239_v37 = vadd.f32 %v1230_v33, %v1157_v35  ;;  %v1564_v35 = vld [vmem:[#allocation10 + $0x38] sm:$0xff] }
 0x11b   : > { %v1156_v49 = vadd.f32 %v1147_v40, %v1065_v42  ;;  %1592 = vmatpush.msra.mxu2 %v1564_v35  ;;  %v1672_v40 = vld [vmem:[#allocation10 + $0x50] sm:$0xff]  ;;  %v1547_v42 = vld [vmem:[#allocation10 + $0x8] sm:$0xff] }
 0x11d   : > { %v1238_v58 = vadd.f32 %v1229_v50, %v1156_v49  ;;  %v1546_v49 = vld [vmem:[#allocation10] sm:$0xff] }
 0x11f   : > { %v1111_v30 = vpop.permute.xlu1 %1110  ;;  %v1275_v51 = vpop.permute.xlu2 %1274 }
 0x120   : > { %v1029_v29 = vpop.permute.xlu0 %1028  ;;  %v1146_v43 = vmul.f32 %v7129_v45, %v1111_v30  ;;  %v1310_v59 = vmul.f32 %v7133_v48, %v1275_v51  ;;  %v1670_v51 = vld [vmem:[#allocation10 + $0x40] sm:$0xff] }
 0x121   : > { %v1064_v47 = vmul.f32 %v7127_v44, %v1029_v29 }
 0x123   : > { %v1155_v53 = vadd.f32 %v1146_v43, %v1064_v47  ;;  %v1671_v43 = vld [vmem:[#allocation10 + $0x48] sm:$0xff]  ;;  %v1561_v47 = vld [vmem:[#allocation10 + $0x20] sm:$0xff] }
 0x127   : > { %v1024_v39 = vpop.permute.xlu1 %1023  ;;  %v1265_v7 = vpop.permute.xlu2 %1264 }
 0x128   : > { %v1285_v36 = vpop.permute.xlu0 %1284  ;;  %v1063_v1 = vmul.f32 %v7127_v44, %v1024_v39  ;;  %v1308_v15 = vmul.f32 %v7133_v48, %v1265_v7  ;;  %v1548_v39 = vld [vmem:[#allocation10 + $0x10] sm:$0xff] }
 0x129   : > { %v1312_v38 = vmul.f32 %v7133_v48, %v1285_v36  ;;  %v1549_v36 = vld [vmem:[#allocation10 + $0x18] sm:$0xff] }
 0x12a   : > { %v1154_v6 = vadd.f32 %v1145_v3, %v1063_v1  ;;  %1639 = vmatpush.msra.mxu3 %v1549_v36 }
 0x12b   : > { %v1321_v41 = vadd.f32 %v1312_v38, %v1239_v37  ;;  %v1673_v37 = vld [vmem:[#allocation10 + $0x58] sm:$0xff]  ;;  %v1563_v38 = vld [vmem:[#allocation10 + $0x30] sm:$0xff] }
 0x12c   : > { %1593 = vmatpush.msra.mxu2 %v1563_v38  ;;  %1640 = vmatpush.msra.mxu3 %v1548_v39 }
 0x12d   : > { %1345 = vmatpush.msra.mxu0 %v1321_v41 }
 0x12e   : > { %1641 = vmatpush.msra.mxu3 %v1547_v42 }
 0x12f   : > { %v1280_v55 = vpop.permute.xlu1 %1279 }
 0x130   : > { %v1193_v52 = vpop.permute.xlu0 %1192  ;;  %v1311_v56 = vmul.f32 %v7133_v48, %v1280_v55  ;;  %1642 = vmatpush.msra.mxu3 %v1546_v49 }
 0x131   : > { %v1228_v54 = vmul.f32 %v7131_v46, %v1193_v52 }
 0x132   : > { %v1320_v61 = vadd.f32 %v1311_v56, %v1238_v58 }
 0x133   : > { %v1237_v60 = vadd.f32 %v1228_v54, %v1155_v53 }
 0x134   : > { %1346 = vmatpush.msra.mxu0 %v1320_v61 }
 0x135   : > { %v1319_v62 = vadd.f32 %v1310_v59, %v1237_v60 }
 0x137   : > { %1347 = vmatpush.msra.mxu0 %v1319_v62  ;;  %v1188_v0 = vpop.permute.xlu1 %1187 }
 0x138   : > { %v1101_v63 = vpop.permute.xlu0 %1100  ;;  %v1227_v4 = vmul.f32 %v7131_v46, %v1188_v0 }
 0x139   : > { %v1144_v2 = vmul.f32 %v7129_v45, %v1101_v63  ;;  %v6757_v45 = vmov 1.0   ;;  %v7215_v63 = vld [vmem:[#allocation5] ss:$0 sm:$0xff] }
 0x13a   : > { %v1236_v13 = vadd.f32 %v1227_v4, %v1154_v6  ;;  %v7218_v4 = vld [vmem:[#allocation8] ss:$0 sm:$0xff] }
 0x13b   : > { %v1153_v10 = vadd.f32 %v1144_v2, %v1062_v5 }
 0x13f   : > { %v1270_v12 = vpop.permute.xlu1 %1269 }
 0x140   : > { %v1183_v8 = vpop.permute.xlu0 %1182  ;;  %v1309_v14 = vmul.f32 %v7133_v48, %v1270_v12 }
 0x141   : > { %v1226_v11 = vmul.f32 %v7131_v46, %v1183_v8 }
 0x142   : > { %v1318_v17 = vadd.f32 %v1309_v14, %v1236_v13 }
 0x143   : > { %v1235_v16 = vadd.f32 %v1226_v11, %v1153_v10 }
 0x144   : > { %1348 = vmatpush.msra.mxu0 %v1318_v17 }
 0x145   : > { %v1317_v18 = vadd.f32 %v1308_v15, %v1235_v16 }
 0x147   : > { %1349 = vmatpush.msra.mxu0 %v1317_v18 }
 0x148   : > { %4891 = vmatmul.msk.f32.vlgmr.msra.gmra.mxu0 %vm1326_vm1, %v6757_v45 }
 0x149   : > { %1701 = vmatpush.msrb.mxu0 %v1673_v37 }
 0x14b   : > { %1702 = vmatpush.msrb.mxu0 %v1672_v40 }
 0x14d   : > { %1703 = vmatpush.msrb.mxu0 %v1671_v43 }
 0x14f   : > { %1704 = vmatpush.msrb.mxu0 %v1670_v51 }
 0x1c5   : > { %v1351_v44 = vpop.f32.mrf.mxu0 }
 0x1c6   : > { %v1354_v19 = vmul.f32 0.014925373, %v1351_v44 }
 0x1c8   : > { %v1355_v20 = vperm.slane %v1354_v19, 0 }
 0x1ca   : > { %v7186_v46 = vsub.f32 %v7139_v57, %v1355_v20  ;;  %v7189_v21 = vsub.f32 %v7148_v9, %v1355_v20  ;;  %v7194_v22 = vsub.f32 %v7158_v24, %v1355_v20  ;;  %v7200_v26 = vsub.f32 %v7160_v25, %v1355_v20 }
 0x1cb   : > { %v7204_v9 = vsub.f32 %v1321_v41, %v1355_v20  ;;  %v7208_v24 = vsub.f32 %v1320_v61, %v1355_v20  ;;  %v1358_v29 = vsub.f32 %v1319_v62, %v1355_v20  ;;  %v1357_v30 = vsub.f32 %v1318_v17, %v1355_v20  ;;  %v1562_v41 = vld [vmem:[#allocation10 + $0x28] sm:$0xff] }
 0x1cc   : > { %v1373_v48 = vmul.f32 %v7186_v46, %v7186_v46  ;;  %v1372_v23 = vmul.f32 %v7189_v21, %v7189_v21  ;;  %v1371_v57 = vmul.f32 %v7194_v22, %v7194_v22  ;;  %v1370_v27 = vmul.f32 %v7200_v26, %v7200_v26  ;;  %1594 = vmatpush.msra.mxu2 %v1562_v41 }
 0x1cd   : > { %v1369_v28 = vmul.f32 %v7204_v9, %v7204_v9  ;;  %v1368_v25 = vmul.f32 %v7208_v24, %v7208_v24  ;;  %v1367_v31 = vmul.f32 %v1358_v29, %v1358_v29  ;;  %v1356_v32 = vsub.f32 %v1317_v18, %v1355_v20 }
 0x1ce   : > { %4892 = vmatpush.msk.msra.mxu1 %vm1330_vm0, %v1373_v48  ;;  %v1366_v33 = vmul.f32 %v1357_v30, %v1357_v30  ;;  %1595 = vmatpush.msra.mxu2 %v1561_v47 }
 0x1cf   : > { %v1365_v34 = vmul.f32 %v1356_v32, %v1356_v32 }
 0x1d0   : > { %1385 = vmatpush.msra.mxu1 %v1372_v23 }
 0x1d2   : > { %1386 = vmatpush.msra.mxu1 %v1371_v57 }
 0x1d4   : > { %1387 = vmatpush.msra.mxu1 %v1370_v27 }
 0x1d6   : > { %1388 = vmatpush.msra.mxu1 %v1369_v28 }
 0x1d8   : > { %1389 = vmatpush.msra.mxu1 %v1368_v25 }
 0x1da   : > { %1390 = vmatpush.msra.mxu1 %v1367_v31 }
 0x1dc   : > { %1391 = vmatpush.msra.mxu1 %v1366_v33 }
 0x1de   : > { %1392 = vmatpush.msra.mxu1 %v1365_v34 }
 0x1df   : > { %4893 = vmatmul.msk.f32.vlgmr.msra.gmra.mxu1 %vm1326_vm1, %v6757_v45 }
 0x1e0   : > { %5810 = vmatpush.msrb.mxu1 %v1673_v37 }
 0x1e2   : > { %5811 = vmatpush.msrb.mxu1 %v1672_v40 }
 0x1e4   : > { %5812 = vmatpush.msrb.mxu1 %v1671_v43 }
 0x1e6   : > { %5813 = vmatpush.msrb.mxu1 %v1670_v51 }
 0x25c   : > { %v1394_v50 = vpop.f32.mrf.mxu1 }
 0x25d   : > { %v1397_v52 = vmul.f32 0.014925373, %v1394_v50 }
 0x25f   : > { %v1398_v53 = vadd.f32 1e-05, %v1397_v52 }
 0x261   : > { %6045 = vrsqrt.f32 %v1398_v53  ;;  %vm1405_vm3 = vweird.f32 %v1398_v53 }
 0x267   : > { %v6046_v54 = vpop.eup %6045 }
 0x268   : > { %v1400_v55 = vmul.f32 %v6046_v54, %v1398_v53  ;;  %vm1406_vm2 = vweird.f32 %v6046_v54 }
 0x269   : > { %vm1407_vm4 = vmor %vm1405_vm3, %vm1406_vm2 }
 0x26a   : > { %v1401_v56 = vmul.f32 %v6046_v54, %v1400_v55 }
 0x26c   : > { %v1402_v58 = vmul.f32 0.5, %v1401_v56 }
 0x26e   : > { %v1403_v59 = vsub.f32 1.5, %v1402_v58 }
 0x270   : > { %v1404_v60 = vmul.f32 %v6046_v54, %v1403_v59 }
 0x272   : > { %v1408_v61 = vsel %vm1407_vm4, %v6046_v54, %v1404_v60 }
 0x273   : > { %v1409_v62 = vperm.slane %v1408_v61, 0 }
 0x275   : > { %v1410_v0 = vmul.f32 %v1409_v62, %v1356_v32  ;;  %v1411_v1 = vmul.f32 %v1409_v62, %v1357_v30  ;;  %v1412_v2 = vmul.f32 %v1409_v62, %v1358_v29  ;;  %v1413_v3 = vmul.f32 %v1409_v62, %v7208_v24 }
 0x276   : > { %v1414_v5 = vmul.f32 %v1409_v62, %v7204_v9  ;;  %v1415_v6 = vmul.f32 %v1409_v62, %v7200_v26  ;;  %v1416_v7 = vmul.f32 %v1409_v62, %v7194_v22  ;;  %v1418_v8 = vmul.f32 %v1409_v62, %v7186_v46 }
 0x277   : > { %v1423_v10 = vmul.f32 %v7215_v63, %v1410_v0  ;;  %v1424_v11 = vmul.f32 %v7215_v63, %v1411_v1  ;;  %v1425_v12 = vmul.f32 %v7215_v63, %v1412_v2  ;;  %v1417_v13 = vmul.f32 %v1409_v62, %v7189_v21 }
 0x278   : > { %v1426_v14 = vmul.f32 %v7215_v63, %v1413_v3  ;;  %v1427_v15 = vmul.f32 %v7215_v63, %v1414_v5  ;;  %v1428_v16 = vmul.f32 %v7215_v63, %v1415_v6  ;;  %v1431_v44 = vmul.f32 %v7215_v63, %v1418_v8 }
 0x279   : > { %v7232_v17 = vadd.f32 %v7218_v4, %v1423_v10  ;;  %v7235_v18 = vadd.f32 %v7218_v4, %v1424_v11  ;;  %v7238_v45 = vadd.f32 %v7218_v4, %v1425_v12  ;;  %v1429_v21 = vmul.f32 %v7215_v63, %v1416_v7 }
 0x27a   : > { %v7242_v19 = vadd.f32 %v7218_v4, %v1426_v14  ;;  %v7245_v20 = vadd.f32 %v7218_v4, %v1427_v15  ;;  %v7248_v46 = vadd.f32 %v7218_v4, %v1428_v16  ;;  %v7258_v26 = vadd.f32 %v7218_v4, %v1431_v44 }
 0x27b   : > { %v1445_v48 = vmul.f32 %v7232_v17, %v7232_v17  ;;  %v1446_v22 = vmul.f32 %v7235_v18, %v7235_v18  ;;  %v1447_v23 = vmul.f32 %v7238_v45, %v7238_v45  ;;  %v7267_v24 = vadd.f32 %v7218_v4, %v1429_v21 }
 0x27c   : > { %v1448_v57 = vmul.f32 %v7242_v19, %v7242_v19  ;;  %v1449_v9 = vmul.f32 %v7245_v20, %v7245_v20  ;;  %v1450_v27 = vmul.f32 %v7248_v46, %v7248_v46  ;;  %v1453_v30 = vmul.f32 %v7258_v26, %v7258_v26 }
 0x27d   : > { %v1454_v28 = vmul.f32 %v1445_v48, %v7232_v17  ;;  %v1455_v29 = vmul.f32 %v1446_v22, %v7235_v18  ;;  %v1456_v25 = vmul.f32 %v1447_v23, %v7238_v45  ;;  %v1451_v34 = vmul.f32 %v7267_v24, %v7267_v24 }
 0x27e   : > { %v1457_v31 = vmul.f32 %v1448_v57, %v7242_v19  ;;  %v1458_v32 = vmul.f32 %v1449_v9, %v7245_v20  ;;  %v1459_v33 = vmul.f32 %v1450_v27, %v7248_v46  ;;  %v1462_v38 = vmul.f32 %v1453_v30, %v7258_v26 }
 0x27f   : > { %v1463_v35 = vmul.f32 0.044715, %v1454_v28  ;;  %v1464_v36 = vmul.f32 0.044715, %v1455_v29  ;;  %v1465_v37 = vmul.f32 0.044715, %v1456_v25  ;;  %v1460_v42 = vmul.f32 %v1451_v34, %v7267_v24 }
 0x280   : > { %v1466_v39 = vmul.f32 0.044715, %v1457_v31  ;;  %v1467_v40 = vmul.f32 0.044715, %v1458_v32  ;;  %v1468_v41 = vmul.f32 0.044715, %v1459_v33  ;;  %v1430_v0 = vmul.f32 %v7215_v63, %v1417_v13 }
 0x281   : > { %v1472_v43 = vadd.f32 %v1463_v35, %v7232_v17  ;;  %v1473_v47 = vadd.f32 %v1464_v36, %v7235_v18  ;;  %v1474_v49 = vadd.f32 %v1465_v37, %v7238_v45  ;;  %v1471_v50 = vmul.f32 0.044715, %v1462_v38 }
 0x282   : > { %v1475_v51 = vadd.f32 %v1466_v39, %v7242_v19  ;;  %v1476_v52 = vadd.f32 %v1467_v40, %v7245_v20  ;;  %v1477_v53 = vadd.f32 %v1468_v41, %v7248_v46  ;;  %v1469_v54 = vmul.f32 0.044715, %v1460_v42 }
 0x283   : > { %v1481_v55 = vmul.f32 0.7978846, %v1472_v43  ;;  %v1482_v56 = vmul.f32 0.7978846, %v1473_v47  ;;  %v1483_v58 = vmul.f32 0.7978846, %v1474_v49  ;;  %v1480_v59 = vadd.f32 %v1471_v50, %v7258_v26 }
 0x284   : > { %v1478_v60 = vadd.f32 %v1469_v54, %v7267_v24  ;;  %v1484_v62 = vmul.f32 0.7978846, %v1475_v51  ;;  %v1485_v1 = vmul.f32 0.7978846, %v1476_v52  ;;  %v1486_v2 = vmul.f32 0.7978846, %v1477_v53 }
 0x285   : > { %6047 = vtanh.f32 %v1481_v55  ;;  %v1489_v61 = vmul.f32 0.7978846, %v1480_v59  ;;  %v7291_v3 = vadd.f32 %v7218_v4, %v1430_v0 }
 0x286   : > { %6049 = vtanh.f32 %v1482_v56  ;;  %v1487_v5 = vmul.f32 0.7978846, %v1478_v60 }
 0x287   : > { %6051 = vtanh.f32 %v1483_v58  ;;  %v1452_v6 = vmul.f32 %v7291_v3, %v7291_v3 }
 0x288   : > { %6053 = vtanh.f32 %v1489_v61 }
 0x289   : > { %6055 = vtanh.f32 %v1484_v62  ;;  %v1461_v8 = vmul.f32 %v1452_v6, %v7291_v3 }
 0x28a   : > { %6057 = vtanh.f32 %v1485_v1 }
 0x28b   : > { %v6048_v7 = vpop.eup %6047  ;;  %6059 = vtanh.f32 %v1486_v2  ;;  %v1470_v13 = vmul.f32 0.044715, %v1461_v8 }
 0x28c   : > { %v6050_v10 = vpop.eup %6049  ;;  %v1499_v63 = vadd.f32 1.0, %v6048_v7  ;;  %6061 = vtanh.f32 %v1487_v5 }
 0x28d   : > { %v6052_v11 = vpop.eup %6051  ;;  %v1500_v12 = vadd.f32 1.0, %v6050_v10  ;;  %v1479_v48 = vadd.f32 %v1470_v13, %v7291_v3 }
 0x28e   : > { %v6054_v14 = vpop.eup %6053  ;;  %v1508_v4 = vmul.f32 0.5, %v1499_v63  ;;  %v1501_v15 = vadd.f32 1.0, %v6052_v11 }
 0x28f   : > { %v6056_v16 = vpop.eup %6055  ;;  %v1509_v44 = vmul.f32 0.5, %v1500_v12  ;;  %v1507_v21 = vadd.f32 1.0, %v6054_v14  ;;  %v1488_v30 = vmul.f32 0.7978846, %v1479_v48  ;;  %v1793_v48 = vld [vmem:[#allocation10 + $0x98] sm:$0xff] }
 0x290   : > { %v6058_v22 = vpop.eup %6057  ;;  %v1517_v23 = vmul.f32 %v1508_v4, %v7232_v17  ;;  %v1510_v57 = vmul.f32 0.5, %v1501_v15  ;;  %v1502_v9 = vadd.f32 1.0, %v6056_v16  ;;  %1812 = vmatpush.msra.mxu1 %v1793_v48 }
 0x291   : > { %v6060_v27 = vpop.eup %6059  ;;  %v1518_v28 = vmul.f32 %v1509_v44, %v7235_v18  ;;  %v1516_v29 = vmul.f32 0.5, %v1507_v21  ;;  %v1503_v25 = vadd.f32 1.0, %v6058_v22  ;;  %6063 = vtanh.f32 %v1488_v30 }
 0x292   : > { %v6062_v31 = vpop.eup %6061  ;;  %1527 = vst.msk [vmem:[#allocation2] sm:$0xff] %vm1526_vm5, %v1517_v23  ;;  %v1519_v32 = vmul.f32 %v1510_v57, %v7238_v45  ;;  %v1511_v33 = vmul.f32 0.5, %v1502_v9  ;;  %v1504_v34 = vadd.f32 1.0, %v6060_v27  ;;  %v1792_v57 = vld [vmem:[#allocation10 + $0x90] sm:$0xff] }
 0x293   : > { %1528 = vst.msk [vmem:[#allocation2 + $0x8] sm:$0xff] %vm1526_vm5, %v1518_v28  ;;  %v1525_v17 = vmul.f32 %v1516_v29, %v7258_v26  ;;  %v1512_v35 = vmul.f32 0.5, %v1503_v25  ;;  %v1505_v36 = vadd.f32 1.0, %v6062_v31  ;;  %1813 = vmatpush.msra.mxu1 %v1792_v57  ;;  %v1791_v29 = vld [vmem:[#allocation10 + $0x88] sm:$0xff]  ;;  %v1790_v31 = vld [vmem:[#allocation10 + $0x80] sm:$0xff] }
 0x294   : > { %1529 = vst.msk [vmem:[#allocation2 + $0x10] sm:$0xff] %vm1526_vm5, %v1519_v32  ;;  %v1520_v18 = vmul.f32 %v1511_v33, %v7242_v19  ;;  %v1513_v37 = vmul.f32 0.5, %v1504_v34 }
 0x295   : > { %1536 = vst.msk [vmem:[#allocation2 + $0x40] sm:$0x7] %vm1535_vm6, %v1525_v17  ;;  %v1521_v38 = vmul.f32 %v1512_v35, %v7245_v20  ;;  %v1514_v39 = vmul.f32 0.5, %v1505_v36  ;;  %1814 = vmatpush.msra.mxu1 %v1791_v29  ;;  %v1860_v36 = vld [vmem:[#allocation10 + $0xb8] sm:$0xff] }
 0x296   : > { %1530 = vst.msk [vmem:[#allocation2 + $0x18] sm:$0xff] %vm1526_vm5, %v1520_v18  ;;  %v1522_v45 = vmul.f32 %v1513_v37, %v7248_v46  ;;  %1879 = vmatpush.msrb.mxu2 %v1860_v36 }
 0x297   : > { %1531 = vst.msk [vmem:[#allocation2 + $0x20] sm:$0xff] %vm1526_vm5, %v1521_v38  ;;  %v1523_v26 = vmul.f32 %v1514_v39, %v7267_v24  ;;  %v6064_v40 = vpop.eup %6063  ;;  %1815 = vmatpush.msra.mxu1 %v1790_v31 }
 0x298   : > { %1532 = vst.msk [vmem:[#allocation2 + $0x28] sm:$0xff] %vm1526_vm5, %v1522_v45  ;;  %v1506_v42 = vadd.f32 1.0, %v6064_v40  ;;  %v1859_v45 = vld [vmem:[#allocation10 + $0xb0] sm:$0xff]  ;;  %v1784_v40 = vld [vmem:[#allocation10 + $0x78] sm:$0xff] }
 0x299   : > { %1533 = vst.msk [vmem:[#allocation2 + $0x30] sm:$0xff] %vm1526_vm5, %v1523_v26  ;;  %1880 = vmatpush.msrb.mxu2 %v1859_v45  ;;  %v1858_v26 = vld [vmem:[#allocation10 + $0xa8] sm:$0xff] }
 0x29a   : > { %v1551_v41 = vld [vmem:[#allocation2 + $0x1] ss:$2 sm:$0xff]  ;;  %v1537_v19 = vld [vmem:[#allocation2] ss:$2 sm:$0xff]  ;;  %v1515_v43 = vmul.f32 0.5, %v1506_v42 }
 0x29b   : > { %4894 = vmatmul.msk.f32.vlgmr.msra.gmra.mxu2 %vm1526_vm5, %v1551_v41  ;;  %4899 = vmatmul.msk.f32.vlgmr.msra.gmra.mxu3 %vm1526_vm5, %v1537_v19  ;;  %v1660_v20 = vld [vmem:[#allocation2 + $0x2] ss:$2 sm:$0xff] }
 0x29c   : > { %4904 = vmatmul.msk.f32.vlgmr.msrb.gmra.mxu0 %vm1526_vm5, %v1660_v20  ;;  %v1668_v46 = vld [vmem:[#allocation2 + $0x42] ss:$2 sm:$0x1]  ;;  %v1524_v24 = vmul.f32 %v1515_v43, %v7291_v3  ;;  %v1559_v58 = vld [vmem:[#allocation2 + $0x41] ss:$2 sm:$0x1]  ;;  %1881 = vmatpush.msrb.mxu2 %v1858_v26 }
 0x29d   : > { %4908 = vmatmul.msk.f32.vlgmr.msrb.gmra.mxu1 %vm1526_vm5, %v1668_v46  ;;  %v1553_v47 = vld [vmem:[#allocation2 + $0x11] ss:$2 sm:$0xff]  ;;  %v1539_v49 = vld [vmem:[#allocation2 + $0x10] ss:$2 sm:$0xff] }
 0x29e   : > { %1534 = vst.msk [vmem:[#allocation2 + $0x38] sm:$0xff] %vm1526_vm5, %v1524_v24  ;;  %v1662_v50 = vld [vmem:[#allocation2 + $0x12] ss:$2 sm:$0xff]  ;;  %1841 = vmatpush.msrb.mxu1 %v1784_v40 }
 0x29f   : > { %v1555_v51 = vld [vmem:[#allocation2 + $0x21] ss:$2 sm:$0xff]  ;;  %v1541_v52 = vld [vmem:[#allocation2 + $0x20] ss:$2 sm:$0xff]  ;;  %v1782_v24 = vld [vmem:[#allocation10 + $0x68] sm:$0xff] }
 0x2a0   : > { %v1664_v53 = vld [vmem:[#allocation2 + $0x22] ss:$2 sm:$0xff]  ;;  %v1545_v59 = vld [vmem:[#allocation2 + $0x40] ss:$2 sm:$0x1] }
 0x2a1   : > { %v1857_v20 = vld [vmem:[#allocation10 + $0xa0] sm:$0xff]  ;;  %v1783_v46 = vld [vmem:[#allocation10 + $0x70] sm:$0xff] }
 0x2a2   : > { %1842 = vmatpush.msrb.mxu1 %v1783_v46  ;;  %1882 = vmatpush.msrb.mxu2 %v1857_v20 }
 0x2a3   : > { %4895 = vmatmul.msk.f32.gmra.mxu2 %vm1526_vm5, %v1553_v47  ;;  %4900 = vmatmul.msk.f32.gmra.mxu3 %vm1526_vm5, %v1539_v49 }
 0x2a4   : > { %4905 = vmatmul.msk.f32.gmra.mxu0 %vm1526_vm5, %v1662_v50  ;;  %1843 = vmatpush.msrb.mxu1 %v1782_v24 }
 0x2a5   : > { %v1557_v54 = vld [vmem:[#allocation2 + $0x31] ss:$2 sm:$0xff]  ;;  %v1543_v55 = vld [vmem:[#allocation2 + $0x30] ss:$2 sm:$0xff] }
 0x2a6   : > { %v1666_v56 = vld [vmem:[#allocation2 + $0x32] ss:$2 sm:$0xff] }
 0x2ab   : > { %4896 = vmatmul.msk.f32.gmra.mxu2 %vm1526_vm5, %v1555_v51  ;;  %4901 = vmatmul.msk.f32.gmra.mxu3 %vm1526_vm5, %v1541_v52  ;;  %v1781_v52 = vld [vmem:[#allocation10 + $0x60] sm:$0xff] }
 0x2ac   : > { %4906 = vmatmul.msk.f32.gmra.mxu0 %vm1526_vm5, %v1664_v53  ;;  %1844 = vmatpush.msrb.mxu1 %v1781_v52 }
 0x2b3   : > { %4897 = vmatmul.msk.f32.gmra.mxu2 %vm1526_vm5, %v1557_v54  ;;  %4902 = vmatmul.msk.f32.gmra.mxu3 %vm1526_vm5, %v1543_v55 }
 0x2b4   : > { %4907 = vmatmul.msk.f32.gmra.mxu0 %vm1526_vm5, %v1666_v56 }
 0x2bb   : > { %4898 = vmatmul.msk.f32.gmra.mxu2 %vm1526_vm5, %v1559_v58  ;;  %4903 = vmatmul.msk.f32.gmra.mxu3 %vm1526_vm5, %v1545_v59 }
 0x319   : > { %v1706_v60 = vpop.f32.mrf.mxu0 }
 0x31a   : > { %v1718_v55 = vpop.f32.mrf.mxu1 }
 0x31e   : > { %v1597_v61 = vpop.f32.mrf.mxu2  ;;  %v1644_v62 = vpop.f32.mrf.mxu3 }
 0x31f   : > { %v1645_v0 = vadd.f32 %v1644_v62, %v1597_v61 }
 0x321   : > { %v1721_v1 = vadd.f32 %v1706_v60, %v1645_v0  ;;  %v1709_v3 = vpop.f32.mrf.mxu0 }
 0x323   : > { %v1726_v2 = vmul.f32 %v1721_v1, %v1721_v1 }
 0x325   : > { %v1731_v5 = vmul.f32 %v1726_v2, %v1721_v1 }
 0x326   : > { %v1600_v6 = vpop.f32.mrf.mxu2  ;;  %v1647_v7 = vpop.f32.mrf.mxu3 }
 0x327   : > { %v1736_v8 = vmul.f32 0.044715, %v1731_v5  ;;  %v1648_v10 = vadd.f32 %v1647_v7, %v1600_v6 }
 0x329   : > { %v1741_v63 = vadd.f32 %v1736_v8, %v1721_v1  ;;  %v7329_v11 = vadd.f32 %v1709_v3, %v1648_v10  ;;  %v1712_v4 = vpop.f32.mrf.mxu0 }
 0x32b   : > { %v1746_v12 = vmul.f32 0.7978846, %v1741_v63  ;;  %v1727_v13 = vmul.f32 %v7329_v11, %v7329_v11 }
 0x32d   : > { %6065 = vtanh.f32 %v1746_v12  ;;  %v1732_v14 = vmul.f32 %v1727_v13, %v7329_v11 }
 0x32e   : > { %v1603_v15 = vpop.f32.mrf.mxu2  ;;  %v1650_v16 = vpop.f32.mrf.mxu3 }
 0x32f   : > { %v1737_v44 = vmul.f32 0.044715, %v1732_v14  ;;  %v1651_v21 = vadd.f32 %v1650_v16, %v1603_v15 }
 0x331   : > { %v1742_v22 = vadd.f32 %v1737_v44, %v7329_v11  ;;  %v7335_v23 = vadd.f32 %v1712_v4, %v1651_v21  ;;  %v1715_v37 = vpop.f32.mrf.mxu0 }
 0x333   : > { %v6066_v9 = vpop.eup %6065  ;;  %v1747_v27 = vmul.f32 0.7978846, %v1742_v22  ;;  %v1728_v28 = vmul.f32 %v7335_v23, %v7335_v23 }
 0x334   : > { %v1756_v25 = vadd.f32 1.0, %v6066_v9 }
 0x335   : > { %6067 = vtanh.f32 %v1747_v27  ;;  %v1733_v30 = vmul.f32 %v1728_v28, %v7335_v23 }
 0x336   : > { %v1761_v32 = vmul.f32 0.5, %v1756_v25  ;;  %v1606_v33 = vpop.f32.mrf.mxu2  ;;  %v1653_v34 = vpop.f32.mrf.mxu3 }
 0x337   : > { %v1738_v17 = vmul.f32 0.044715, %v1733_v30  ;;  %v1654_v35 = vadd.f32 %v1653_v34, %v1606_v33 }
 0x338   : > { %v1766_v18 = vmul.f32 %v1761_v32, %v1721_v1 }
 0x339   : > { %v1743_v38 = vadd.f32 %v1738_v17, %v7335_v23  ;;  %v1724_v39 = vadd.f32 %v1715_v37, %v1654_v35 }
 0x33a   : > { %1771 = vst.msk [vmem:[#allocation3] sm:$0xff] %vm1526_vm5, %v1766_v18 }
 0x33b   : > { %v6068_v41 = vpop.eup %6067  ;;  %v1748_v19 = vmul.f32 0.7978846, %v1743_v38  ;;  %v1729_v42 = vmul.f32 %v1724_v39, %v1724_v39 }
 0x33c   : > { %v1757_v43 = vadd.f32 1.0, %v6068_v41 }
 0x33d   : > { %6069 = vtanh.f32 %v1748_v19  ;;  %v1734_v47 = vmul.f32 %v1729_v42, %v1724_v39 }
 0x33e   : > { %v1762_v49 = vmul.f32 0.5, %v1757_v43  ;;  %v1609_v50 = vpop.f32.mrf.mxu2  ;;  %v1656_v51 = vpop.f32.mrf.mxu3 }
 0x33f   : > { %v1739_v53 = vmul.f32 0.044715, %v1734_v47  ;;  %v1657_v54 = vadd.f32 %v1656_v51, %v1609_v50 }
 0x340   : > { %v1767_v56 = vmul.f32 %v1762_v49, %v7329_v11  ;;  %v6758_v49 = vmov 32.0  }
 0x341   : > { %v1744_v58 = vadd.f32 %v1739_v53, %v1724_v39  ;;  %v1725_v59 = vadd.f32 %v1718_v55, %v1657_v54 }
 0x342   : > { %1772 = vst.msk [vmem:[#allocation3 + $0x8] sm:$0xff] %vm1526_vm5, %v1767_v56 }
 0x343   : > { %v6070_v60 = vpop.eup %6069  ;;  %v1749_v61 = vmul.f32 0.7978846, %v1744_v58  ;;  %v1730_v62 = vmul.f32 %v1725_v59, %v1725_v59 }
 0x344   : > { %v1758_v0 = vadd.f32 1.0, %v6070_v60 }
 0x345   : > { %6071 = vtanh.f32 %v1749_v61  ;;  %v1735_v1 = vmul.f32 %v1730_v62, %v1725_v59 }
 0x346   : > { %v1763_v2 = vmul.f32 0.5, %v1758_v0 }
 0x347   : > { %v1740_v3 = vmul.f32 0.044715, %v1735_v1 }
 0x348   : > { %v1768_v5 = vmul.f32 %v1763_v2, %v7335_v23 }
 0x349   : > { %v1745_v6 = vadd.f32 %v1740_v3, %v1725_v59  ;;  %v1786_v7 = vld [vmem:[#allocation3 + $0x1] ss:$2 sm:$0xff]  ;;  %v1777_v21 = vld [vmem:[#allocation3] ss:$2 sm:$0xff] }
 0x34a   : > { %1773 = vst.msk [vmem:[#allocation3 + $0x10] sm:$0xff] %vm1526_vm5, %v1768_v5  ;;  %4909 = vmatmul.msk.f32.vlgmr.msra.gmra.mxu1 %vm1526_vm5, %v1786_v7  ;;  %v5648_v5 = vld [vmem:[%s7837_s17 + $0x8] sm:$0xff] }
 0x34b   : > { %v6072_v8 = vpop.eup %6071  ;;  %v1750_v10 = vmul.f32 0.7978846, %v1745_v6  ;;  %2003 = vmatpush.bf16.msrb.mxu3 %v5648_v5  ;;  %v6030_v5 = vld [vmem:[#allocation14] ss:$0 sm:$0xff] }
 0x34c   : > { %v1759_v63 = vadd.f32 1.0, %v6072_v8  ;;  %v5647_v8 = vld [vmem:[%s7837_s17] sm:$0xff] }
 0x34d   : > { %6073 = vtanh.f32 %v1750_v10 }
 0x34e   : > { %v1764_v11 = vmul.f32 0.5, %v1759_v63  ;;  %v5664_v63 = vld [vmem:[%s7838_s21 + $0x78] sm:$0xff] }
 0x34f   : > { %2004 = vmatpush.bf16.msrb.mxu3 %v5647_v8  ;;  %2103 = vmatpush.bf16.msra.mxu0 %v5664_v63 }
 0x350   : > { %v1769_v12 = vmul.f32 %v1764_v11, %v1724_v39  ;;  %v5656_v11 = vld [vmem:[%s7838_s21 + $0x38] sm:$0xff] }
 0x351   : > { %v1853_v13 = vld [vmem:[#allocation3 + $0x2] ss:$2 sm:$0xff]  ;;  %2165 = vmatpush.bf16.msra.mxu1 %v5656_v11 }
 0x352   : > { %1774 = vst.msk [vmem:[#allocation3 + $0x18] sm:$0xff] %vm1526_vm5, %v1769_v12  ;;  %4913 = vmatmul.msk.f32.vlgmr.msrb.gmra.mxu2 %vm1526_vm5, %v1853_v13  ;;  %v5672_v12 = vld [vmem:[%s7838_s21 + $0xb8] sm:$0xff] }
 0x353   : > { %v6074_v14 = vpop.eup %6073  ;;  %2247 = vmatpush.bf16.msra.mxu2 %v5672_v12 }
 0x354   : > { %v1760_v4 = vadd.f32 1.0, %v6074_v14  ;;  %v5680_v14 = vld [vmem:[%s7838_s21 + $0xf8] sm:$0xff] }
 0x355   : > { %2331 = vmatpush.bf16.msra.mxu3 %v5680_v14 }
 0x356   : > { %v1765_v15 = vmul.f32 0.5, %v1760_v4 }
 0x358   : > { %v1770_v16 = vmul.f32 %v1765_v15, %v1725_v59  ;;  %v5663_v15 = vld [vmem:[%s7838_s21 + $0x70] sm:$0xff] }
 0x359   : > { %v1788_v44 = vld [vmem:[#allocation3 + $0x11] ss:$2 sm:$0xff]  ;;  %v1779_v22 = vld [vmem:[#allocation3 + $0x10] ss:$2 sm:$0xff]  ;;  %2104 = vmatpush.bf16.msra.mxu0 %v5663_v15 }
 0x35a   : > { %1776 = vst.msk [vmem:[#allocation3 + $0x20] sm:$0x1] %vm1775_vm7, %v1770_v16  ;;  %4910 = vmatmul.msk.f32.gmra.mxu1 %vm1526_vm5, %v1788_v44  ;;  %v5655_v16 = vld [vmem:[%s7838_s21 + $0x30] sm:$0xff] }
 0x35b   : > { %v5671_v44 = vld [vmem:[%s7838_s21 + $0xb0] sm:$0xff]  ;;  %2166 = vmatpush.bf16.msra.mxu1 %v5655_v16 }
 0x35c   : > { %2248 = vmatpush.bf16.msra.mxu2 %v5671_v44 }
 0x361   : > { %v1855_v48 = vld [vmem:[#allocation3 + $0x12] ss:$2 sm:$0xff] }
 0x362   : > { %4911 = vmatmul.msk.f32.vlgmr.msrb.gmra.mxu1 %vm1526_vm5, %v1777_v21  ;;  %4914 = vmatmul.msk.f32.gmra.mxu2 %vm1526_vm5, %v1855_v48  ;;  %v5679_v21 = vld [vmem:[%s7838_s21 + $0xf0] sm:$0xff] }
 0x363   : > { %2332 = vmatpush.bf16.msra.mxu3 %v5679_v21 }
 0x36a   : > { %4912 = vmatmul.msk.f32.gmra.mxu1 %vm1526_vm5, %v1779_v22 }
 0x3c7   : > { %v1817_v23 = vpop.f32.mrf.mxu1 }
 0x3d5   : > { %v1884_v28 = vpop.f32.mrf.mxu2 }
 0x3d7   : > { %v1820_v57 = vpop.f32.mrf.mxu1 }
 0x3df   : > { %v1846_v9 = vpop.f32.mrf.mxu1 }
 0x3e0   : > { %v1847_v27 = vadd.f32 %v1846_v9, %v1817_v23  ;;  %v5654_v9 = vld [vmem:[%s7838_s21 + $0x28] sm:$0xff] }
 0x3e1   : > { %2167 = vmatpush.bf16.msra.mxu1 %v5654_v9  ;;  %v5188_v9 = vld [vmem:[#allocation17 + $0xb4] sm:$0xf0] }
 0x3e2   : > { %v1890_v29 = vadd.f32 %v1884_v28, %v1847_v27  ;;  %v5670_v28 = vld [vmem:[%s7838_s21 + $0xa8] sm:$0xff] }
 0x3e3   : > { %2249 = vmatpush.bf16.msra.mxu2 %v5670_v28  ;;  %v5704_v28 = vld [vmem:[#allocation17 + $0xb8] sm:$0xf0] }
 0x3e4   : > { %v1892_v25 = vmul.f32 %v1890_v29, %v1890_v29 }
 0x3e5   : > { %v1887_v34 = vpop.f32.mrf.mxu2 }
 0x3e6   : > { %v1894_v30 = vmul.f32 %v1892_v25, %v1890_v29 }
 0x3e7   : > { %v1849_v31 = vpop.f32.mrf.mxu1 }
 0x3e8   : > { %v1850_v32 = vadd.f32 %v1849_v31, %v1820_v57  ;;  %v1896_v33 = vmul.f32 0.044715, %v1894_v30  ;;  %v5662_v57 = vld [vmem:[%s7838_s21 + $0x68] sm:$0xff] }
 0x3e9   : > { %2105 = vmatpush.bf16.msra.mxu0 %v5662_v57 }
 0x3ea   : > { %v1891_v17 = vadd.f32 %v1887_v34, %v1850_v32  ;;  %v1898_v35 = vadd.f32 %v1896_v33, %v1890_v29 }
 0x3ec   : > { %v1893_v36 = vmul.f32 %v1891_v17, %v1891_v17  ;;  %v1900_v18 = vmul.f32 0.7978846, %v1898_v35 }
 0x3ee   : > { %6075 = vtanh.f32 %v1900_v18  ;;  %v1895_v37 = vmul.f32 %v1893_v36, %v1891_v17 }
 0x3f0   : > { %v1897_v38 = vmul.f32 0.044715, %v1895_v37  ;;  %v6028_v37 = vld [vmem:[#allocation11] ss:$0 sm:$0xff] }
 0x3f2   : > { %v1899_v39 = vadd.f32 %v1897_v38, %v1891_v17 }
 0x3f4   : > { %v6076_v45 = vpop.eup %6075  ;;  %v1901_v26 = vmul.f32 0.7978846, %v1899_v39 }
 0x3f5   : > { %v1904_v40 = vadd.f32 1.0, %v6076_v45 }
 0x3f6   : > { %6077 = vtanh.f32 %v1901_v26 }
 0x3f7   : > { %v1906_v41 = vmul.f32 0.5, %v1904_v40  ;;  %6079 = vrcp.f32 %v6758_v49  ;;  %v6029_v40 = vld [vmem:[#allocation13] ss:$0 sm:$0xff]  ;;  %v5677_v49 = vld [vmem:[%s7838_s21 + $0xe0] sm:$0xff] }
 0x3f9   : > { %v1908_v19 = vmul.f32 %v1906_v41, %v1890_v29  ;;  %v5678_v29 = vld [vmem:[%s7838_s21 + $0xe8] sm:$0xff] }
 0x3fa   : > { %2333 = vmatpush.bf16.msra.mxu3 %v5678_v29 }
 0x3fb   : > { %v1912_v42 = vsel %vm1526_vm5, %v1908_v19, 0.0 }
 0x3fc   : > { %v6078_v20 = vpop.eup %6077  ;;  %1913 = vadd.xlane.f32.xlu0 %v1912_v42 }
 0x3fd   : > { %v1905_v46 = vadd.f32 1.0, %v6078_v20  ;;  %v6080_v50 = vpop.eup %6079 }
 0x3fe   : > { %v1919_v51 = vmul.f32 32.0, %v6080_v50  ;;  %vm1923_vm8 = vweird.f32 %v6080_v50  ;;  %2334 = vmatpush.bf16.msra.mxu3 %v5677_v49  ;;  %v5150_v49 = vld [vmem:[#allocation17 + $0x60] sm:$0xf] }
 0x3ff   : > { %v1907_v43 = vmul.f32 0.5, %v1905_v46  ;;  %v6759_v46 = vmov 0.0  }
 0x400   : > { %v1920_v52 = vsub.f32 1.0, %v1919_v51  ;;  %2011 = vst [vmem:[#allocation4] sm:$0xff] %v6759_v46  ;;  %v5652_v51 = vld [vmem:[%s7838_s21 + $0x18] sm:$0xff] }
 0x401   : > { %v1909_v24 = vmul.f32 %v1907_v43, %v1891_v17  ;;  %2012 = vst [vmem:[#allocation4 + $0x8] sm:$0xff] %v6759_v46  ;;  %v5661_v43 = vld [vmem:[%s7838_s21 + $0x60] sm:$0xff] }
 0x402   : > { %v1921_v53 = vmul.f32 %v6080_v50, %v1920_v52  ;;  %2013 = vst [vmem:[#allocation4 + $0x10] sm:$0xf] %v6759_v46  ;;  %2106 = vmatpush.bf16.msra.mxu0 %v5661_v43  ;;  %v5668_v52 = vld [vmem:[%s7838_s21 + $0x98] sm:$0xff] }
 0x403   : > { %v1915_v47 = vsel %vm1526_vm5, %v1909_v24, 0.0 }
 0x404   : > { %1916 = vadd.xlane.f32.xlu1 %v1915_v47  ;;  %v1922_v54 = vadd.f32 %v6080_v50, %v1921_v53  ;;  %v5669_v47 = vld [vmem:[%s7838_s21 + $0xa0] sm:$0xff]  ;;  %v5676_v53 = vld [vmem:[%s7838_s21 + $0xd8] sm:$0xff] }
 0x405   : > { %2250 = vmatpush.bf16.msra.mxu2 %v5669_v47  ;;  %2335 = vmatpush.bf16.msra.mxu3 %v5676_v53  ;;  %v7473_v47 = vld [vmem:[#allocation16] ss:$0 sm:$0xff] }
 0x406   : > { %v1924_v55 = vsel %vm1923_vm8, %v6080_v50, %v1922_v54  ;;  %v5660_v50 = vld [vmem:[%s7838_s21 + $0x58] sm:$0xff]  ;;  %v5659_v54 = vld [vmem:[%s7838_s21 + $0x50] sm:$0xff] }
 0x407   : > { %2107 = vmatpush.bf16.msra.mxu0 %v5660_v50  ;;  %v5694_v50 = vld [vmem:[#allocation17 + $0x68] sm:$0xf0] }
 0x408   : > { %v5151_v53 = vor.u32 %v5694_v50, %v5150_v49 }
 0x409   : > { %2251 = vmatpush.bf16.msra.mxu2 %v5668_v52 }
 0x40b   : > { %2108 = vmatpush.bf16.msra.mxu0 %v5659_v54  ;;  %v5152_v54 = vld [vmem:[#allocation17 + $0x6c] sm:$0xf0] }
 0x46f   : > { %v1914_v56 = vpop.xlane.xlu0 %1913 }
 0x470   : > { %v1925_v58 = vmul.f32 %v1924_v55, %v1914_v56  ;;  %v5667_v56 = vld [vmem:[%s7838_s21 + $0x90] sm:$0xff] }
 0x471   : > { %2252 = vmatpush.bf16.msra.mxu2 %v5667_v56  ;;  %v5695_v56 = vld [vmem:[#allocation17 + $0x70] sm:$0xf0] }
 0x472   : > { %v1927_v59 = vsub.f32 %v1908_v19, %v1925_v58  ;;  %v5675_v58 = vld [vmem:[%s7838_s21 + $0xd0] sm:$0xff] }
 0x473   : > { %2336 = vmatpush.bf16.msra.mxu3 %v5675_v58 }
 0x474   : > { %v1929_v60 = vmul.f32 %v1927_v59, %v1927_v59 }
 0x476   : > { %v1931_v61 = vsel %vm1526_vm5, %v1929_v60, 0.0  ;;  %v5650_v60 = vld [vmem:[%s7838_s21 + $0x8] sm:$0xff] }
 0x477   : > { %v1917_v62 = vpop.xlane.xlu1 %1916  ;;  %1932 = vadd.xlane.f32.xlu2 %v1931_v61  ;;  %v5666_v61 = vld [vmem:[%s7838_s21 + $0x88] sm:$0xff] }
 0x478   : > { %v1926_v0 = vmul.f32 %v1924_v55, %v1917_v62  ;;  %v5674_v62 = vld [vmem:[%s7838_s21 + $0xc8] sm:$0xff]  ;;  %2253 = vmatpush.bf16.msra.mxu2 %v5666_v61 }
 0x479   : > { %2337 = vmatpush.bf16.msra.mxu3 %v5674_v62 }
 0x47a   : > { %v7356_v1 = vsub.f32 %v1909_v24, %v1926_v0  ;;  %v5653_v24 = vld [vmem:[%s7838_s21 + $0x20] sm:$0xff] }
 0x47b   : > { %2168 = vmatpush.bf16.msra.mxu1 %v5653_v24  ;;  %v5657_v0 = vld [vmem:[%s7838_s21 + $0x40] sm:$0xff] }
 0x47c   : > { %v1930_v2 = vmul.f32 %v7356_v1, %v7356_v1 }
 0x47e   : > { %v1934_v3 = vsel %vm1526_vm5, %v1930_v2, 0.0  ;;  %v5665_v2 = vld [vmem:[%s7838_s21 + $0x80] sm:$0xff] }
 0x47f   : > { %1935 = vadd.xlane.f32.xlu2 %v1934_v3  ;;  %2169 = vmatpush.bf16.msra.mxu1 %v5652_v51  ;;  %v5673_v3 = vld [vmem:[%s7838_s21 + $0xc0] sm:$0xff]  ;;  %v5693_v51 = vld [vmem:[#allocation17 + $0x64] sm:$0xf] }
 0x480   : > { %2254 = vmatpush.bf16.msra.mxu2 %v5665_v2  ;;  %2338 = vmatpush.bf16.msra.mxu3 %v5673_v3  ;;  %v5691_v2 = vld [vmem:[#allocation17 + $0x50] sm:$0xf0]  ;;  %v5690_v3 = vld [vmem:[#allocation17 + $0x4c] sm:$0xf] }
 0x4ea   : > { %v1933_v6 = vpop.xlane.xlu2 %1932 }
 0x4eb   : > { %v1937_v7 = vmul.f32 %v1933_v6, %v1924_v55 }
 0x4ed   : > { %v1939_v10 = vadd.f32 1e-05, %v1937_v7 }
 0x4ef   : > { %6081 = vrsqrt.f32 %v1939_v10  ;;  %vm1947_vm10 = vweird.f32 %v1939_v10 }
 0x4f2   : > { %v1936_v13 = vpop.xlane.xlu2 %1935 }
 0x4f3   : > { %v1938_v4 = vmul.f32 %v1936_v13, %v1924_v55  ;;  %v5651_v55 = vld [vmem:[%s7838_s21 + $0x10] sm:$0xff] }
 0x4f4   : > { %2170 = vmatpush.bf16.msra.mxu1 %v5651_v55  ;;  %v5158_v55 = vld [vmem:[#allocation17 + $0x68] sm:$0xf] }
 0x4f5   : > { %v6082_v48 = vpop.eup %6081  ;;  %v1940_v22 = vadd.f32 1e-05, %v1938_v4 }
 0x4f6   : > { %v1942_v23 = vmul.f32 %v6082_v48, %v1939_v10  ;;  %vm1948_vm9 = vweird.f32 %v6082_v48 }
 0x4f7   : > { %6083 = vrsqrt.f32 %v1940_v22  ;;  %vm1949_vm11 = vmor %vm1947_vm10, %vm1948_vm9  ;;  %vm1957_vm13 = vweird.f32 %v1940_v22 }
 0x4f8   : > { %v1943_v27 = vmul.f32 %v6082_v48, %v1942_v23  ;;  %2171 = vmatpush.bf16.msra.mxu1 %v5650_v60  ;;  %v5702_v23 = vld [vmem:[#allocation17 + $0xac] sm:$0xf]  ;;  %v5159_v60 = vor.u32 %v5695_v56, %v5158_v55 }
 0x4f9   : > { %v5191_v29 = vor.u32 %v5702_v23, %v5188_v9  ;;  %v5689_v23 = vld [vmem:[#allocation17 + $0x40] sm:$0xf0] }
 0x4fa   : > { %v1944_v25 = vmul.f32 0.5, %v1943_v27  ;;  %v5194_v27 = vld [vmem:[#allocation17 + $0xb0] sm:$0xf] }
 0x4fc   : > { %v1945_v30 = vsub.f32 1.5, %v1944_v25  ;;  %v5195_v25 = vor.u32 %v5704_v28, %v5194_v27  ;;  %v5114_v28 = vld [vmem:[#allocation17 + $0x18] sm:$0xf] }
 0x4fd   : > { %v6084_v31 = vpop.eup %6083 }
 0x4fe   : > { %v1946_v32 = vmul.f32 %v6082_v48, %v1945_v30  ;;  %v1952_v33 = vmul.f32 %v6084_v31, %v1940_v22  ;;  %vm1958_vm12 = vweird.f32 %v6084_v31  ;;  %v5703_v22 = vld [vmem:[#allocation17 + $0xb0] sm:$0xf0]  ;;  %2570 = vmatpush.bf16.msrb.mxu2 %v5195_v25  ;;  %v5174_v30 = vld [vmem:[#allocation17 + $0x90] sm:$0xf]  ;;  %v5684_v25 = vld [vmem:[#allocation17 + $0x1c] sm:$0xf] }
 0x4ff   : > { %vm1959_vm14 = vmor %vm1957_vm13, %vm1958_vm12 }
 0x500   : > { %v1953_v34 = vmul.f32 %v6084_v31, %v1952_v33  ;;  %v1950_v17 = vsel %vm1949_vm11, %v6082_v48, %v1946_v32  ;;  %v5186_v48 = vld [vmem:[#allocation17 + $0xa8] sm:$0xf]  ;;  %v5699_v32 = vld [vmem:[#allocation17 + $0x94] sm:$0xf] }
 0x501   : > { %v1961_v18 = vmul.f32 %v1950_v17, %v1927_v59  ;;  %v5658_v59 = vld [vmem:[%s7838_s21 + $0x48] sm:$0xff]  ;;  %v5187_v57 = vor.u32 %v5703_v22, %v5186_v48  ;;  %v5128_v48 = vld [vmem:[#allocation17 + $0x3c] sm:$0xf0] }
 0x502   : > { %v1954_v35 = vmul.f32 0.5, %v1953_v34  ;;  %2109 = vmatpush.bf16.msra.mxu0 %v5658_v59  ;;  %v5176_v34 = vld [vmem:[#allocation17 + $0x9c] sm:$0xf0]  ;;  %v5182_v17 = vld [vmem:[#allocation17 + $0x98] sm:$0xf]  ;;  %v5155_v59 = vor.u32 %v5693_v51, %v5152_v54 }
 0x503   : > { %v1966_v26 = vmul.f32 %v6028_v37, %v1961_v18  ;;  %v5134_v22 = vld [vmem:[#allocation17 + $0x38] sm:$0xf] }
 0x504   : > { %v1955_v36 = vsub.f32 1.5, %v1954_v35  ;;  %v5701_v35 = vld [vmem:[#allocation17 + $0xa0] sm:$0xf0]  ;;  %v5135_v27 = vor.u32 %v5689_v23, %v5134_v22 }
 0x505   : > { %v1971_v19 = vadd.f32 %v6029_v40, %v1966_v26  ;;  %v5183_v18 = vor.u32 %v5701_v35, %v5182_v17  ;;  %v5696_v26 = vld [vmem:[#allocation17 + $0x7c] sm:$0xf] }
 0x506   : > { %v1956_v38 = vmul.f32 %v6084_v31, %v1955_v36  ;;  %2110 = vmatpush.bf16.msra.mxu0 %v5657_v0  ;;  %v5179_v36 = vor.u32 %v5699_v32, %v5176_v34  ;;  %v5116_v32 = vld [vmem:[#allocation17 + $0x24] sm:$0xf0]  ;;  %v5686_v34 = vld [vmem:[#allocation17 + $0x28] sm:$0xf0] }
 0x507   : > { %2571 = vmatpush.bf16.msrb.mxu2 %v5183_v18 }
 0x508   : > { %v1960_v39 = vsel %vm1959_vm14, %v6084_v31, %v1956_v38  ;;  %v5700_v31 = vld [vmem:[#allocation17 + $0x98] sm:$0xf0] }
 0x509   : > { %v1962_v45 = vmul.f32 %v1960_v39, %v7356_v1  ;;  %v5649_v1 = vld [vmem:[%s7838_s21] sm:$0xff]  ;;  %v5175_v33 = vor.u32 %v5700_v31, %v5174_v30  ;;  %v5162_v39 = vld [vmem:[#allocation17 + $0x78] sm:$0xf] }
 0x50a   : > { %2172 = vmatpush.bf16.msra.mxu1 %v5649_v1  ;;  %2542 = vmatpush.bf16.msrb.mxu0 %v5187_v57  ;;  %v5138_v1 = vld [vmem:[#allocation17 + $0x48] sm:$0xf] }
 0x50b   : > { %v1967_v41 = vmul.f32 %v6028_v37, %v1962_v45  ;;  %v5697_v45 = vld [vmem:[#allocation17 + $0x80] sm:$0xf0] }
 0x50d   : > { %v1972_v42 = vadd.f32 %v6029_v40, %v1967_v41  ;;  %v5163_v41 = vor.u32 %v5697_v45, %v5162_v39  ;;  %v5102_v39 = vld [vmem:[#allocation17] sm:$0xf]  ;;  %v5682_v45 = vld [vmem:[#allocation17 + $0x8] sm:$0xf0] }
 0x50e   : > { %2556 = vmatpush.bf16.msrb.mxu1 %v5191_v29  ;;  %2543 = vmatpush.bf16.msrb.mxu0 %v5175_v33  ;;  %v5685_v29 = vld [vmem:[#allocation17 + $0x20] sm:$0xf0]  ;;  %v5122_v33 = vld [vmem:[#allocation17 + $0x20] sm:$0xf] }
 0x50f   : > { %v1973_v20 = vpack.c.bf16 %v1972_v42, %v1971_v19  ;;  %v5164_v19 = vld [vmem:[#allocation17 + $0x84] sm:$0xf0]  ;;  %v5170_v42 = vld [vmem:[#allocation17 + $0x80] sm:$0xf]  ;;  %v5115_v18 = vor.u32 %v5685_v29, %v5114_v28 }
 0x510   : > { %v5167_v43 = vor.u32 %v5696_v26, %v5164_v19  ;;  %v5681_v26 = vld [vmem:[#allocation17 + $0x4] sm:$0xf]  ;;  %v5104_v19 = vld [vmem:[#allocation17 + $0xc] sm:$0xf0] }
 0x511   : > { %4923 = vmatmul.msk.bf16.vlgmr.msrb.gmra.mxu3 %vm1526_vm5, %v1973_v20  ;;  %v5698_v20 = vld [vmem:[#allocation17 + $0x88] sm:$0xf0]  ;;  %v5107_v49 = vor.u32 %v5681_v26, %v5104_v19 }
 0x512   : > { %2557 = vmatpush.bf16.msrb.mxu1 %v5179_v36  ;;  %v5171_v24 = vor.u32 %v5698_v20, %v5170_v42  ;;  %2544 = vmatpush.bf16.msrb.mxu0 %v5163_v41  ;;  %v5110_v42 = vld [vmem:[#allocation17 + $0x8] sm:$0xf]  ;;  %v5683_v20 = vld [vmem:[#allocation17 + $0x10] sm:$0xf0] }
 0x513   : > { %v5111_v50 = vor.u32 %v5683_v20, %v5110_v42 }
 0x514   : > { %2572 = vmatpush.bf16.msrb.mxu2 %v5171_v24  ;;  %v5103_v24 = vor.u32 %v5682_v45, %v5102_v39 }
 0x516   : > { %2558 = vmatpush.bf16.msrb.mxu1 %v5167_v43  ;;  %2545 = vmatpush.bf16.msrb.mxu0 %v5151_v53 }
 0x518   : > { %2573 = vmatpush.bf16.msrb.mxu2 %v5159_v60 }
 0x51a   : > { %2559 = vmatpush.bf16.msrb.mxu1 %v5155_v59 }
 0x594   : > { %v2006_v6 = vpop.f32.mrf.mxu3 }
 0x595   : > { %v7465_v7 = vadd.f32 %v6030_v5, %v2006_v6 }
 0x597   : > { %2014 = vst [vmem:[#allocation4 + $0x2] sm:$0xff] %v7465_v7 }
 0x59c   : > { %v2008_v8 = vpop.f32.mrf.mxu3 }
 0x59d   : > { %v7468_v10 = vadd.f32 %v6030_v5, %v2008_v8  ;;  %v5139_v8 = vor.u32 %v5691_v2, %v5138_v1 }
 0x59e   : > { %v2035_v11 = vld [vmem:[#allocation4 + $0x1] sm:$0xff] }
 0x59f   : > { %2015 = vst [vmem:[#allocation4 + $0xa] sm:$0xff] %v7468_v10  ;;  %v2181_v63 = vpack.c.bf16 %v7468_v10, %v7465_v7  ;;  %v2016_v12 = vld [vmem:[#allocation4] sm:$0xff]  ;;  %2546 = vmatpush.bf16.msrb.mxu0 %v5139_v8 }
 0x5a1   : > { %2255 = vmatmul.bf16.vlgmr.msra.gmra.mxu2 %v2181_v63  ;;  %v5140_v63 = vld [vmem:[#allocation17 + $0x54] sm:$0xf0] }
 0x5a6   : > { %v2036_v13 = vld [vmem:[#allocation4 + $0x9] sm:$0xff] }
 0x5a7   : > { %v2017_v14 = vld [vmem:[#allocation4 + $0x8] sm:$0xff]  ;;  %v2037_v15 = vpack.c.bf16 %v2036_v13, %v2035_v11  ;;  %v5146_v11 = vld [vmem:[#allocation17 + $0x50] sm:$0xf]  ;;  %v5143_v13 = vor.u32 %v5690_v3, %v5140_v63  ;;  %v2406_v3 = vld [vmem:[%s7765_s12] sm:$0x7] }
 0x5a8   : > { %v2263_v4 = vld [vmem:[#allocation4 + $0x3] sm:$0xff]  ;;  %v2018_v16 = vpack.c.bf16 %v2017_v14, %v2016_v12  ;;  %v2264_v44 = vld [vmem:[#allocation4 + $0xb] sm:$0xff]  ;;  %v2408_v8 = vperm.slane %v2406_v3, 0  ;;  %v2409_v63 = vperm.slane %v2406_v3, 1 }
 0x5a9   : > { %v2265_v21 = vpack.c.bf16 %v2264_v44, %v2263_v4  ;;  %2111 = vmatmul.bf16.vlgmr.msra.gmra.mxu0 %v2037_v15  ;;  %v5692_v12 = vld [vmem:[#allocation17 + $0x58] sm:$0xf0]  ;;  %v5126_v4 = vld [vmem:[#allocation17 + $0x30] sm:$0xf]  ;;  %2560 = vmatpush.bf16.msrb.mxu1 %v5143_v13  ;;  %v2410_v13 = vperm.slane %v2406_v3, 2 }
 0x5aa   : > { %2173 = vmatmul.bf16.vlgmr.msra.gmra.mxu1 %v2018_v16  ;;  %v5147_v14 = vor.u32 %v5692_v12, %v5146_v11  ;;  %v5688_v15 = vld [vmem:[#allocation17 + $0x38] sm:$0xf0]  ;;  %v5687_v16 = vld [vmem:[#allocation17 + $0x34] sm:$0xf] }
 0x5ab   : > { %2339 = vmatmul.bf16.vlgmr.msra.gmra.mxu3 %v2265_v21  ;;  %v5127_v21 = vor.u32 %v5688_v15, %v5126_v4  ;;  %v5131_v9 = vor.u32 %v5687_v16, %v5128_v48 }
 0x5ac   : > { %2574 = vmatpush.bf16.msrb.mxu2 %v5147_v14 }
 0x5ad   : > { %2547 = vmatpush.bf16.msrb.mxu0 %v5127_v21  ;;  %2561 = vmatpush.bf16.msrb.mxu1 %v5131_v9 }
 0x5b0   : > { %2575 = vmatpush.bf16.msrb.mxu2 %v5135_v27 }
 0x5b1   : > { %2548 = vmatpush.bf16.msrb.mxu0 %v5115_v18 }
 0x5b5   : > { %2549 = vmatpush.bf16.msrb.mxu0 %v5103_v24  ;;  %v5706_v24 = vld [vmem:[#allocation19 + $0x8] sm:$0xff] }
 0x624   : > { %v2256_v46 = vpop.f32.mrf.mxu2 }
 0x626   : > { %v2112_v37 = vpop.f32.mrf.mxu0 }
 0x627   : > { %v2174_v38 = vpop.f32.mrf.mxu1 }
 0x628   : > { %v2175_v40 = vadd.f32 %v2174_v38, %v2112_v37  ;;  %v5119_v37 = vor.u32 %v5684_v25, %v5116_v32  ;;  %v5123_v38 = vor.u32 %v5686_v34, %v5122_v33 }
 0x62a   : > { %v2261_v52 = vadd.f32 %v2256_v46, %v2175_v40  ;;  %2562 = vmatpush.bf16.msrb.mxu1 %v5119_v37  ;;  %2576 = vmatpush.bf16.msrb.mxu2 %v5123_v38 }
 0x62c   : > { %v2258_v57 = vpop.f32.mrf.mxu2 }
 0x62e   : > { %v2340_v58 = vpop.f32.mrf.mxu3  ;;  %v2114_v62 = vpop.f32.mrf.mxu0  ;;  %2563 = vmatpush.bf16.msrb.mxu1 %v5107_v49  ;;  %2577 = vmatpush.bf16.msrb.mxu2 %v5111_v50  ;;  %v5705_v49 = vld [vmem:[#allocation19] sm:$0xff] }
 0x62f   : > { %v2345_v61 = vadd.f32 %v2340_v58, %v2261_v52  ;;  %v2176_v0 = vpop.f32.mrf.mxu1 }
 0x630   : > { %v2177_v6 = vadd.f32 %v2176_v0, %v2114_v62 }
 0x631   : > { %v7476_v5 = vadd.f32 %v7473_v47, %v2345_v61 }
 0x632   : > { %v2262_v31 = vadd.f32 %v2258_v57, %v2177_v6 }
 0x633   : > { %v2353_v44 = vmul.f32 %v7476_v5, %v7476_v5 }
 0x635   : > { %v2355_v30 = vmul.f32 %v2353_v44, %v7476_v5 }
 0x636   : > { %v2342_v17 = vpop.f32.mrf.mxu3 }
 0x637   : > { %v2357_v35 = vmul.f32 0.044715, %v2355_v30  ;;  %v2346_v36 = vadd.f32 %v2342_v17, %v2262_v31 }
 0x639   : > { %v2359_v40 = vadd.f32 %v2357_v35, %v7476_v5  ;;  %v2352_v41 = vadd.f32 %v7473_v47, %v2346_v36 }
 0x63b   : > { %v2361_v46 = vmul.f32 0.7978846, %v2359_v40  ;;  %v2354_v43 = vmul.f32 %v2352_v41, %v2352_v41 }
 0x63d   : > { %6085 = vtanh.f32 %v2361_v46  ;;  %v2356_v51 = vmul.f32 %v2354_v43, %v2352_v41 }
 0x63f   : > { %v2358_v52 = vmul.f32 0.044715, %v2356_v51 }
 0x641   : > { %v2360_v53 = vadd.f32 %v2358_v52, %v2352_v41 }
 0x643   : > { %v6086_v54 = vpop.eup %6085  ;;  %v2362_v47 = vmul.f32 0.7978846, %v2360_v53 }
 0x644   : > { %v2365_v55 = vadd.f32 1.0, %v6086_v54 }
 0x645   : > { %6087 = vtanh.f32 %v2362_v47 }
 0x646   : > { %v2367_v56 = vmul.f32 0.5, %v2365_v55 }
 0x648   : > { %v2369_v60 = vmul.f32 %v2367_v56, %v7476_v5 }
 0x64a   : > { %v7485_v0 = vadd.f32 %v2369_v60, %v7465_v7 }
 0x64b   : > { %v6088_v58 = vpop.eup %6087 }
 0x64c   : > { %v2366_v59 = vadd.f32 1.0, %v6088_v58 }
 0x64e   : > { %v2368_v61 = vmul.f32 0.5, %v2366_v59 }
 0x650   : > { %v2370_v62 = vmul.f32 %v2368_v61, %v2352_v41 }
 0x652   : > { %v7488_v1 = vadd.f32 %v2370_v62, %v7468_v10 }
 0x654   : > { %v2373_v2 = vpack.c.bf16 %v7488_v1, %v7485_v0 }
 0x656   : > { %2550 = vmatmul.bf16.vlgmr.msrb.gmra.mxu0 %v2373_v2  ;;  %2564 = vmatmul.bf16.vlgmr.msrb.gmra.mxu1 %v2373_v2 }
 0x657   : > { %2578 = vmatmul.bf16.vlgmr.msrb.gmra.mxu2 %v2373_v2 }
 0x6d3   : > { %v2551_v6 = vpop.f32.mrf.mxu0  ;;  %v2565_v5 = vpop.f32.mrf.mxu1 }
 0x6d4   : > { %v2552_v11 = vadd.f32 %v2551_v6, %v2408_v8  ;;  %v2566_v7 = vadd.f32 %v2565_v5, %v2409_v63 }
 0x6d6   : > { %v2584_v4 = vpack.c.bf16 %v2566_v7, %v2552_v11 }
 0x6d8   : > { %v2609_v48 = vunpack.c.h.b16 %v2584_v4  ;;  %v2606_v32 = vunpack.c.l.b16 %v2584_v4 }
 0x6da   : > { %v2579_v12 = vpop.f32.mrf.mxu2 }
 0x6db   : > { %v2553_v10 = vpop.f32.mrf.mxu0  ;;  %v2567_v14 = vpop.f32.mrf.mxu1  ;;  %v2580_v21 = vadd.f32 %v2579_v12, %v2410_v13 }
 0x6dc   : > { %v2554_v15 = vadd.f32 %v2553_v10, %v2408_v8  ;;  %v2568_v16 = vadd.f32 %v2567_v14, %v2409_v63 }
 0x6dd   : > { %v2585_v9 = vpack.c.bf16 %v2580_v21, %v2580_v21 }
 0x6de   : > { %v2586_v44 = vpack.c.bf16 %v2568_v16, %v2554_v15 }
 0x6df   : > { %v2658_v30 = vunpack.c.l.b16 %v2585_v9 }
 0x6e0   : > { %v2610_v22 = vunpack.c.h.b16 %v2586_v44  ;;  %v2607_v25 = vunpack.c.l.b16 %v2586_v44 }
 0x6e2   : > { %v2611_v23 = vpack.c.b16 %v2610_v22, %v2609_v48  ;;  %v2581_v57 = vpop.f32.mrf.mxu2  ;;  %v2608_v34 = vpack.c.b16 %v2607_v25, %v2606_v32 }
 0x6e3   : > { %v2582_v27 = vadd.f32 %v2581_v57, %v2410_v13 }
 0x6e4   : > { %v2616_v28 = vsel %vm1526_vm5, %v2611_v23, 0 }
 0x6e5   : > { %v2587_v29 = vpack.c.bf16 %v2582_v27, %v2582_v27  ;;  %2625 = vmatpush.bf16.xpose.msrb.mxu3 %v2616_v28 }
 0x6e7   : > { %v2659_v31 = vunpack.c.l.b16 %v2587_v29 }
 0x6e9   : > { %v7496_v33 = vpack.c.b16 %v2659_v31, %v2658_v30 }
 0x6ec   : > { %5196 = vmatmul.msk.bf16.vlgmr.msrb.gmra.mxu3 %vm1526_vm5, %v2608_v34 }
 0x6ed   : > { %2672 = vmatpush.bf16.msra.mxu3 %v7496_v33 }
 0x6f1   : > { %2798 = vmatpush.bf16.msrb.mxu3 %v5706_v24 }
 0x6f5   : > { %2799 = vmatpush.bf16.msrb.mxu3 %v5705_v49 }
 0x76f   : > { %v2627_v17 = vpop.f32.mrf.mxu3 }
 0x770   : > { %v2633_v35 = vsel %vm2632_vm15, %v2627_v17, -inf }
 0x771   : > { %2634 = vmax.xlane.f32.xlu0 %v2633_v35 }
 0x777   : > { %v2629_v36 = vpop.f32.mrf.mxu3 }
 0x778   : > { %v2636_v18 = vsel %vm2632_vm15, %v2629_v36, -inf }
 0x779   : > { %2637 = vmax.xlane.f32.xlu1 %v2636_v18 }
 0x792   : > { %2682 = vrot.lane.b32.xlu1 %v2611_v23, %s6760_s29 }
 0x79a   : > { %2907 = vrot.lane.b32.xlu1 %v2611_v23, %s6761_s1 }
 0x7e4   : > { %v2635_v37 = vpop.xlane.xlu0 %2634 }
 0x7e5   : > { %v2639_v38 = vsub.f32 %v2627_v17, %v2635_v37 }
 0x7e7   : > { %v2641_v39 = vmul.f32 1.442695, %v2639_v38 }
 0x7e9   : > { %6089 = vpow2.f32 %v2641_v39 }
 0x7ec   : > { %v2638_v45 = vpop.xlane.xlu1 %2637 }
 0x7ed   : > { %v2640_v26 = vsub.f32 %v2629_v36, %v2638_v45 }
 0x7ef   : > { %v6090_v40 = vpop.eup %6089  ;;  %v2643_v41 = vmul.f32 1.442695, %v2640_v26 }
 0x7f0   : > { %v2645_v19 = vsel %vm2632_vm15, %v6090_v40, 0.0 }
 0x7f1   : > { %6091 = vpow2.f32 %v2643_v41  ;;  %2646 = vadd.xlane.f32.xlu2 %v2645_v19 }
 0x7f7   : > { %v6092_v42 = vpop.eup %6091 }
 0x7f8   : > { %v2648_v20 = vsel %vm2632_vm15, %v6092_v42, 0.0 }
 0x7f9   : > { %2649 = vadd.xlane.f32.xlu0 %v2648_v20 }
 0x804   : > { %v2683_v46 = vpop.permute.xlu1 %2682 }
 0x805   : > { %v2688_v43 = vsel %vm1526_vm5, %v2683_v46, 0 }
 0x806   : > { %2697 = vmatpush.bf16.xpose.msra.mxu0 %v2688_v43 }
 0x809   : > { %2680 = vrot.lane.b32.xlu2 %v2608_v34, %s6760_s29 }
 0x80c   : > { %v2908_v56 = vpop.permute.xlu1 %2907 }
 0x80d   : > { %2808 = vrot.lane.b32.xlu0 %v2611_v23, %s6762_s6  ;;  %v2913_v59 = vsel %vm1526_vm5, %v2908_v56, 0 }
 0x811   : > { %2905 = vrot.lane.b32.xlu2 %v2608_v34, %s6761_s1 }
 0x815   : > { %2806 = vrot.lane.b32.xlu0 %v2608_v34, %s6762_s6 }
 0x864   : > { %v2647_v50 = vpop.xlane.xlu2 %2646 }
 0x865   : > { %6093 = vrcp.f32 %v2647_v50 }
 0x86b   : > { %v6094_v53 = vpop.eup %6093 }
 0x86c   : > { %v2681_v51 = vpop.permute.xlu2 %2680  ;;  %v2650_v52 = vpop.xlane.xlu0 %2649  ;;  %v2653_v47 = vmul.f32 %v6094_v53, %v6090_v40 }
 0x86d   : > { %6095 = vrcp.f32 %v2650_v52  ;;  %5198 = vmatmul.msk.bf16.vlgmr.msra.gmra.mxu0 %vm1526_vm5, %v2681_v51 }
 0x873   : > { %v6096_v54 = vpop.eup %6095 }
 0x874   : > { %v2654_v55 = vmul.f32 %v6096_v54, %v6092_v42  ;;  %v2906_v14 = vpop.permute.xlu2 %2905 }
 0x876   : > { %v2655_v58 = vpack.c.bf16 %v2654_v55, %v2653_v47 }
 0x878   : > { %5197 = vmatmul.msk.bf16.vlgmr.msra.gmra.mxu3 %vm2632_vm15, %v2655_v58  ;;  %v5708_v58 = vld [vmem:[#allocation19 + $0x18] sm:$0xff] }
 0x879   : > { %2922 = vmatpush.bf16.xpose.msra.mxu3 %v2913_v59  ;;  %2769 = vmatpush.bf16.msra.mxu2 %v5708_v58  ;;  %v5707_v59 = vld [vmem:[#allocation19 + $0x10] sm:$0xff]  ;;  %v5728_v58 = vld [vmem:[#allocation20 + $0x74] sm:$0xf0] }
 0x87d   : > { %2770 = vmatpush.bf16.msra.mxu2 %v5707_v59  ;;  %v5727_v59 = vld [vmem:[#allocation20 + $0x74] sm:$0xf] }
 0x87f   : > { %v2809_v60 = vpop.permute.xlu0 %2808 }
 0x880   : > { %v2814_v61 = vsel %vm1526_vm5, %v2809_v60, 0 }
 0x881   : > { %2823 = vmatpush.bf16.xpose.msrb.mxu0 %v2814_v61 }
 0x887   : > { %v2807_v62 = vpop.permute.xlu0 %2806 }
 0x888   : > { %5218 = vmatmul.msk.bf16.vlgmr.msrb.gmra.mxu0 %vm1526_vm5, %v2807_v62 }
 0x8ea   : > { %v2699_v2 = vpop.f32.mrf.mxu0 }
 0x8eb   : > { %v2704_v3 = vsel %vm2632_vm15, %v2699_v2, -inf }
 0x8ec   : > { %2705 = vmax.xlane.f32.xlu1 %v2704_v3 }
 0x8f2   : > { %v2701_v6 = vpop.f32.mrf.mxu0 }
 0x8f3   : > { %v2707_v5 = vsel %vm2632_vm15, %v2701_v6, -inf }
 0x8f4   : > { %2708 = vmax.xlane.f32.xlu0 %v2707_v5 }
 0x8fb   : > { %v2674_v8 = vpop.f32.mrf.mxu3 }
 0x903   : > { %v2676_v63 = vpop.f32.mrf.mxu3 }
 0x904   : > { %v2679_v11 = vpack.c.bf16 %v2676_v63, %v2674_v8 }
 0x905   : > { %v2825_v7 = vpop.f32.mrf.mxu0 }
 0x906   : > { %5217 = vmatmul.msk.bf16.vlgmr.msrb.gmra.mxu3 %vm1526_vm5, %v2679_v11  ;;  %v2830_v12 = vsel %vm2632_vm15, %v2825_v7, -inf }
 0x907   : > { %2831 = vmax.xlane.f32.xlu2 %v2830_v12 }
 0x90d   : > { %v2827_v13 = vpop.f32.mrf.mxu0 }
 0x90e   : > { %v2833_v10 = vsel %vm2632_vm15, %v2827_v13, -inf }
 0x90f   : > { %2834 = vmax.xlane.f32.xlu1 %v2833_v10 }
 0x916   : > { %5229 = vmatmul.msk.bf16.vlgmr.msra.gmra.mxu3 %vm1526_vm5, %v2906_v14 }
 0x95f   : > { %v2706_v4 = vpop.xlane.xlu1 %2705 }
 0x960   : > { %v2710_v15 = vsub.f32 %v2699_v2, %v2706_v4 }
 0x962   : > { %v2712_v16 = vmul.f32 1.442695, %v2710_v15 }
 0x964   : > { %6097 = vpow2.f32 %v2712_v16 }
 0x967   : > { %v2709_v28 = vpop.xlane.xlu0 %2708 }
 0x968   : > { %v2711_v29 = vsub.f32 %v2701_v6, %v2709_v28 }
 0x96a   : > { %v6098_v44 = vpop.eup %6097  ;;  %v2714_v30 = vmul.f32 1.442695, %v2711_v29 }
 0x96b   : > { %v2716_v21 = vsel %vm2632_vm15, %v6098_v44, 0.0 }
 0x96c   : > { %2717 = vadd.xlane.f32.xlu1 %v2716_v21  ;;  %v5712_v21 = vld [vmem:[#allocation19 + $0x38] sm:$0xff] }
 0x97a   : > { %v2832_v48 = vpop.xlane.xlu2 %2831 }
 0x97b   : > { %v2836_v22 = vsub.f32 %v2825_v7, %v2832_v48  ;;  %v5709_v48 = vld [vmem:[#allocation19 + $0x20] sm:$0xff] }
 0x97d   : > { %v2838_v23 = vmul.f32 1.442695, %v2836_v22  ;;  %v5711_v22 = vld [vmem:[#allocation19 + $0x30] sm:$0xff] }
 0x97f   : > { %6099 = vpow2.f32 %v2838_v23 }
 0x980   : > { %6101 = vpow2.f32 %v2714_v30 }
 0x982   : > { %v2835_v31 = vpop.xlane.xlu1 %2834 }
 0x983   : > { %v2837_v32 = vsub.f32 %v2827_v13, %v2835_v31 }
 0x985   : > { %v7523_v57 = vpop.eup %6099  ;;  %v2840_v35 = vmul.f32 1.442695, %v2837_v32 }
 0x986   : > { %v2842_v9 = vsel %vm2632_vm15, %v7523_v57, 0.0  ;;  %v6102_v36 = vpop.eup %6101 }
 0x987   : > { %2843 = vadd.xlane.f32.xlu1 %v2842_v9  ;;  %6103 = vpow2.f32 %v2840_v35  ;;  %v2719_v37 = vsel %vm2632_vm15, %v6102_v36, 0.0 }
 0x989   : > { %v7527_v27 = vpop.f32.mrf.mxu3 }
 0x98d   : > { %v6104_v39 = vpop.eup %6103 }
 0x98e   : > { %v2845_v45 = vsel %vm2632_vm15, %v6104_v39, 0.0 }
 0x991   : > { %v7529_v25 = vpop.f32.mrf.mxu3 }
 0x999   : > { %v2924_v34 = vpop.f32.mrf.mxu3 }
 0x99a   : > { %v2929_v17 = vsel %vm2632_vm15, %v2924_v34, -inf }
 0x99b   : > { %2930 = vmax.xlane.f32.xlu0 %v2929_v17 }
 0x9a1   : > { %v2926_v18 = vpop.f32.mrf.mxu3 }
 0x9a2   : > { %v2932_v38 = vsel %vm2632_vm15, %v2926_v18, -inf }
 0x9a3   : > { %2720 = vadd.xlane.f32.xlu0 %v2719_v37  ;;  %2933 = vmax.xlane.f32.xlu2 %v2932_v38  ;;  %v6032_v37 = vld [vmem:[%s7767_s14] ss:$0 sm:$0xff] }
 0x9ab   : > { %2846 = vadd.xlane.f32.xlu0 %v2845_v45 }
 0x9bb   : > { %2727 = vrot.lane.b32.xlu2 %v7496_v33, %s6760_s29 }
 0x9df   : > { %v2718_v19 = vpop.xlane.xlu1 %2717 }
 0x9fa   : > { %v2844_v61 = vpop.xlane.xlu1 %2843 }
 0xa0e   : > { %v2931_v26 = vpop.xlane.xlu0 %2930 }
 0xa0f   : > { %v2935_v40 = vsub.f32 %v2924_v34, %v2931_v26 }
 0xa11   : > { %v2937_v41 = vmul.f32 1.442695, %v2935_v40 }
 0xa13   : > { %6105 = vpow2.f32 %v2937_v41 }
 0xa14   : > { %6107 = vrcp.f32 %v2718_v19 }
 0xa16   : > { %v2721_v42 = vpop.xlane.xlu0 %2720  ;;  %v2934_v20 = vpop.xlane.xlu2 %2933 }
 0xa17   : > { %6109 = vrcp.f32 %v2721_v42  ;;  %v2936_v46 = vsub.f32 %v2926_v18, %v2934_v20  ;;  %v6763_v20 = vmov 128.0  }
 0xa19   : > { %v6106_v43 = vpop.eup %6105  ;;  %v2939_v24 = vmul.f32 1.442695, %v2936_v46 }
 0xa1a   : > { %v2941_v49 = vsel %vm2632_vm15, %v6106_v43, 0.0  ;;  %v6108_v50 = vpop.eup %6107 }
 0xa1b   : > { %6111 = vpow2.f32 %v2939_v24  ;;  %2942 = vadd.xlane.f32.xlu1 %v2941_v49  ;;  %v2724_v52 = vmul.f32 %v6108_v50, %v6098_v44  ;;  %v5710_v44 = vld [vmem:[#allocation19 + $0x28] sm:$0xff] }
 0xa1c   : > { %2895 = vmatpush.bf16.msrb.mxu2 %v5710_v44  ;;  %v5276_v44 = vld [vmem:[#allocation20 + $0x48] sm:$0xf0] }
 0xa1d   : > { %v6110_v51 = vpop.eup %6109 }
 0xa1e   : > { %v2725_v53 = vmul.f32 %v6110_v51, %v6102_v36  ;;  %v2728_v54 = vpop.permute.xlu2 %2727  ;;  %v2847_v60 = vpop.xlane.xlu0 %2846 }
 0xa1f   : > { %2740 = vmatpush.bf16.msra.mxu1 %v2728_v54  ;;  %6113 = vrcp.f32 %v2847_v60 }
 0xa20   : > { %v2726_v47 = vpack.c.bf16 %v2725_v53, %v2724_v52  ;;  %6115 = vrcp.f32 %v2844_v61  ;;  %2896 = vmatpush.bf16.msrb.mxu2 %v5709_v48  ;;  %v5300_v61 = vld [vmem:[#allocation20 + $0x78] sm:$0xf0]  ;;  %v5266_v48 = vld [vmem:[#allocation20 + $0x30] sm:$0xf] }
 0xa21   : > { %v6112_v55 = vpop.eup %6111 }
 0xa22   : > { %5199 = vmatmul.msk.bf16.vlgmr.msra.gmra.mxu1 %vm2632_vm15, %v2726_v47  ;;  %v2944_v56 = vsel %vm2632_vm15, %v6112_v55, 0.0 }
 0xa23   : > { %2945 = vadd.xlane.f32.xlu0 %v2944_v56  ;;  %v5298_v56 = vld [vmem:[#allocation20 + $0x70] sm:$0xf] }
 0xa24   : > { %v5299_v60 = vor.u32 %v5728_v58, %v5298_v56 }
 0xa25   : > { %v6114_v6 = vpop.eup %6113 }
 0xa26   : > { %v6116_v5 = vpop.eup %6115  ;;  %v2851_v8 = vmul.f32 %v6114_v6, %v6104_v39  ;;  %v5725_v6 = vld [vmem:[#allocation20 + $0x64] sm:$0xf] }
 0xa27   : > { %v2850_v11 = vmul.f32 %v6116_v5, %v7523_v57 }
 0xa29   : > { %v2852_v13 = vpack.c.bf16 %v2851_v8, %v2850_v11  ;;  %v5292_v8 = vld [vmem:[#allocation20 + $0x68] sm:$0xf0]  ;;  %v5282_v11 = vld [vmem:[#allocation20 + $0x50] sm:$0xf] }
 0xa34   : > { %2853 = vrot.lane.b32.xlu1 %v7496_v33, %s6762_s6 }
 0xa37   : > { %2952 = vrot.lane.b32.xlu0 %v7496_v33, %s6761_s1 }
 0xa8e   : > { %v2943_v2 = vpop.xlane.xlu1 %2942 }
 0xa96   : > { %v2946_v62 = vpop.xlane.xlu0 %2945 }
 0xa97   : > { %6117 = vrcp.f32 %v2946_v62  ;;  %v5303_v62 = vor.u32 %v5727_v59, %v5300_v61 }
 0xa98   : > { %6119 = vrcp.f32 %v2943_v2  ;;  %v5290_v2 = vld [vmem:[#allocation20 + $0x60] sm:$0xf] }
 0xa99   : > { %6121 = vrcp.f32 %v6763_v20  ;;  %3188 = vmatpush.bf16.msrb.mxu3 %v5303_v62  ;;  %v5713_v20 = vld [vmem:[#allocation20 + $0x4] sm:$0xf] }
 0xa9d   : > { %v6118_v63 = vpop.eup %6117 }
 0xa9e   : > { %v6120_v7 = vpop.eup %6119  ;;  %v2950_v10 = vmul.f32 %v6118_v63, %v6112_v55  ;;  %v5295_v63 = vor.u32 %v5725_v6, %v5292_v8 }
 0xa9f   : > { %v2742_v3 = vpop.f32.mrf.mxu1  ;;  %v2949_v15 = vmul.f32 %v6120_v7, %v6106_v43  ;;  %v6122_v46 = vpop.eup %6121  ;;  %v5723_v7 = vld [vmem:[#allocation20 + $0x54] sm:$0xf] }
 0xaa0   : > { %v3019_v43 = vmul.f32 128.0, %v6122_v46  ;;  %vm3023_vm0 = vweird.f32 %v6122_v46  ;;  %3189 = vmatpush.bf16.msrb.mxu3 %v5295_v63  ;;  %v6034_v63 = vld [vmem:[%s7769_s16] ss:$0 sm:$0xff] }
 0xaa1   : > { %v2951_v16 = vpack.c.bf16 %v2950_v10, %v2949_v15  ;;  %v5721_v15 = vld [vmem:[#allocation20 + $0x44] sm:$0xf] }
 0xaa2   : > { %v3020_v24 = vsub.f32 1.0, %v3019_v43 }
 0xaa4   : > { %v3021_v49 = vmul.f32 %v6122_v46, %v3020_v24 }
 0xaa6   : > { %v2854_v33 = vpop.permute.xlu1 %2853  ;;  %v3022_v50 = vadd.f32 %v6122_v46, %v3021_v49 }
 0xaa7   : > { %v2744_v12 = vpop.f32.mrf.mxu1  ;;  %2866 = vmatpush.bf16.msrb.mxu1 %v2854_v33  ;;  %v5724_v33 = vld [vmem:[#allocation20 + $0x54] sm:$0xf0] }
 0xaa8   : > { %v2747_v14 = vpack.c.bf16 %v2744_v12, %v2742_v3  ;;  %v5726_v3 = vld [vmem:[#allocation20 + $0x64] sm:$0xf0]  ;;  %v5283_v12 = vor.u32 %v5724_v33, %v5282_v11 }
 0xaa9   : > { %v2953_v4 = vpop.permute.xlu0 %2952  ;;  %v5291_v5 = vor.u32 %v5726_v3, %v5290_v2  ;;  %v6033_v2 = vld [vmem:[%s7768_s15] ss:$0 sm:$0xff] }
 0xaaa   : > { %5208 = vmatmul.msk.bf16.vlgmr.msra.gmra.mxu2 %vm1526_vm5, %v2747_v14  ;;  %5219 = vmatmul.msk.bf16.vlgmr.msrb.gmra.mxu1 %vm2632_vm15, %v2852_v13  ;;  %v5284_v13 = vld [vmem:[#allocation20 + $0x58] sm:$0xf0]  ;;  %v5274_v14 = vld [vmem:[#allocation20 + $0x40] sm:$0xf] }
 0xaab   : > { %2965 = vmatpush.bf16.msra.mxu0 %v2953_v4  ;;  %2994 = vmatpush.bf16.msra.mxu1 %v5712_v21  ;;  %v5287_v10 = vor.u32 %v5723_v7, %v5284_v13  ;;  %v5722_v4 = vld [vmem:[#allocation20 + $0x44] sm:$0xf0]  ;;  %v5279_v21 = vor.u32 %v5721_v15, %v5276_v44  ;;  %v5744_v13 = vld [vmem:[#allocation22 + $0x78] sm:$0xff]  ;;  %v3088_v15 = vld [vmem:[%s7771_s18] sm:$0x3] }
 0xaac   : > { %3174 = vmatpush.bf16.msra.mxu2 %v5299_v60  ;;  %v5741_v44 = vld [vmem:[#allocation22 + $0x60] sm:$0xff] }
 0xaad   : > { %3190 = vmatpush.bf16.msrb.mxu3 %v5287_v10  ;;  %v5743_v10 = vld [vmem:[#allocation22 + $0x70] sm:$0xff] }
 0xaae   : > { %5230 = vmatmul.msk.bf16.vlgmr.msra.gmra.mxu0 %vm2632_vm15, %v2951_v16  ;;  %v5275_v16 = vor.u32 %v5722_v4, %v5274_v14  ;;  %v5734_v14 = vld [vmem:[#allocation22 + $0x28] sm:$0xff] }
 0xaaf   : > { %2995 = vmatpush.bf16.msra.mxu1 %v5711_v22  ;;  %v5720_v22 = vld [vmem:[#allocation20 + $0x34] sm:$0xf0]  ;;  %v5742_v4 = vld [vmem:[#allocation22 + $0x68] sm:$0xff] }
 0xab0   : > { %3175 = vmatpush.bf16.msra.mxu2 %v5291_v5 }
 0xab1   : > { %3191 = vmatpush.bf16.msrb.mxu3 %v5279_v21  ;;  %v3090_v21 = vperm.slane %v3088_v15, 0 }
 0xab3   : > { %3386 = vmatpush.bf16.msrb.mxu1 %v5744_v13 }
 0xab4   : > { %3176 = vmatpush.bf16.msra.mxu2 %v5283_v12  ;;  %v5736_v12 = vld [vmem:[#allocation22 + $0x38] sm:$0xff] }
 0xab5   : > { %3372 = vmatpush.bf16.msrb.mxu0 %v5736_v12 }
 0xab7   : > { %3387 = vmatpush.bf16.msrb.mxu1 %v5743_v10 }
 0xab8   : > { %3177 = vmatpush.bf16.msra.mxu2 %v5275_v16  ;;  %v5733_v16 = vld [vmem:[#allocation22 + $0x20] sm:$0xff] }
 0xabb   : > { %3388 = vmatpush.bf16.msrb.mxu1 %v5742_v4 }
 0xabf   : > { %3389 = vmatpush.bf16.msrb.mxu1 %v5741_v44 }
 0xb27   : > { %v2868_v23 = vpop.f32.mrf.mxu1 }
 0xb2b   : > { %v2967_v57 = vpop.f32.mrf.mxu0 }
 0xb2d   : > { %v2772_v31 = vpop.f32.mrf.mxu2 }
 0xb2e   : > { %v2802_v34 = vadd.f32 %v7527_v27, %v2772_v31  ;;  %v5258_v31 = vld [vmem:[#allocation20 + $0x20] sm:$0xf] }
 0xb2f   : > { %v2870_v9 = vpop.f32.mrf.mxu1 }
 0xb30   : > { %v2873_v28 = vpack.c.bf16 %v2870_v9, %v2868_v23  ;;  %v5719_v23 = vld [vmem:[#allocation20 + $0x34] sm:$0xf]  ;;  %v5267_v9 = vor.u32 %v5720_v22, %v5266_v48  ;;  %v3091_v48 = vperm.slane %v3088_v15, 1  ;;  %v5732_v22 = vld [vmem:[#allocation22 + $0x18] sm:$0xff] }
 0xb32   : > { %5228 = vmatmul.msk.bf16.vlgmr.msrb.gmra.mxu2 %vm1526_vm5, %v2873_v28  ;;  %v5268_v28 = vld [vmem:[#allocation20 + $0x38] sm:$0xf0] }
 0xb33   : > { %v2969_v29 = vpop.f32.mrf.mxu0  ;;  %3178 = vmatpush.bf16.msra.mxu2 %v5267_v9 }
 0xb34   : > { %v2972_v30 = vpack.c.bf16 %v2969_v29, %v2967_v57 }
 0xb35   : > { %v2774_v32 = vpop.f32.mrf.mxu2 }
 0xb36   : > { %5239 = vmatmul.msk.bf16.vlgmr.msra.gmra.mxu1 %vm1526_vm5, %v2972_v30  ;;  %v2804_v39 = vadd.f32 %v7529_v25, %v2774_v32  ;;  %v5271_v30 = vor.u32 %v5719_v23, %v5268_v28  ;;  %v5718_v32 = vld [vmem:[#allocation20 + $0x24] sm:$0xf0]  ;;  %v5740_v23 = vld [vmem:[#allocation22 + $0x58] sm:$0xff] }
 0xb37   : > { %3390 = vmatpush.bf16.msrb.mxu1 %v5740_v23 }
 0xb38   : > { %3192 = vmatpush.bf16.msrb.mxu3 %v5271_v30  ;;  %v5731_v30 = vld [vmem:[#allocation22 + $0x10] sm:$0xff] }
 0xbb3   : > { %v2997_v17 = vpop.f32.mrf.mxu1 }
 0xbb5   : > { %v2898_v35 = vpop.f32.mrf.mxu2 }
 0xbb6   : > { %v2903_v36 = vadd.f32 %v2898_v35, %v2802_v34  ;;  %v5717_v34 = vld [vmem:[#allocation20 + $0x24] sm:$0xf] }
 0xbb8   : > { %v3002_v18 = vadd.f32 %v2997_v17, %v2903_v36  ;;  %v5260_v17 = vld [vmem:[#allocation20 + $0x28] sm:$0xf0]  ;;  %v5259_v36 = vor.u32 %v5718_v32, %v5258_v31  ;;  %v5739_v31 = vld [vmem:[#allocation22 + $0x50] sm:$0xff] }
 0xbb9   : > { %3391 = vmatpush.bf16.msrb.mxu1 %v5739_v31 }
 0xbba   : > { %v3004_v38 = vadd.f32 %v3002_v18, %v7485_v0  ;;  %v7557_v0 = vsel %vm3023_vm0, %v6122_v46, %v3022_v50  ;;  %v5263_v18 = vor.u32 %v5717_v34, %v5260_v17  ;;  %3179 = vmatpush.bf16.msra.mxu2 %v5259_v36  ;;  %v5244_v46 = vld [vmem:[#allocation20 + $0x8] sm:$0xf0] }
 0xbbb   : > { %v2999_v41 = vpop.f32.mrf.mxu1  ;;  %v5730_v36 = vld [vmem:[#allocation22 + $0x8] sm:$0xff] }
 0xbbc   : > { %v3010_v45 = vadd.f32 %v6032_v37, %v3004_v38  ;;  %v5716_v38 = vld [vmem:[#allocation20 + $0x14] sm:$0xf0]  ;;  %3193 = vmatpush.bf16.msrb.mxu3 %v5263_v18  ;;  %v5738_v18 = vld [vmem:[#allocation22 + $0x48] sm:$0xff] }
 0xbbd   : > { %v2900_v26 = vpop.f32.mrf.mxu2  ;;  %3392 = vmatpush.bf16.msrb.mxu1 %v5738_v18 }
 0xbbe   : > { %v2904_v40 = vadd.f32 %v2900_v26, %v2804_v39  ;;  %3014 = vadd.xlane.f32.xlu2 %v3010_v45  ;;  %v5715_v39 = vld [vmem:[#allocation20 + $0x14] sm:$0xf] }
 0xbc0   : > { %v3003_v19 = vadd.f32 %v2999_v41, %v2904_v40 }
 0xbc2   : > { %v3005_v27 = vadd.f32 %v3003_v19, %v7488_v1 }
 0xbc4   : > { %v3011_v42 = vadd.f32 %v6032_v37, %v3005_v27  ;;  %v5250_v37 = vld [vmem:[#allocation20 + $0x10] sm:$0xf]  ;;  %v5242_v27 = vld [vmem:[#allocation20] sm:$0xf] }
 0xbc5   : > { %v5251_v40 = vor.u32 %v5716_v38, %v5250_v37 }
 0xbc6   : > { %3016 = vadd.xlane.f32.xlu0 %v3011_v42 }
 0xbc7   : > { %3180 = vmatpush.bf16.msra.mxu2 %v5251_v40 }
 0xc31   : > { %v3015_v25 = vpop.xlane.xlu2 %3014 }
 0xc32   : > { %v3025_v51 = vmul.f32 %v7557_v0, %v3015_v25  ;;  %v5247_v25 = vor.u32 %v5713_v20, %v5244_v46 }
 0xc34   : > { %v7560_v52 = vsub.f32 %v3010_v45, %v3025_v51  ;;  %v5252_v45 = vld [vmem:[#allocation20 + $0x18] sm:$0xf0] }
 0xc35   : > { %v5255_v19 = vor.u32 %v5715_v39, %v5252_v45 }
 0xc36   : > { %v3029_v1 = vmul.f32 %v7560_v52, %v7560_v52 }
 0xc37   : > { %3194 = vmatpush.bf16.msrb.mxu3 %v5255_v19 }
 0xc38   : > { %3031 = vadd.xlane.f32.xlu1 %v3029_v1 }
 0xc39   : > { %v3017_v53 = vpop.xlane.xlu0 %3016 }
 0xc3a   : > { %v3026_v54 = vmul.f32 %v7557_v0, %v3017_v53 }
 0xc3b   : > { %3195 = vmatpush.bf16.msrb.mxu3 %v5247_v25 }
 0xc3c   : > { %v7565_v47 = vsub.f32 %v3011_v42, %v3026_v54  ;;  %v5714_v42 = vld [vmem:[#allocation20 + $0x4] sm:$0xf0] }
 0xc3d   : > { %v5243_v50 = vor.u32 %v5714_v42, %v5242_v27  ;;  %v5729_v27 = vld [vmem:[#allocation22] sm:$0xff] }
 0xc3e   : > { %v3030_v55 = vmul.f32 %v7565_v47, %v7565_v47  ;;  %v5737_v42 = vld [vmem:[#allocation22 + $0x40] sm:$0xff] }
 0xc3f   : > { %3181 = vmatpush.bf16.msra.mxu2 %v5243_v50  ;;  %3393 = vmatpush.bf16.msrb.mxu1 %v5737_v42  ;;  %v5445_v42 = vld [vmem:[#allocation17 + $0x15c] sm:$0xf0] }
 0xc40   : > { %3033 = vadd.xlane.f32.xlu2 %v3030_v55 }
 0xcab   : > { %v3032_v57 = vpop.xlane.xlu1 %3031 }
 0xcac   : > { %v3035_v29 = vmul.f32 %v3032_v57, %v7557_v0 }
 0xcae   : > { %v3037_v35 = vadd.f32 1e-05, %v3035_v29 }
 0xcb0   : > { %6123 = vrsqrt.f32 %v3037_v35  ;;  %vm3045_vm2 = vweird.f32 %v3037_v35 }
 0xcb3   : > { %v3034_v26 = vpop.xlane.xlu2 %3033 }
 0xcb4   : > { %v3036_v41 = vmul.f32 %v3034_v26, %v7557_v0 }
 0xcb6   : > { %v6124_v43 = vpop.eup %6123  ;;  %v3038_v24 = vadd.f32 1e-05, %v3036_v41 }
 0xcb7   : > { %v3040_v49 = vmul.f32 %v6124_v43, %v3037_v35  ;;  %vm3046_vm1 = vweird.f32 %v6124_v43 }
 0xcb8   : > { %6125 = vrsqrt.f32 %v3038_v24  ;;  %vm3047_vm3 = vmor %vm3045_vm2, %vm3046_vm1  ;;  %vm3055_vm6 = vweird.f32 %v3038_v24 }
 0xcb9   : > { %v3041_v51 = vmul.f32 %v6124_v43, %v3040_v49 }
 0xcbb   : > { %v3042_v1 = vmul.f32 0.5, %v3041_v51 }
 0xcbd   : > { %v3043_v53 = vsub.f32 1.5, %v3042_v1 }
 0xcbe   : > { %v6126_v54 = vpop.eup %6125 }
 0xcbf   : > { %v3044_v55 = vmul.f32 %v6124_v43, %v3043_v53  ;;  %v3050_v56 = vmul.f32 %v6126_v54, %v3038_v24  ;;  %vm3056_vm4 = vweird.f32 %v6126_v54 }
 0xcc0   : > { %vm3057_vm7 = vmor %vm3055_vm6, %vm3056_vm4 }
 0xcc1   : > { %v3051_v58 = vmul.f32 %v6126_v54, %v3050_v56  ;;  %v3048_v59 = vsel %vm3047_vm3, %v6124_v43, %v3044_v55 }
 0xcc2   : > { %v3059_v62 = vmul.f32 %v3048_v59, %v7560_v52 }
 0xcc3   : > { %v3052_v60 = vmul.f32 0.5, %v3051_v58 }
 0xcc4   : > { %v3064_v8 = vmul.f32 %v6033_v2, %v3059_v62 }
 0xcc5   : > { %v3053_v61 = vsub.f32 1.5, %v3052_v60 }
 0xcc6   : > { %v7579_v33 = vadd.f32 %v6034_v63, %v3064_v8 }
 0xcc7   : > { %v3054_v3 = vmul.f32 %v6126_v54, %v3053_v61 }
 0xcc9   : > { %v3058_v6 = vsel %vm3057_vm7, %v6126_v54, %v3054_v3 }
 0xcca   : > { %v3060_v5 = vmul.f32 %v3058_v6, %v7565_v47  ;;  %v5735_v47 = vld [vmem:[#allocation22 + $0x30] sm:$0xff] }
 0xccb   : > { %3373 = vmatpush.bf16.msrb.mxu0 %v5735_v47 }
 0xccc   : > { %v3065_v11 = vmul.f32 %v6033_v2, %v3060_v5 }
 0xcce   : > { %v7581_v7 = vadd.f32 %v6034_v63, %v3065_v11 }
 0xccf   : > { %3374 = vmatpush.bf16.msrb.mxu0 %v5734_v14  ;;  %v6035_v14 = vld [vmem:[%s7839_s26] ss:$0 sm:$0xff] }
 0xcd0   : > { %v3071_v52 = vpack.c.bf16 %v7581_v7, %v7579_v33 }
 0xcd2   : > { %3182 = vmatmul.bf16.vlgmr.msra.gmra.mxu2 %v3071_v52  ;;  %3196 = vmatmul.bf16.vlgmr.msrb.gmra.mxu3 %v3071_v52 }
 0xcd3   : > { %3375 = vmatpush.bf16.msrb.mxu0 %v5733_v16 }
 0xcd7   : > { %3376 = vmatpush.bf16.msrb.mxu0 %v5732_v22 }
 0xcdb   : > { %3377 = vmatpush.bf16.msrb.mxu0 %v5731_v30 }
 0xcdf   : > { %3378 = vmatpush.bf16.msrb.mxu0 %v5730_v36  ;;  %v5766_v36 = vld [vmem:[#allocation17 + $0x16c] sm:$0xf] }
 0xce3   : > { %3379 = vmatpush.bf16.msrb.mxu0 %v5729_v27 }
 0xd55   : > { %v3183_v57 = vpop.f32.mrf.mxu2  ;;  %v3197_v9 = vpop.f32.mrf.mxu3 }
 0xd56   : > { %v3184_v28 = vadd.f32 %v3183_v57, %v3090_v21  ;;  %v3198_v29 = vadd.f32 %v3197_v9, %v3091_v48 }
 0xd58   : > { %v3202_v32 = vmul.f32 %v3184_v28, %v3184_v28  ;;  %v3203_v34 = vmul.f32 %v3198_v29, %v3198_v29 }
 0xd5a   : > { %v3206_v17 = vmul.f32 %v3202_v32, %v3184_v28  ;;  %v3207_v35 = vmul.f32 %v3203_v34, %v3198_v29 }
 0xd5c   : > { %v3210_v37 = vmul.f32 0.044715, %v3206_v17  ;;  %v3211_v38 = vmul.f32 0.044715, %v3207_v35  ;;  %v5767_v35 = vld [vmem:[#allocation17 + $0x170] sm:$0xf0] }
 0xd5d   : > { %v3185_v39 = vpop.f32.mrf.mxu2  ;;  %v3199_v45 = vpop.f32.mrf.mxu3 }
 0xd5e   : > { %v3214_v26 = vadd.f32 %v3210_v37, %v3184_v28  ;;  %v3215_v40 = vadd.f32 %v3211_v38, %v3198_v29  ;;  %v3186_v41 = vadd.f32 %v3185_v39, %v3090_v21  ;;  %v3200_v19 = vadd.f32 %v3199_v45, %v3091_v48  ;;  %v5457_v37 = vld [vmem:[#allocation17 + $0x174] sm:$0xf0]  ;;  %v5463_v38 = vld [vmem:[#allocation17 + $0x170] sm:$0xf]  ;;  %v5768_v39 = vld [vmem:[#allocation17 + $0x178] sm:$0xf0] }
 0xd5f   : > { %v5460_v45 = vor.u32 %v5766_v36, %v5457_v37 }
 0xd60   : > { %v3218_v20 = vmul.f32 0.7978846, %v3214_v26  ;;  %v3204_v46 = vmul.f32 %v3186_v41, %v3186_v41  ;;  %v3205_v43 = vmul.f32 %v3200_v19, %v3200_v19  ;;  %v3219_v24 = vmul.f32 0.7978846, %v3215_v40  ;;  %v5443_v40 = vld [vmem:[#allocation17 + $0x150] sm:$0xf] }
 0xd61   : > { %v5464_v26 = vor.u32 %v5768_v39, %v5463_v38  ;;  %3639 = vmatpush.bf16.msra.mxu3 %v5460_v45  ;;  %v5371_v45 = vld [vmem:[#allocation17 + $0xc0] sm:$0xf] }
 0xd62   : > { %v3208_v49 = vmul.f32 %v3204_v46, %v3186_v41  ;;  %v3209_v50 = vmul.f32 %v3205_v43, %v3200_v19  ;;  %6127 = vtanh.f32 %v3218_v20  ;;  %v5451_v20 = vld [vmem:[#allocation17 + $0x158] sm:$0xf]  ;;  %v5765_v46 = vld [vmem:[#allocation17 + $0x160] sm:$0xf0] }
 0xd63   : > { %6129 = vtanh.f32 %v3219_v24  ;;  %3653 = vmatpush.bf16.msra.mxu0 %v5464_v26  ;;  %v5452_v24 = vor.u32 %v5765_v46, %v5451_v20  ;;  %v5746_v26 = vld [vmem:[#allocation17 + $0xc8] sm:$0xf0] }
 0xd64   : > { %v3212_v25 = vmul.f32 0.044715, %v3208_v49  ;;  %v3213_v51 = vmul.f32 0.044715, %v3209_v50  ;;  %v5431_v49 = vld [vmem:[#allocation17 + $0x138] sm:$0xf] }
 0xd65   : > { %v5761_v50 = vld [vmem:[#allocation17 + $0x140] sm:$0xf0] }
 0xd66   : > { %v3216_v1 = vadd.f32 %v3212_v25, %v3186_v41  ;;  %v3217_v53 = vadd.f32 %v3213_v51, %v3200_v19  ;;  %v5760_v25 = vld [vmem:[#allocation17 + $0x13c] sm:$0xf]  ;;  %v5432_v51 = vor.u32 %v5761_v50, %v5431_v49 }
 0xd67   : > { %3654 = vmatpush.bf16.msra.mxu0 %v5452_v24 }
 0xd68   : > { %v3220_v54 = vmul.f32 0.7978846, %v3216_v1  ;;  %v3221_v55 = vmul.f32 0.7978846, %v3217_v53  ;;  %v6128_v56 = vpop.eup %6127  ;;  %v5433_v1 = vld [vmem:[#allocation17 + $0x144] sm:$0xf0] }
 0xd69   : > { %v6130_v58 = vpop.eup %6129  ;;  %v3226_v59 = vadd.f32 1.0, %v6128_v56  ;;  %v5439_v53 = vld [vmem:[#allocation17 + $0x140] sm:$0xf] }
 0xd6a   : > { %6131 = vtanh.f32 %v3220_v54  ;;  %v3227_v60 = vadd.f32 1.0, %v6130_v58  ;;  %v5762_v54 = vld [vmem:[#allocation17 + $0x148] sm:$0xf0]  ;;  %v5419_v58 = vld [vmem:[#allocation17 + $0x120] sm:$0xf] }
 0xd6b   : > { %6133 = vtanh.f32 %v3221_v55  ;;  %v3230_v2 = vmul.f32 0.5, %v3226_v59  ;;  %v5436_v55 = vor.u32 %v5760_v25, %v5433_v1  ;;  %v5440_v56 = vor.u32 %v5762_v54, %v5439_v53  ;;  %v5758_v59 = vld [vmem:[#allocation17 + $0x128] sm:$0xf0] }
 0xd6c   : > { %v3231_v6 = vmul.f32 0.5, %v3227_v60  ;;  %v5757_v60 = vld [vmem:[#allocation17 + $0x124] sm:$0xf] }
 0xd6d   : > { %v3234_v11 = vmul.f32 %v3230_v2, %v3184_v28  ;;  %3655 = vmatpush.bf16.msra.mxu0 %v5440_v56  ;;  %v5427_v2 = vld [vmem:[#allocation17 + $0x128] sm:$0xf] }
 0xd6e   : > { %v3235_v12 = vmul.f32 %v3231_v6, %v3198_v29 }
 0xd70   : > { %v6132_v61 = vpop.eup %6131 }
 0xd71   : > { %v6134_v62 = vpop.eup %6133  ;;  %v3228_v3 = vadd.f32 1.0, %v6132_v61  ;;  %v5420_v61 = vor.u32 %v5758_v59, %v5419_v58 }
 0xd72   : > { %v3229_v5 = vadd.f32 1.0, %v6134_v62  ;;  %v5421_v62 = vld [vmem:[#allocation17 + $0x12c] sm:$0xf0] }
 0xd73   : > { %v3232_v8 = vmul.f32 0.5, %v3228_v3  ;;  %v5759_v3 = vld [vmem:[#allocation17 + $0x130] sm:$0xf0]  ;;  %v5424_v6 = vor.u32 %v5757_v60, %v5421_v62 }
 0xd74   : > { %v3233_v63 = vmul.f32 0.5, %v3229_v5  ;;  %v5428_v5 = vor.u32 %v5759_v3, %v5427_v2 }
 0xd75   : > { %v3236_v52 = vmul.f32 %v3232_v8, %v3186_v41  ;;  %v5764_v41 = vld [vmem:[#allocation17 + $0x158] sm:$0xf0]  ;;  %v5407_v8 = vld [vmem:[#allocation17 + $0x108] sm:$0xf] }
 0xd76   : > { %v3237_v13 = vmul.f32 %v3233_v63, %v3200_v19  ;;  %v5763_v19 = vld [vmem:[#allocation17 + $0x154] sm:$0xf]  ;;  %v5444_v27 = vor.u32 %v5764_v41, %v5443_v40  ;;  %3656 = vmatpush.bf16.msra.mxu0 %v5428_v5  ;;  %v5745_v40 = vld [vmem:[#allocation17 + $0xc4] sm:$0xf]  ;;  %v5373_v41 = vld [vmem:[#allocation17 + $0xcc] sm:$0xf0] }
 0xd77   : > { %v3238_v47 = vpack.c.bf16 %v3236_v52, %v3234_v11  ;;  %v5448_v43 = vor.u32 %v5763_v19, %v5445_v42  ;;  %v5755_v63 = vld [vmem:[#allocation17 + $0x110] sm:$0xf0]  ;;  %v5754_v11 = vld [vmem:[#allocation17 + $0x10c] sm:$0xf]  ;;  %v5379_v19 = vld [vmem:[#allocation17 + $0xc8] sm:$0xf]  ;;  %v5376_v24 = vor.u32 %v5745_v40, %v5373_v41 }
 0xd78   : > { %v3239_v10 = vpack.c.bf16 %v3237_v13, %v3235_v12  ;;  %v5408_v12 = vor.u32 %v5755_v63, %v5407_v8  ;;  %v5409_v13 = vld [vmem:[#allocation17 + $0x114] sm:$0xf0]  ;;  %v6037_v5 = vld [vmem:[#allocation25] ss:$0 sm:$0xff] }
 0xd79   : > { %3380 = vmatmul.bf16.vlgmr.msrb.gmra.mxu0 %v3238_v47  ;;  %3640 = vmatpush.bf16.msra.mxu3 %v5448_v43  ;;  %v5415_v47 = vld [vmem:[#allocation17 + $0x110] sm:$0xf]  ;;  %v5372_v43 = vor.u32 %v5746_v26, %v5371_v45 }
 0xd7a   : > { %3394 = vmatmul.bf16.vlgmr.msrb.gmra.mxu1 %v3239_v10  ;;  %v5756_v10 = vld [vmem:[#allocation17 + $0x118] sm:$0xf0] }
 0xd7d   : > { %3641 = vmatpush.bf16.msra.mxu3 %v5436_v55 }
 0xd81   : > { %3642 = vmatpush.bf16.msra.mxu3 %v5424_v6 }
 0xdf6   : > { %v3381_v4 = vpop.f32.mrf.mxu0 }
 0xdf7   : > { %v3382_v15 = vadd.f32 %v6035_v14, %v3381_v4  ;;  %v3395_v16 = vpop.f32.mrf.mxu1  ;;  %v5412_v4 = vor.u32 %v5754_v11, %v5409_v13 }
 0xdf9   : > { %v3396_v44 = vadd.f32 %v3395_v16, %v3382_v15  ;;  %v5416_v15 = vor.u32 %v5756_v10, %v5415_v47  ;;  %v5395_v16 = vld [vmem:[#allocation17 + $0xf0] sm:$0xf]  ;;  %3643 = vmatpush.bf16.msra.mxu3 %v5412_v4 }
 0xdfb   : > { %v3400_v21 = vadd.f32 %v3396_v44, %v7579_v33  ;;  %v5752_v44 = vld [vmem:[#allocation17 + $0xf8] sm:$0xf0]  ;;  %3657 = vmatpush.bf16.msra.mxu0 %v5416_v15 }
 0xdfd   : > { %3404 = vadd.xlane.f32.xlu2 %v3400_v21 }
 0xdfe   : > { %v3383_v48 = vpop.f32.mrf.mxu0 }
 0xdff   : > { %v3384_v22 = vadd.f32 %v6035_v14, %v3383_v48  ;;  %v3397_v23 = vpop.f32.mrf.mxu1  ;;  %v5397_v48 = vld [vmem:[#allocation17 + $0xfc] sm:$0xf0] }
 0xe01   : > { %v3398_v57 = vadd.f32 %v3397_v23, %v3384_v22  ;;  %v5403_v22 = vld [vmem:[#allocation17 + $0xf8] sm:$0xf]  ;;  %v5753_v23 = vld [vmem:[#allocation17 + $0x100] sm:$0xf0] }
 0xe03   : > { %v3401_v9 = vadd.f32 %v3398_v57, %v7581_v7  ;;  %v5455_v7 = vld [vmem:[#allocation17 + $0x168] sm:$0xf] }
 0xe04   : > { %v5456_v18 = vor.u32 %v5767_v35, %v5455_v7  ;;  %v5391_v7 = vld [vmem:[#allocation17 + $0xe0] sm:$0xf]  ;;  %v5750_v35 = vld [vmem:[#allocation17 + $0xe8] sm:$0xf0] }
 0xe05   : > { %3406 = vadd.xlane.f32.xlu2 %v3401_v9  ;;  %v5392_v39 = vor.u32 %v5750_v35, %v5391_v7 }
 0xe06   : > { %3625 = vmatpush.bf16.msrb.mxu2 %v5456_v18 }
 0xe0a   : > { %3626 = vmatpush.bf16.msrb.mxu2 %v5444_v27  ;;  %v5747_v27 = vld [vmem:[#allocation17 + $0xd0] sm:$0xf0] }
 0xe0b   : > { %v5380_v49 = vor.u32 %v5747_v27, %v5379_v19 }
 0xe0e   : > { %3627 = vmatpush.bf16.msrb.mxu2 %v5432_v51 }
 0xe12   : > { %3628 = vmatpush.bf16.msrb.mxu2 %v5420_v61  ;;  %v6036_v61 = vld [vmem:[#allocation23] ss:$0 sm:$0xff] }
 0xe16   : > { %3629 = vmatpush.bf16.msrb.mxu2 %v5408_v12  ;;  %v5368_v12 = vld [vmem:[%s7765_s12 + $0x3] sm:$0x7] }
 0xe17   : > { %v3491_v47 = vperm.slane %v5368_v12, 0  ;;  %v3492_v10 = vperm.slane %v5368_v12, 1 }
 0xe70   : > { %v3405_v28 = vpop.xlane.xlu2 %3404 }
 0xe71   : > { %v3408_v29 = vmul.f32 %v3405_v28, %v7557_v0 }
 0xe73   : > { %v7594_v30 = vsub.f32 %v3400_v21, %v3408_v29  ;;  %v5751_v21 = vld [vmem:[#allocation17 + $0xf4] sm:$0xf]  ;;  %v5404_v29 = vor.u32 %v5753_v23, %v5403_v22 }
 0xe74   : > { %v5400_v28 = vor.u32 %v5751_v21, %v5397_v48 }
 0xe75   : > { %v3412_v31 = vmul.f32 %v7594_v30, %v7594_v30  ;;  %3658 = vmatpush.bf16.msra.mxu0 %v5404_v29 }
 0xe76   : > { %3644 = vmatpush.bf16.msra.mxu3 %v5400_v28 }
 0xe77   : > { %3414 = vadd.xlane.f32.xlu0 %v3412_v31  ;;  %v5383_v31 = vld [vmem:[#allocation17 + $0xd8] sm:$0xf] }
 0xe78   : > { %v3407_v32 = vpop.xlane.xlu2 %3406 }
 0xe79   : > { %v3409_v33 = vmul.f32 %v3407_v32, %v7557_v0  ;;  %v5749_v32 = vld [vmem:[#allocation17 + $0xe0] sm:$0xf0]  ;;  %3659 = vmatpush.bf16.msra.mxu0 %v5392_v39 }
 0xe7a   : > { %v5384_v18 = vor.u32 %v5749_v32, %v5383_v31 }
 0xe7b   : > { %v7599_v34 = vsub.f32 %v3401_v9, %v3409_v33  ;;  %v5396_v9 = vor.u32 %v5752_v44, %v5395_v16  ;;  %v5748_v33 = vld [vmem:[#allocation17 + $0xdc] sm:$0xf] }
 0xe7d   : > { %v3413_v17 = vmul.f32 %v7599_v34, %v7599_v34  ;;  %3630 = vmatpush.bf16.msrb.mxu2 %v5396_v9  ;;  %3660 = vmatpush.bf16.msra.mxu0 %v5380_v49 }
 0xe7f   : > { %3416 = vadd.xlane.f32.xlu1 %v3413_v17  ;;  %v5385_v17 = vld [vmem:[#allocation17 + $0xe4] sm:$0xf0] }
 0xe80   : > { %v5388_v38 = vor.u32 %v5748_v33, %v5385_v17 }
 0xe81   : > { %3631 = vmatpush.bf16.msrb.mxu2 %v5384_v18 }
 0xe82   : > { %3645 = vmatpush.bf16.msra.mxu3 %v5388_v38 }
 0xe85   : > { %3632 = vmatpush.bf16.msrb.mxu2 %v5372_v43 }
 0xe86   : > { %3646 = vmatpush.bf16.msra.mxu3 %v5376_v24 }
 0xeea   : > { %v3415_v52 = vpop.xlane.xlu0 %3414 }
 0xeeb   : > { %v3418_v14 = vmul.f32 %v3415_v52, %v7557_v0 }
 0xeed   : > { %v3420_v57 = vadd.f32 1e-05, %v3418_v14  ;;  %v3493_v14 = vperm.slane %v5368_v12, 2 }
 0xeef   : > { %6135 = vrsqrt.f32 %v3420_v57  ;;  %vm3428_vm9 = vweird.f32 %v3420_v57 }
 0xef2   : > { %v3417_v36 = vpop.xlane.xlu1 %3416 }
 0xef3   : > { %v3419_v37 = vmul.f32 %v3417_v36, %v7557_v0 }
 0xef5   : > { %v6136_v42 = vpop.eup %6135  ;;  %v3421_v20 = vadd.f32 1e-05, %v3419_v37 }
 0xef6   : > { %v3423_v46 = vmul.f32 %v6136_v42, %v3420_v57  ;;  %vm3429_vm8 = vweird.f32 %v6136_v42 }
 0xef7   : > { %6137 = vrsqrt.f32 %v3421_v20  ;;  %vm3430_vm10 = vmor %vm3428_vm9, %vm3429_vm8  ;;  %vm3438_vm12 = vweird.f32 %v3421_v20 }
 0xef8   : > { %v3424_v50 = vmul.f32 %v6136_v42, %v3423_v46 }
 0xefa   : > { %v3425_v25 = vmul.f32 0.5, %v3424_v50 }
 0xefc   : > { %v3426_v51 = vsub.f32 1.5, %v3425_v25 }
 0xefd   : > { %v6138_v1 = vpop.eup %6137 }
 0xefe   : > { %v3427_v53 = vmul.f32 %v6136_v42, %v3426_v51  ;;  %v3433_v54 = vmul.f32 %v6138_v1, %v3421_v20  ;;  %vm3439_vm11 = vweird.f32 %v6138_v1 }
 0xeff   : > { %vm3440_vm13 = vmor %vm3438_vm12, %vm3439_vm11 }
 0xf00   : > { %v3434_v55 = vmul.f32 %v6138_v1, %v3433_v54  ;;  %v3431_v56 = vsel %vm3430_vm10, %v6136_v42, %v3427_v53  ;;  %v5770_v53 = vld [vmem:[#allocation19 + $0x48] sm:$0xff]  ;;  %v5769_v54 = vld [vmem:[#allocation19 + $0x40] sm:$0xff] }
 0xf01   : > { %v3442_v60 = vmul.f32 %v3431_v56, %v7594_v30 }
 0xf02   : > { %v3435_v58 = vmul.f32 0.5, %v3434_v55 }
 0xf03   : > { %v3447_v6 = vmul.f32 %v6036_v61, %v3442_v60 }
 0xf04   : > { %v3436_v59 = vsub.f32 1.5, %v3435_v58 }
 0xf05   : > { %v7607_v63 = vadd.f32 %v6037_v5, %v3447_v6 }
 0xf06   : > { %v3437_v62 = vmul.f32 %v6138_v1, %v3436_v59 }
 0xf08   : > { %v3441_v2 = vsel %vm3440_vm13, %v6138_v1, %v3437_v62 }
 0xf09   : > { %v3443_v3 = vmul.f32 %v3441_v2, %v7599_v34 }
 0xf0b   : > { %v3448_v8 = vmul.f32 %v6036_v61, %v3443_v3 }
 0xf0d   : > { %v7609_v11 = vadd.f32 %v6037_v5, %v3448_v8 }
 0xf0f   : > { %v3454_v52 = vpack.c.bf16 %v7609_v11, %v7607_v63 }
 0xf11   : > { %3633 = vmatmul.bf16.vlgmr.msrb.gmra.mxu2 %v3454_v52  ;;  %3647 = vmatmul.bf16.vlgmr.msra.gmra.mxu3 %v3454_v52 }
 0xf12   : > { %3661 = vmatmul.bf16.vlgmr.msra.gmra.mxu0 %v3454_v52 }
 0xf8f   : > { %v3662_v30 = vpop.f32.mrf.mxu0 }
 0xf90   : > { %v3663_v21 = vadd.f32 %v3662_v30, %v3493_v14 }
 0xf92   : > { %v3668_v29 = vpack.c.bf16 %v3663_v21, %v3663_v21 }
 0xf94   : > { %v3634_v13 = vpop.f32.mrf.mxu2  ;;  %v3648_v34 = vpop.f32.mrf.mxu3  ;;  %v3741_v7 = vunpack.c.l.b16 %v3668_v29 }
 0xf95   : > { %v3635_v15 = vadd.f32 %v3634_v13, %v3491_v47  ;;  %v3649_v16 = vadd.f32 %v3648_v34, %v3492_v10 }
 0xf97   : > { %v3664_v4 = vpop.f32.mrf.mxu0  ;;  %v3667_v23 = vpack.c.bf16 %v3649_v16, %v3635_v15 }
 0xf98   : > { %v3665_v44 = vadd.f32 %v3664_v4, %v3493_v14 }
 0xf99   : > { %v3693_v32 = vunpack.c.h.b16 %v3667_v23  ;;  %v3690_v38 = vunpack.c.l.b16 %v3667_v23 }
 0xf9a   : > { %v3670_v57 = vpack.c.bf16 %v3665_v44, %v3665_v44 }
 0xf9c   : > { %v3636_v48 = vpop.f32.mrf.mxu2  ;;  %v3650_v22 = vpop.f32.mrf.mxu3  ;;  %v3742_v33 = vunpack.c.l.b16 %v3670_v57 }
 0xf9d   : > { %v3637_v9 = vadd.f32 %v3636_v48, %v3491_v47  ;;  %v3651_v28 = vadd.f32 %v3650_v22, %v3492_v10 }
 0xf9e   : > { %v7616_v36 = vpack.c.b16 %v3742_v33, %v3741_v7 }
 0xf9f   : > { %v3669_v31 = vpack.c.bf16 %v3651_v28, %v3637_v9 }
 0xfa1   : > { %v3694_v17 = vunpack.c.h.b16 %v3669_v31  ;;  %v3691_v37 = vunpack.c.l.b16 %v3669_v31 }
 0xfa3   : > { %v3695_v35 = vpack.c.b16 %v3694_v17, %v3693_v32  ;;  %v3692_v39 = vpack.c.b16 %v3691_v37, %v3690_v38 }
 0xfa5   : > { %v3700_v18 = vsel %vm1526_vm5, %v3695_v35, 0 }
 0xfa6   : > { %3709 = vmatpush.bf16.xpose.msra.mxu1 %v3700_v18 }
 0xfad   : > { %5465 = vmatmul.msk.bf16.vlgmr.msra.gmra.mxu1 %vm1526_vm5, %v3692_v39 }
 0xfae   : > { %3755 = vmatpush.bf16.msrb.mxu1 %v7616_v36 }
 0xfb2   : > { %3881 = vmatpush.bf16.msra.mxu1 %v5770_v53 }
 0xfb6   : > { %3882 = vmatpush.bf16.msra.mxu1 %v5769_v54 }
0x102a   : > { %v3711_v45 = vpop.f32.mrf.mxu1 }
0x102b   : > { %v3716_v26 = vsel %vm2632_vm15, %v3711_v45, -inf }
0x102c   : > { %3717 = vmax.xlane.f32.xlu2 %v3716_v26 }
0x1032   : > { %v3713_v40 = vpop.f32.mrf.mxu1 }
0x1033   : > { %v3719_v41 = vsel %vm2632_vm15, %v3713_v40, -inf }
0x1034   : > { %3720 = vmax.xlane.f32.xlu0 %v3719_v41 }
0x1048   : > { %3765 = vrot.lane.b32.xlu0 %v3695_v35, %s6760_s29 }
0x1050   : > { %3990 = vrot.lane.b32.xlu0 %v3695_v35, %s6761_s1 }
0x1058   : > { %3988 = vrot.lane.b32.xlu0 %v3692_v39, %s6761_s1 }
0x109f   : > { %v3718_v19 = vpop.xlane.xlu2 %3717 }
0x10a0   : > { %v3722_v27 = vsub.f32 %v3711_v45, %v3718_v19 }
0x10a2   : > { %v3724_v42 = vmul.f32 1.442695, %v3722_v27 }
0x10a4   : > { %6139 = vpow2.f32 %v3724_v42 }
0x10a7   : > { %v3721_v20 = vpop.xlane.xlu0 %3720 }
0x10a8   : > { %v3723_v46 = vsub.f32 %v3713_v40, %v3721_v20 }
0x10aa   : > { %v6140_v43 = vpop.eup %6139  ;;  %v3726_v24 = vmul.f32 1.442695, %v3723_v46 }
0x10ab   : > { %v3728_v49 = vsel %vm2632_vm15, %v6140_v43, 0.0 }
0x10ac   : > { %6141 = vpow2.f32 %v3726_v24  ;;  %3729 = vadd.xlane.f32.xlu1 %v3728_v49 }
0x10b2   : > { %v6142_v50 = vpop.eup %6141 }
0x10b3   : > { %v3731_v25 = vsel %vm2632_vm15, %v6142_v50, 0.0 }
0x10b4   : > { %3732 = vadd.xlane.f32.xlu2 %v3731_v25 }
0x10ba   : > { %v3766_v51 = vpop.permute.xlu0 %3765 }
0x10bb   : > { %v3771_v1 = vsel %vm1526_vm5, %v3766_v51, 0 }
0x10bc   : > { %3780 = vmatpush.bf16.xpose.msra.mxu2 %v3771_v1 }
0x10c2   : > { %v3991_v2 = vpop.permute.xlu0 %3990 }
0x10c3   : > { %v3996_v5 = vsel %vm1526_vm5, %v3991_v2, 0 }
0x10c5   : > { %3763 = vrot.lane.b32.xlu1 %v3692_v39, %s6760_s29 }
0x10ca   : > { %v3989_v4 = vpop.permute.xlu0 %3988 }
0x10cc   : > { %3891 = vrot.lane.b32.xlu2 %v3695_v35, %s6762_s6 }
0x10cd   : > { %3889 = vrot.lane.b32.xlu1 %v3692_v39, %s6762_s6 }
0x111f   : > { %v3730_v55 = vpop.xlane.xlu1 %3729 }
0x1120   : > { %6143 = vrcp.f32 %v3730_v55 }
0x1126   : > { %v6144_v58 = vpop.eup %6143 }
0x1127   : > { %v3733_v56 = vpop.xlane.xlu2 %3732  ;;  %v3736_v60 = vmul.f32 %v6144_v58, %v6140_v43 }
0x1128   : > { %6145 = vrcp.f32 %v3733_v56 }
0x112e   : > { %v6146_v59 = vpop.eup %6145 }
0x112f   : > { %v3737_v61 = vmul.f32 %v6146_v59, %v6142_v50  ;;  %v3892_v62 = vpop.permute.xlu2 %3891 }
0x1130   : > { %v3897_v3 = vsel %vm1526_vm5, %v3892_v62, 0 }
0x1131   : > { %v3738_v6 = vpack.c.bf16 %v3737_v61, %v3736_v60  ;;  %3906 = vmatpush.bf16.xpose.msrb.mxu2 %v3897_v3 }
0x1133   : > { %5466 = vmatmul.msk.bf16.vlgmr.msrb.gmra.mxu1 %vm2632_vm15, %v3738_v6 }
0x1134   : > { %4005 = vmatpush.bf16.xpose.msrb.mxu1 %v3996_v5 }
0x1137   : > { %v3764_v8 = vpop.permute.xlu1 %3763 }
0x1138   : > { %5467 = vmatmul.msk.bf16.vlgmr.msra.gmra.mxu2 %vm1526_vm5, %v3764_v8 }
0x113f   : > { %v3890_v52 = vpop.permute.xlu1 %3889 }
0x1148   : > { %5487 = vmatmul.msk.bf16.vlgmr.msrb.gmra.mxu2 %vm1526_vm5, %v3890_v52  ;;  %v5772_v52 = vld [vmem:[#allocation19 + $0x58] sm:$0xff] }
0x1149   : > { %3852 = vmatpush.bf16.msrb.mxu0 %v5772_v52  ;;  %v5565_v52 = vld [vmem:[#allocation20 + $0xe8] sm:$0xf0] }
0x11b0   : > { %v3757_v30 = vpop.f32.mrf.mxu1 }
0x11b8   : > { %v3759_v12 = vpop.f32.mrf.mxu1 }
0x11b9   : > { %v3762_v13 = vpack.c.bf16 %v3759_v12, %v3757_v30 }
0x11bb   : > { %v3782_v34 = vpop.f32.mrf.mxu2  ;;  %5486 = vmatmul.msk.bf16.vlgmr.msra.gmra.mxu1 %vm1526_vm5, %v3762_v13  ;;  %v5771_v13 = vld [vmem:[#allocation19 + $0x50] sm:$0xff] }
0x11bc   : > { %v3787_v47 = vsel %vm2632_vm15, %v3782_v34, -inf  ;;  %3853 = vmatpush.bf16.msrb.mxu0 %v5771_v13  ;;  %v5788_v13 = vld [vmem:[#allocation20 + $0xd4] sm:$0xf0] }
0x11bd   : > { %3788 = vmax.xlane.f32.xlu2 %v3787_v47 }
0x11c3   : > { %v3784_v10 = vpop.f32.mrf.mxu2 }
0x11c4   : > { %v3790_v14 = vsel %vm2632_vm15, %v3784_v10, -inf }
0x11c5   : > { %3791 = vmax.xlane.f32.xlu1 %v3790_v14 }
0x11cb   : > { %v3908_v15 = vpop.f32.mrf.mxu2  ;;  %5498 = vmatmul.msk.bf16.vlgmr.msrb.gmra.mxu1 %vm1526_vm5, %v3989_v4 }
0x11cc   : > { %v3913_v16 = vsel %vm2632_vm15, %v3908_v15, -inf }
0x11cd   : > { %3914 = vmax.xlane.f32.xlu1 %v3913_v16 }
0x11d3   : > { %v3910_v7 = vpop.f32.mrf.mxu2 }
0x11d4   : > { %v3916_v37 = vsel %vm2632_vm15, %v3910_v7, -inf }
0x1230   : > { %v3789_v28 = vpop.xlane.xlu2 %3788 }
0x1231   : > { %v3793_v29 = vsub.f32 %v3782_v34, %v3789_v28 }
0x1233   : > { %v3795_v33 = vmul.f32 1.442695, %v3793_v29  ;;  %v5776_v29 = vld [vmem:[#allocation19 + $0x78] sm:$0xff] }
0x1238   : > { %v7642_v44 = vpop.f32.mrf.mxu1  ;;  %v3792_v21 = vpop.xlane.xlu1 %3791 }
0x1239   : > { %v3794_v48 = vsub.f32 %v3784_v10, %v3792_v21 }
0x123b   : > { %v3797_v22 = vmul.f32 1.442695, %v3794_v48 }
0x123d   : > { %6147 = vpow2.f32 %v3797_v22 }
0x123e   : > { %6149 = vpow2.f32 %v3795_v33  ;;  %v5773_v33 = vld [vmem:[#allocation19 + $0x60] sm:$0xff] }
0x1240   : > { %v7644_v23 = vpop.f32.mrf.mxu1  ;;  %v3915_v17 = vpop.xlane.xlu1 %3914 }
0x1241   : > { %v3919_v35 = vsub.f32 %v3908_v15, %v3915_v17 }
0x1243   : > { %v6148_v57 = vpop.eup %6147  ;;  %v3921_v39 = vmul.f32 1.442695, %v3919_v35 }
0x1244   : > { %v3802_v9 = vsel %vm2632_vm15, %v6148_v57, 0.0  ;;  %v6150_v45 = vpop.eup %6149 }
0x1245   : > { %3803 = vadd.xlane.f32.xlu1 %v3802_v9  ;;  %6151 = vpow2.f32 %v3921_v39  ;;  %v3799_v26 = vsel %vm2632_vm15, %v6150_v45, 0.0 }
0x1248   : > { %v4007_v31 = vpop.f32.mrf.mxu1 }
0x1249   : > { %v4012_v32 = vsel %vm2632_vm15, %v4007_v31, -inf }
0x124a   : > { %4013 = vmax.xlane.f32.xlu0 %v4012_v32  ;;  %v5774_v32 = vld [vmem:[#allocation19 + $0x68] sm:$0xff] }
0x124b   : > { %v7651_v40 = vpop.eup %6151  ;;  %3978 = vmatpush.bf16.msra.mxu0 %v5774_v32  ;;  %v5541_v32 = vld [vmem:[#allocation20 + $0xb8] sm:$0xf0] }
0x124c   : > { %v3925_v41 = vsel %vm2632_vm15, %v7651_v40, 0.0 }
0x124f   : > { %3979 = vmatpush.bf16.msra.mxu0 %v5773_v33 }
0x1250   : > { %v4009_v18 = vpop.f32.mrf.mxu1 }
0x1251   : > { %v4015_v38 = vsel %vm2632_vm15, %v4009_v18, -inf }
0x1252   : > { %3917 = vmax.xlane.f32.xlu0 %v3916_v37  ;;  %4016 = vmax.xlane.f32.xlu2 %v4015_v38 }
0x125a   : > { %3800 = vadd.xlane.f32.xlu2 %v3799_v26 }
0x1262   : > { %3926 = vadd.xlane.f32.xlu2 %v3925_v41 }
0x1266   : > { %3810 = vrot.lane.b32.xlu0 %v7616_v36, %s6760_s29  ;;  %s7841_s29 = sld [smem:[#allocation61_spill]] }
0x126e   : > { %3936 = vrot.lane.b32.xlu0 %v7616_v36, %s6762_s6  ;;  %s4608_s6 = scalar_lea.hbm %s7841_s29, %s5809_s8 }
0x126f   : > { %s4611_s2 = sshll.u32 %s4608_s6, 4  ;;  %s4612_s2 = int_to_ptr.hbm [resolvable:$true] %s4611_s2 }
0x1270   : > { %s6651_s7 = sshra.s32 %s4612_s2, 4  ;;  %s6652_s7 = int_to_ptr.hbm [resolvable:$true] %s6651_s7 }
0x1271   : > { %s6653_s9 = scalar_lea.hbm %s6652_s7, 16 }
0x1272   : > { %p6654_p0 = scmp.ne.s32.totalorder %s6652_s7, %s6653_s9 }
0x1274   : > { %p6655_p1 = pnand %p6654_p0, %p6934_p5 }
0x1276   : > { %p6656_p2 = pneg %p6655_p1 }
0x12b8   : > { %v3804_v51 = vpop.xlane.xlu1 %3803 }
0x12bd   : > { %v4014_v19 = vpop.xlane.xlu0 %4013 }
0x12be   : > { %v4018_v27 = vsub.f32 %v4007_v31, %v4014_v19  ;;  %v5775_v31 = vld [vmem:[#allocation19 + $0x70] sm:$0xff] }
0x12c0   : > { %v4020_v42 = vmul.f32 1.442695, %v4018_v27 }
0x12c2   : > { %6153 = vpow2.f32 %v4020_v42  ;;  %v6038_v42 = vld [vmem:[%s7767_s14 + $0x1] ss:$0 sm:$0xff] }
0x12c5   : > { %v4017_v20 = vpop.xlane.xlu2 %4016  ;;  %v3918_v46 = vpop.xlane.xlu0 %3917 }
0x12c6   : > { %v4019_v43 = vsub.f32 %v4009_v18, %v4017_v20  ;;  %v3920_v50 = vsub.f32 %v3910_v7, %v3918_v46 }
0x12c8   : > { %v6154_v24 = vpop.eup %6153  ;;  %v4022_v49 = vmul.f32 1.442695, %v4019_v43  ;;  %v3923_v1 = vmul.f32 1.442695, %v3920_v50 }
0x12c9   : > { %v4024_v25 = vsel %vm2632_vm15, %v6154_v24, 0.0 }
0x12ca   : > { %4025 = vadd.xlane.f32.xlu2 %v4024_v25  ;;  %6155 = vpow2.f32 %v4022_v49 }
0x12cd   : > { %v3801_v53 = vpop.xlane.xlu2 %3800 }
0x12ce   : > { %6157 = vrcp.f32 %v3801_v53 }
0x12cf   : > { %6159 = vrcp.f32 %v3804_v51 }
0x12d0   : > { %v6156_v54 = vpop.eup %6155  ;;  %6161 = vpow2.f32 %v3923_v1 }
0x12d1   : > { %v4027_v55 = vsel %vm2632_vm15, %v6156_v54, 0.0 }
0x12d2   : > { %4028 = vadd.xlane.f32.xlu1 %v4027_v55 }
0x12d4   : > { %v6158_v56 = vpop.eup %6157 }
0x12d5   : > { %v6160_v58 = vpop.eup %6159  ;;  %v3807_v59 = vmul.f32 %v6158_v56, %v6150_v45  ;;  %v3927_v5 = vpop.xlane.xlu2 %3926 }
0x12d6   : > { %v6162_v60 = vpop.eup %6161  ;;  %v3808_v61 = vmul.f32 %v6160_v58, %v6148_v57 }
0x12d7   : > { %v3928_v3 = vsel %vm2632_vm15, %v6162_v60, 0.0 }
0x12d8   : > { %v3811_v62 = vpop.permute.xlu0 %3810  ;;  %v3809_v2 = vpack.c.bf16 %v3808_v61, %v3807_v59  ;;  %v5792_v59 = vld [vmem:[#allocation20 + $0xf4] sm:$0xf0] }
0x12d9   : > { %3823 = vmatpush.bf16.msrb.mxu3 %v3811_v62  ;;  %v5573_v62 = vld [vmem:[#allocation20 + $0xf8] sm:$0xf0] }
0x12da   : > { %3929 = vadd.xlane.f32.xlu1 %v3928_v3  ;;  %v5563_v3 = vld [vmem:[#allocation20 + $0xe0] sm:$0xf] }
0x12dc   : > { %5468 = vmatmul.msk.bf16.vlgmr.msrb.gmra.mxu3 %vm2632_vm15, %v3809_v2 }
0x12e0   : > { %v3937_v6 = vpop.permute.xlu0 %3936 }
0x12e1   : > { %3949 = vmatpush.bf16.msra.mxu3 %v3937_v6  ;;  %v5790_v6 = vld [vmem:[#allocation20 + $0xe4] sm:$0xf0] }
0x12e2   : > { %4035 = vrot.lane.b32.xlu2 %v7616_v36, %s6761_s1  ;;  %s7842_s1 = smov %s7841_s29 }
0x12e3   : > { %s6657_s0 = scalar_lea.hbm %s7842_s1, 32  ;;  %p6658_p3 = scmp.lt.s32.totalorder %s6652_s7, %s7842_s1 }
0x12e4   : > { %p6659_p4 = scmp.lt.s32.totalorder %s6657_s0, %s6653_s9 }
0x12e5   : > { %4077 = vmatpush.bf16.msrb.mxu3 %v5776_v29 }
0x12e6   : > { %p6660_p7 = por %p6659_p4, %p6658_p3 }
0x12e8   : > { %p6661_p8 = pnand %p6660_p7, %p6656_p2 }
0x12e9   : > { %4078 = vmatpush.bf16.msrb.mxu3 %v5775_v31 }
0x133d   : > { %v4026_v8 = vpop.xlane.xlu2 %4025 }
0x133e   : > { %6163 = vrcp.f32 %v4026_v8  ;;  %v5564_v8 = vor.u32 %v5790_v6, %v5563_v3 }
0x1344   : > { %v6164_v34 = vpop.eup %6163 }
0x1345   : > { %v4036_v30 = vpop.permute.xlu2 %4035  ;;  %v4029_v12 = vpop.xlane.xlu1 %4028  ;;  %v4032_v10 = vmul.f32 %v6164_v34, %v6154_v24  ;;  %v5787_v34 = vld [vmem:[#allocation20 + $0xd4] sm:$0xf] }
0x1346   : > { %4048 = vmatpush.bf16.msra.mxu2 %v4036_v30  ;;  %6165 = vrcp.f32 %v4029_v12  ;;  %v5555_v12 = vld [vmem:[#allocation20 + $0xd0] sm:$0xf] }
0x1347   : > { %6167 = vrcp.f32 %v3927_v5  ;;  %v5789_v5 = vld [vmem:[#allocation20 + $0xe4] sm:$0xf] }
0x1348   : > { %v5568_v30 = vor.u32 %v5789_v5, %v5565_v52 }
0x134c   : > { %v6166_v47 = vpop.eup %6165 }
0x134d   : > { %v4033_v14 = vmul.f32 %v6166_v47, %v6156_v54  ;;  %v3930_v4 = vpop.xlane.xlu1 %3929  ;;  %v6168_v36 = vpop.eup %6167  ;;  %v5556_v47 = vor.u32 %v5788_v13, %v5555_v12 }
0x134e   : > { %6169 = vrcp.f32 %v3930_v4  ;;  %v3933_v21 = vmul.f32 %v6168_v36, %v7651_v40  ;;  %v5547_v4 = vld [vmem:[#allocation20 + $0xc0] sm:$0xf]  ;;  %v5785_v36 = vld [vmem:[#allocation20 + $0xc4] sm:$0xf] }
0x134f   : > { %v4034_v15 = vpack.c.bf16 %v4033_v14, %v4032_v10  ;;  %v5557_v10 = vld [vmem:[#allocation20 + $0xd8] sm:$0xf0] }
0x1350   : > { %v5560_v14 = vor.u32 %v5787_v34, %v5557_v10  ;;  %v5808_v10 = vld [vmem:[#allocation22 + $0xf8] sm:$0xff] }
0x1351   : > { %5499 = vmatmul.msk.bf16.vlgmr.msra.gmra.mxu2 %vm2632_vm15, %v4034_v15  ;;  %v5786_v15 = vld [vmem:[#allocation20 + $0xc4] sm:$0xf0] }
0x1354   : > { %v6170_v16 = vpop.eup %6169 }
0x1355   : > { %v3934_v48 = vmul.f32 %v6170_v16, %v6162_v60  ;;  %v5791_v60 = vld [vmem:[#allocation20 + $0xf4] sm:$0xf]  ;;  %v5548_v16 = vor.u32 %v5786_v15, %v5547_v4  ;;  %v5798_v15 = vld [vmem:[#allocation22 + $0xa8] sm:$0xff] }
0x1356   : > { %v5576_v2 = vor.u32 %v5791_v60, %v5573_v62  ;;  %v5807_v4 = vld [vmem:[#allocation22 + $0xf0] sm:$0xff] }
0x1357   : > { %v3935_v22 = vpack.c.bf16 %v3934_v48, %v3933_v21  ;;  %v5549_v21 = vld [vmem:[#allocation20 + $0xc8] sm:$0xf0] }
0x1358   : > { %4269 = vmatpush.bf16.msra.mxu1 %v5576_v2  ;;  %v5552_v48 = vor.u32 %v5785_v36, %v5549_v21  ;;  %v6039_v2 = vld [vmem:[%s7768_s15 + $0x1] ss:$0 sm:$0xff]  ;;  %v5512_v36 = vld [vmem:[%s7771_s18 + $0x2] sm:$0x3]  ;;  %v5805_v21 = vld [vmem:[#allocation22 + $0xe0] sm:$0xff] }
0x1359   : > { %5488 = vmatmul.msk.bf16.vlgmr.msra.gmra.mxu3 %vm2632_vm15, %v3935_v22 }
0x135a   : > { %4469 = vmatpush.bf16.msra.mxu3 %v5808_v10 }
0x135c   : > { %4270 = vmatpush.bf16.msra.mxu1 %v5568_v30 }
0x135e   : > { %4470 = vmatpush.bf16.msra.mxu3 %v5807_v4 }
0x135f   : > { %v3825_v57 = vpop.f32.mrf.mxu3 }
0x1360   : > { %4271 = vmatpush.bf16.msra.mxu1 %v5560_v14  ;;  %v5799_v14 = vld [vmem:[#allocation22 + $0xb0] sm:$0xff] }
0x1364   : > { %4272 = vmatpush.bf16.msra.mxu1 %v5552_v48  ;;  %v4171_v48 = vperm.slane %v5512_v36, 0 }
0x1367   : > { %v3827_v9 = vpop.f32.mrf.mxu3 }
0x1368   : > { %v3830_v28 = vpack.c.bf16 %v3827_v9, %v3825_v57  ;;  %v5539_v57 = vld [vmem:[#allocation20 + $0xb0] sm:$0xf]  ;;  %v5784_v9 = vld [vmem:[#allocation20 + $0xb4] sm:$0xf0] }
0x1369   : > { %v5540_v31 = vor.u32 %v5784_v9, %v5539_v57  ;;  %v5796_v57 = vld [vmem:[#allocation22 + $0x98] sm:$0xff] }
0x136a   : > { %5477 = vmatmul.msk.bf16.vlgmr.msrb.gmra.mxu0 %vm1526_vm5, %v3830_v28  ;;  %v5783_v28 = vld [vmem:[#allocation20 + $0xb4] sm:$0xf]  ;;  %v5804_v9 = vld [vmem:[#allocation22 + $0xd8] sm:$0xff] }
0x136b   : > { %v5544_v33 = vor.u32 %v5783_v28, %v5541_v32 }
0x136d   : > { %4273 = vmatpush.bf16.msra.mxu1 %v5544_v33  ;;  %v5795_v33 = vld [vmem:[#allocation22 + $0x90] sm:$0xff] }
0x13d4   : > { %v4050_v17 = vpop.f32.mrf.mxu2 }
0x13dc   : > { %v3951_v7 = vpop.f32.mrf.mxu3  ;;  %v4052_v35 = vpop.f32.mrf.mxu2 }
0x13dd   : > { %v4055_v18 = vpack.c.bf16 %v4052_v35, %v4050_v17  ;;  %v5782_v35 = vld [vmem:[#allocation20 + $0xa4] sm:$0xf0] }
0x13df   : > { %5508 = vmatmul.msk.bf16.vlgmr.msrb.gmra.mxu3 %vm1526_vm5, %v4055_v18 }
0x13e4   : > { %v3953_v37 = vpop.f32.mrf.mxu3 }
0x13e5   : > { %v3956_v38 = vpack.c.bf16 %v3953_v37, %v3951_v7  ;;  %v5531_v7 = vld [vmem:[#allocation20 + $0xa0] sm:$0xf]  ;;  %v5781_v37 = vld [vmem:[#allocation20 + $0xa4] sm:$0xf] }
0x13e6   : > { %v5532_v18 = vor.u32 %v5782_v35, %v5531_v7 }
0x13e7   : > { %5497 = vmatmul.msk.bf16.vlgmr.msra.gmra.mxu0 %vm1526_vm5, %v3956_v38  ;;  %v3855_v39 = vpop.f32.mrf.mxu0  ;;  %v5533_v38 = vld [vmem:[#allocation20 + $0xa8] sm:$0xf0] }
0x13e8   : > { %v3885_v26 = vadd.f32 %v7642_v44, %v3855_v39  ;;  %v5523_v39 = vld [vmem:[#allocation20 + $0x90] sm:$0xf] }
0x13ef   : > { %v3857_v45 = vpop.f32.mrf.mxu0 }
0x13f0   : > { %v3887_v46 = vadd.f32 %v7644_v23, %v3857_v45  ;;  %v5536_v45 = vor.u32 %v5781_v37, %v5533_v38  ;;  %v5802_v37 = vld [vmem:[#allocation22 + $0xc8] sm:$0xff] }
0x13f2   : > { %4274 = vmatpush.bf16.msra.mxu1 %v5536_v45 }
0x1462   : > { %v4080_v40 = vpop.f32.mrf.mxu3 }
0x1464   : > { %v3981_v41 = vpop.f32.mrf.mxu0 }
0x1465   : > { %v3986_v19 = vadd.f32 %v3981_v41, %v3885_v26  ;;  %v5780_v26 = vld [vmem:[#allocation20 + $0x94] sm:$0xf0]  ;;  %v5525_v41 = vld [vmem:[#allocation20 + $0x98] sm:$0xf0] }
0x1467   : > { %v4085_v27 = vadd.f32 %v4080_v40, %v3986_v19  ;;  %v5779_v40 = vld [vmem:[#allocation20 + $0x94] sm:$0xf]  ;;  %v5524_v19 = vor.u32 %v5780_v26, %v5523_v39 }
0x1469   : > { %v4087_v20 = vadd.f32 %v4085_v27, %v7607_v63 }
0x146a   : > { %v4082_v50 = vpop.f32.mrf.mxu3 }
0x146b   : > { %v4094_v43 = vadd.f32 %v6038_v42, %v4087_v20  ;;  %v5515_v20 = vld [vmem:[#allocation20 + $0x80] sm:$0xf] }
0x146c   : > { %v3983_v24 = vpop.f32.mrf.mxu0 }
0x146d   : > { %v3987_v49 = vadd.f32 %v3983_v24, %v3887_v46  ;;  %4100 = vadd.xlane.f32.xlu1 %v4094_v43  ;;  %v5778_v46 = vld [vmem:[#allocation20 + $0x84] sm:$0xf0]  ;;  %v5777_v24 = vld [vmem:[#allocation20 + $0x84] sm:$0xf] }
0x146f   : > { %v4086_v25 = vadd.f32 %v4082_v50, %v3987_v49  ;;  %v5517_v49 = vld [vmem:[#allocation20 + $0x88] sm:$0xf0] }
0x1471   : > { %v4088_v44 = vadd.f32 %v4086_v25, %v7609_v11  ;;  %v5571_v11 = vld [vmem:[#allocation20 + $0xf0] sm:$0xf] }
0x1472   : > { %v5572_v61 = vor.u32 %v5792_v59, %v5571_v11 }
0x1473   : > { %v4095_v51 = vadd.f32 %v6038_v42, %v4088_v44  ;;  %v5528_v42 = vor.u32 %v5779_v40, %v5525_v41  ;;  %v5516_v44 = vor.u32 %v5778_v46, %v5515_v20 }
0x1474   : > { %4255 = vmatpush.bf16.msrb.mxu0 %v5572_v61 }
0x1475   : > { %4102 = vadd.xlane.f32.xlu0 %v4095_v51  ;;  %4275 = vmatpush.bf16.msra.mxu1 %v5528_v42 }
0x1478   : > { %4256 = vmatpush.bf16.msrb.mxu0 %v5564_v8  ;;  %v6040_v8 = vld [vmem:[%s7769_s16 + $0x1] ss:$0 sm:$0xff] }
0x147c   : > { %4257 = vmatpush.bf16.msrb.mxu0 %v5556_v47 }
0x1480   : > { %4258 = vmatpush.bf16.msrb.mxu0 %v5548_v16  ;;  %v5797_v16 = vld [vmem:[#allocation22 + $0xa0] sm:$0xff] }
0x1484   : > { %4259 = vmatpush.bf16.msrb.mxu0 %v5540_v31 }
0x1488   : > { %4260 = vmatpush.bf16.msrb.mxu0 %v5532_v18  ;;  %v5794_v18 = vld [vmem:[#allocation22 + $0x88] sm:$0xff] }
0x148c   : > { %4261 = vmatpush.bf16.msrb.mxu0 %v5524_v19  ;;  %v5793_v19 = vld [vmem:[#allocation22 + $0x80] sm:$0xff] }
0x1490   : > { %4262 = vmatpush.bf16.msrb.mxu0 %v5516_v44 }
0x14e0   : > { %v4101_v1 = vpop.xlane.xlu1 %4100 }
0x14e1   : > { %v4104_v53 = vmul.f32 %v4101_v1, %v7557_v0  ;;  %v5520_v1 = vor.u32 %v5777_v24, %v5517_v49 }
0x14e3   : > { %v7679_v54 = vsub.f32 %v4094_v43, %v4104_v53  ;;  %4276 = vmatpush.bf16.msra.mxu1 %v5520_v1 }
0x14e5   : > { %v4108_v63 = vmul.f32 %v7679_v54, %v7679_v54 }
0x14e7   : > { %4110 = vadd.xlane.f32.xlu1 %v4108_v63 }
0x14e8   : > { %v4103_v23 = vpop.xlane.xlu0 %4102 }
0x14e9   : > { %v4105_v55 = vmul.f32 %v4103_v23, %v7557_v0 }
0x14eb   : > { %v7684_v56 = vsub.f32 %v4095_v51, %v4105_v55 }
0x14ed   : > { %v4109_v58 = vmul.f32 %v7684_v56, %v7684_v56 }
0x14ef   : > { %4112 = vadd.xlane.f32.xlu1 %v4109_v58 }
0x155a   : > { %v4111_v22 = vpop.xlane.xlu1 %4110 }
0x155b   : > { %v4114_v29 = vmul.f32 %v4111_v22, %v7557_v0  ;;  %v4172_v22 = vperm.slane %v5512_v36, 1 }
0x155d   : > { %v4116_v17 = vadd.f32 1e-05, %v4114_v29 }
0x155f   : > { %6171 = vrsqrt.f32 %v4116_v17  ;;  %vm4124_vm14 = vweird.f32 %v4116_v17 }
0x1562   : > { %v4113_v27 = vpop.xlane.xlu1 %4112 }
0x1563   : > { %v4115_v43 = vmul.f32 %v4113_v27, %v7557_v0  ;;  %v5801_v27 = vld [vmem:[#allocation22 + $0xc0] sm:$0xff] }
0x1565   : > { %v6172_v50 = vpop.eup %6171  ;;  %v4117_v25 = vadd.f32 1e-05, %v4115_v43 }
0x1566   : > { %v4119_v51 = vmul.f32 %v6172_v50, %v4116_v17  ;;  %vm4125_vm5 = vweird.f32 %v6172_v50  ;;  %v5803_v17 = vld [vmem:[#allocation22 + $0xd0] sm:$0xff] }
0x1567   : > { %6173 = vrsqrt.f32 %v4117_v25  ;;  %vm4126_vm15 = vmor %vm4124_vm14, %vm4125_vm5  ;;  %vm4134_vm1 = vweird.f32 %v4117_v25 }
0x1568   : > { %v4120_v53 = vmul.f32 %v6172_v50, %v4119_v51 }
0x156a   : > { %v4121_v63 = vmul.f32 0.5, %v4120_v53 }
0x156c   : > { %v4122_v23 = vsub.f32 1.5, %v4121_v63 }
0x156d   : > { %v6174_v55 = vpop.eup %6173 }
0x156e   : > { %v4123_v58 = vmul.f32 %v6172_v50, %v4122_v23  ;;  %v4129_v11 = vmul.f32 %v6174_v55, %v4117_v25  ;;  %vm4135_vm0 = vweird.f32 %v6174_v55 }
0x156f   : > { %vm4136_vm2 = vmor %vm4134_vm1, %vm4135_vm0 }
0x1570   : > { %v4130_v59 = vmul.f32 %v6174_v55, %v4129_v11  ;;  %v4127_v60 = vsel %vm4126_vm15, %v6172_v50, %v4123_v58 }
0x1571   : > { %v4138_v3 = vmul.f32 %v4127_v60, %v7679_v54  ;;  %v5800_v54 = vld [vmem:[#allocation22 + $0xb8] sm:$0xff] }
0x1572   : > { %v4131_v61 = vmul.f32 0.5, %v4130_v59  ;;  %4455 = vmatpush.bf16.msrb.mxu2 %v5800_v54 }
0x1573   : > { %v4143_v52 = vmul.f32 %v6039_v2, %v4138_v3 }
0x1574   : > { %v4132_v62 = vsub.f32 1.5, %v4131_v61 }
0x1575   : > { %v7698_v13 = vadd.f32 %v6040_v8, %v4143_v52 }
0x1576   : > { %v4133_v6 = vmul.f32 %v6174_v55, %v4132_v62  ;;  %4456 = vmatpush.bf16.msrb.mxu2 %v5799_v14 }
0x1578   : > { %v4137_v5 = vsel %vm4136_vm2, %v6174_v55, %v4133_v6 }
0x1579   : > { %v4139_v30 = vmul.f32 %v4137_v5, %v7684_v56  ;;  %v5806_v56 = vld [vmem:[#allocation22 + $0xe8] sm:$0xff] }
0x157a   : > { %4457 = vmatpush.bf16.msrb.mxu2 %v5798_v15  ;;  %4471 = vmatpush.bf16.msra.mxu3 %v5806_v56  ;;  %v6041_v15 = vld [vmem:[%s7839_s26 + $0x1] ss:$0 sm:$0xff] }
0x157b   : > { %v4144_v12 = vmul.f32 %v6039_v2, %v4139_v30 }
0x157d   : > { %v7700_v34 = vadd.f32 %v6040_v8, %v4144_v12 }
0x157e   : > { %4458 = vmatpush.bf16.msrb.mxu2 %v5797_v16  ;;  %4472 = vmatpush.bf16.msra.mxu3 %v5805_v21 }
0x157f   : > { %v4150_v47 = vpack.c.bf16 %v7700_v34, %v7698_v13 }
0x1581   : > { %4263 = vmatmul.bf16.vlgmr.msrb.gmra.mxu0 %v4150_v47  ;;  %4277 = vmatmul.bf16.vlgmr.msra.gmra.mxu1 %v4150_v47 }
0x1582   : > { %4459 = vmatpush.bf16.msrb.mxu2 %v5796_v57  ;;  %4473 = vmatpush.bf16.msra.mxu3 %v5804_v9 }
0x1586   : > { %4460 = vmatpush.bf16.msrb.mxu2 %v5795_v33  ;;  %4474 = vmatpush.bf16.msra.mxu3 %v5803_v17 }
0x158a   : > { %4461 = vmatpush.bf16.msrb.mxu2 %v5794_v18  ;;  %4475 = vmatpush.bf16.msra.mxu3 %v5802_v37 }
0x158e   : > { %4462 = vmatpush.bf16.msrb.mxu2 %v5793_v19  ;;  %4476 = vmatpush.bf16.msra.mxu3 %v5801_v27  ;;  %v4552_v19 = vld [vmem:[#allocation26 + $0x38] sm:$0xff]  ;;  %v4551_v27 = vld [vmem:[#allocation26 + $0x30] sm:$0xff] }
0x15fe   : > { %v4264_v28 = vpop.f32.mrf.mxu0  ;;  %v4278_v29 = vpop.f32.mrf.mxu1 }
0x15ff   : > { %v4265_v31 = vadd.f32 %v4264_v28, %v4171_v48  ;;  %v4279_v32 = vadd.f32 %v4278_v29, %v4172_v22 }
0x1601   : > { %v4283_v7 = vmul.f32 %v4265_v31, %v4265_v31  ;;  %v4284_v35 = vmul.f32 %v4279_v32, %v4279_v32 }
0x1603   : > { %v4287_v38 = vmul.f32 %v4283_v7, %v4265_v31  ;;  %v4288_v39 = vmul.f32 %v4284_v35, %v4279_v32 }
0x1605   : > { %v4291_v45 = vmul.f32 0.044715, %v4287_v38  ;;  %v4292_v26 = vmul.f32 0.044715, %v4288_v39  ;;  %v4557_v39 = vld [vmem:[#allocation26 + $0x60] sm:$0xff] }
0x1606   : > { %v4266_v40 = vpop.f32.mrf.mxu0  ;;  %v4280_v41 = vpop.f32.mrf.mxu1 }
0x1607   : > { %v4295_v42 = vadd.f32 %v4291_v45, %v4265_v31  ;;  %v4296_v20 = vadd.f32 %v4292_v26, %v4279_v32  ;;  %v4267_v46 = vadd.f32 %v4266_v40, %v4171_v48  ;;  %v4281_v43 = vadd.f32 %v4280_v41, %v4172_v22  ;;  %v4556_v45 = vld [vmem:[#allocation26 + $0x58] sm:$0xff]  ;;  %v4555_v26 = vld [vmem:[#allocation26 + $0x50] sm:$0xff]  ;;  %v4554_v40 = vld [vmem:[#allocation26 + $0x48] sm:$0xff] }
0x1608   : > { %v4553_v41 = vld [vmem:[#allocation26 + $0x40] sm:$0xff] }
0x1609   : > { %v4299_v24 = vmul.f32 0.7978846, %v4295_v42  ;;  %v4285_v49 = vmul.f32 %v4267_v46, %v4267_v46  ;;  %v4286_v50 = vmul.f32 %v4281_v43, %v4281_v43  ;;  %v4300_v25 = vmul.f32 0.7978846, %v4296_v20  ;;  %v4550_v42 = vld [vmem:[#allocation26 + $0x28] sm:$0xff]  ;;  %v4549_v20 = vld [vmem:[#allocation26 + $0x20] sm:$0xff] }
0x160b   : > { %v4289_v44 = vmul.f32 %v4285_v49, %v4267_v46  ;;  %v4290_v51 = vmul.f32 %v4286_v50, %v4281_v43  ;;  %6175 = vtanh.f32 %v4299_v24  ;;  %v4547_v24 = vld [vmem:[#allocation26 + $0x10] sm:$0xff]  ;;  %v4546_v50 = vld [vmem:[#allocation26 + $0x8] sm:$0xff] }
0x160c   : > { %6177 = vtanh.f32 %v4300_v25 }
0x160d   : > { %v4293_v1 = vmul.f32 0.044715, %v4289_v44  ;;  %v4294_v53 = vmul.f32 0.044715, %v4290_v51  ;;  %v4545_v44 = vld [vmem:[#allocation26] sm:$0xff] }
0x160f   : > { %v4297_v63 = vadd.f32 %v4293_v1, %v4267_v46  ;;  %v4298_v23 = vadd.f32 %v4294_v53, %v4281_v43 }
0x1611   : > { %v4301_v55 = vmul.f32 0.7978846, %v4297_v63  ;;  %v4302_v58 = vmul.f32 0.7978846, %v4298_v23  ;;  %v6176_v11 = vpop.eup %6175 }
0x1612   : > { %v6178_v59 = vpop.eup %6177  ;;  %v4307_v60 = vadd.f32 1.0, %v6176_v11 }
0x1613   : > { %6179 = vtanh.f32 %v4301_v55  ;;  %v4308_v61 = vadd.f32 1.0, %v6178_v59 }
0x1614   : > { %6181 = vtanh.f32 %v4302_v58  ;;  %v4311_v3 = vmul.f32 0.5, %v4307_v60 }
0x1615   : > { %v4312_v5 = vmul.f32 0.5, %v4308_v61 }
0x1616   : > { %v4315_v12 = vmul.f32 %v4311_v3, %v4265_v31  ;;  %v4560_v31 = vld [vmem:[#allocation26 + $0x78] sm:$0xff] }
0x1617   : > { %v4316_v54 = vmul.f32 %v4312_v5, %v4279_v32  ;;  %v4559_v32 = vld [vmem:[#allocation26 + $0x70] sm:$0xff]  ;;  %4561 = vmatpush.msra.mxu0 %v4560_v31  ;;  %v6043_v5 = vld [vmem:[#allocation25 + $0x1] ss:$0 sm:$0xff] }
0x1619   : > { %v6180_v62 = vpop.eup %6179  ;;  %4562 = vmatpush.msra.mxu0 %v4559_v32 }
0x161a   : > { %v6182_v2 = vpop.eup %6181  ;;  %v4309_v6 = vadd.f32 1.0, %v6180_v62  ;;  %v6042_v62 = vld [vmem:[#allocation23 + $0x1] ss:$0 sm:$0xff] }
0x161b   : > { %v4310_v8 = vadd.f32 1.0, %v6182_v2 }
0x161c   : > { %v4313_v52 = vmul.f32 0.5, %v4309_v6 }
0x161d   : > { %v4314_v30 = vmul.f32 0.5, %v4310_v8 }
0x161e   : > { %v4317_v47 = vmul.f32 %v4313_v52, %v4267_v46  ;;  %v4548_v46 = vld [vmem:[#allocation26 + $0x18] sm:$0xff] }
0x161f   : > { %v4318_v10 = vmul.f32 %v4314_v30, %v4281_v43 }
0x1620   : > { %v4319_v14 = vpack.c.bf16 %v4317_v47, %v4315_v12 }
0x1621   : > { %v4320_v4 = vpack.c.bf16 %v4318_v10, %v4316_v54 }
0x1622   : > { %4463 = vmatmul.bf16.vlgmr.msrb.gmra.mxu2 %v4319_v14 }
0x1623   : > { %4477 = vmatmul.bf16.vlgmr.msra.gmra.mxu3 %v4320_v4 }
0x16a5   : > { %v4464_v56 = vpop.f32.mrf.mxu2 }
0x16a6   : > { %v4465_v36 = vadd.f32 %v6041_v15, %v4464_v56  ;;  %v4478_v16 = vpop.f32.mrf.mxu3 }
0x16a8   : > { %v4479_v21 = vadd.f32 %v4478_v16, %v4465_v36  ;;  %v6044_v16 = vld [vmem:[#allocation28] ss:$0 sm:$0xff] }
0x16aa   : > { %v4483_v48 = vadd.f32 %v4479_v21, %v7698_v13 }
0x16ac   : > { %4489 = vadd.xlane.f32.xlu2 %v4483_v48 }
0x16ad   : > { %v4466_v22 = vpop.f32.mrf.mxu2 }
0x16ae   : > { %v4467_v57 = vadd.f32 %v6041_v15, %v4466_v22  ;;  %v4480_v9 = vpop.f32.mrf.mxu3 }
0x16b0   : > { %v4481_v28 = vadd.f32 %v4480_v9, %v4467_v57 }
0x16b2   : > { %v4484_v29 = vadd.f32 %v4481_v28, %v7700_v34  ;;  %v4558_v34 = vld [vmem:[#allocation26 + $0x68] sm:$0xff] }
0x16b3   : > { %4563 = vmatpush.msra.mxu0 %v4558_v34 }
0x16b4   : > { %4491 = vadd.xlane.f32.xlu1 %v4484_v29 }
0x16b5   : > { %4564 = vmatpush.msra.mxu0 %v4557_v39 }
0x16b7   : > { %4565 = vmatpush.msra.mxu0 %v4556_v45 }
0x16b9   : > { %4566 = vmatpush.msra.mxu0 %v4555_v26 }
0x16bb   : > { %4567 = vmatpush.msra.mxu0 %v4554_v40 }
0x16bd   : > { %4568 = vmatpush.msra.mxu0 %v4553_v41 }
0x16bf   : > { %4569 = vmatpush.msra.mxu0 %v4552_v19 }
0x16c1   : > { %4570 = vmatpush.msra.mxu0 %v4551_v27 }
0x16c3   : > { %4571 = vmatpush.msra.mxu0 %v4550_v42 }
0x16c5   : > { %4572 = vmatpush.msra.mxu0 %v4549_v20 }
0x16c7   : > { %4573 = vmatpush.msra.mxu0 %v4548_v46 }
0x16c9   : > { %4574 = vmatpush.msra.mxu0 %v4547_v24 }
0x16cb   : > { %4575 = vmatpush.msra.mxu0 %v4546_v50 }
0x16cd   : > { %4576 = vmatpush.msra.mxu0 %v4545_v44 }
0x171f   : > { %v4490_v33 = vpop.xlane.xlu2 %4489 }
0x1720   : > { %v4493_v17 = vmul.f32 %v4490_v33, %v7557_v0 }
0x1722   : > { %v4495_v7 = vsub.f32 %v4483_v48, %v4493_v17 }
0x1724   : > { %v4497_v35 = vmul.f32 %v4495_v7, %v4495_v7 }
0x1726   : > { %4499 = vadd.xlane.f32.xlu1 %v4497_v35 }
0x1727   : > { %v4492_v18 = vpop.xlane.xlu1 %4491 }
0x1728   : > { %v4494_v13 = vmul.f32 %v4492_v18, %v7557_v0 }
0x172a   : > { %v7714_v37 = vsub.f32 %v4484_v29, %v4494_v13 }
0x172c   : > { %v4498_v38 = vmul.f32 %v7714_v37, %v7714_v37 }
0x172e   : > { %4501 = vadd.xlane.f32.xlu1 %v4498_v38 }
0x1799   : > { %v4500_v43 = vpop.xlane.xlu1 %4499 }
0x179a   : > { %v4503_v49 = vmul.f32 %v4500_v43, %v7557_v0 }
0x179c   : > { %v4505_v25 = vadd.f32 1e-05, %v4503_v49 }
0x179e   : > { %6183 = vrsqrt.f32 %v4505_v25  ;;  %vm4513_vm4 = vweird.f32 %v4505_v25 }
0x17a1   : > { %v4502_v51 = vpop.xlane.xlu1 %4501 }
0x17a2   : > { %v4504_v1 = vmul.f32 %v4502_v51, %v7557_v0 }
0x17a4   : > { %v6184_v53 = vpop.eup %6183  ;;  %v4506_v63 = vadd.f32 1e-05, %v4504_v1 }
0x17a5   : > { %v4508_v23 = vmul.f32 %v6184_v53, %v4505_v25  ;;  %vm4514_vm3 = vweird.f32 %v6184_v53 }
0x17a6   : > { %6185 = vrsqrt.f32 %v4506_v63  ;;  %vm4515_vm6 = vmor %vm4513_vm4, %vm4514_vm3  ;;  %vm4523_vm8 = vweird.f32 %v4506_v63 }
0x17a7   : > { %v4509_v55 = vmul.f32 %v6184_v53, %v4508_v23 }
0x17a9   : > { %v4510_v58 = vmul.f32 0.5, %v4509_v55 }
0x17ab   : > { %v4511_v11 = vsub.f32 1.5, %v4510_v58 }
0x17ac   : > { %v6186_v59 = vpop.eup %6185 }
0x17ad   : > { %v4512_v60 = vmul.f32 %v6184_v53, %v4511_v11  ;;  %v4518_v61 = vmul.f32 %v6186_v59, %v4506_v63  ;;  %vm4524_vm7 = vweird.f32 %v6186_v59 }
0x17ae   : > { %vm4525_vm9 = vmor %vm4523_vm8, %vm4524_vm7 }
0x17af   : > { %v4516_v2 = vsel %vm4515_vm6, %v6184_v53, %v4512_v60  ;;  %v4519_v3 = vmul.f32 %v6186_v59, %v4518_v61 }
0x17b0   : > { %v4527_v6 = vmul.f32 %v4516_v2, %v4495_v7 }
0x17b1   : > { %v4520_v8 = vmul.f32 0.5, %v4519_v3 }
0x17b2   : > { %v4532_v0 = vmul.f32 %v6042_v62, %v4527_v6 }
0x17b3   : > { %v4521_v52 = vsub.f32 1.5, %v4520_v8 }
0x17b4   : > { %v4537_v30 = vadd.f32 %v6043_v5, %v4532_v0 }
0x17b5   : > { %v4522_v12 = vmul.f32 %v6186_v59, %v4521_v52 }
0x17b6   : > { %4577 = vmatmul.f32.vlgmr.msra.gmra.mxu0 %v4537_v30  ;;  %v4539_v47 = vmul.f32 %v4537_v30, %v4537_v30 }
0x17b7   : > { %v4526_v54 = vsel %vm4525_vm9, %v6186_v59, %v4522_v12 }
0x17b8   : > { %4541 = vadd.xlane.f32.xlu0 %v4539_v47  ;;  %v4528_v10 = vmul.f32 %v4526_v54, %v7714_v37 }
0x17ba   : > { %v4533_v14 = vmul.f32 %v6042_v62, %v4528_v10 }
0x17bc   : > { %v4538_v4 = vadd.f32 %v6043_v5, %v4533_v14 }
0x17be   : > { %4580 = vmatmul.f32.gmra.mxu0 %v4538_v4  ;;  %v4540_v15 = vmul.f32 %v4538_v4, %v4538_v4 }
0x17c0   : > { %4543 = vadd.xlane.f32.xlu1 %v4540_v15 }
0x182b   : > { %v4542_v21 = vpop.xlane.xlu0 %4541 }
0x1833   : > { %v4578_v56 = vpop.f32.mrf.mxu0  ;;  %v4544_v28 = vpop.xlane.xlu1 %4543 }
0x1834   : > { %v4584_v36 = vmul.f32 2.0, %v4578_v56 }
0x1836   : > { %v4586_v48 = vsub.f32 %v4542_v21, %v4584_v36 }
0x1838   : > { %v4592_v22 = vadd.f32 %v6044_v16, %v4586_v48 }
0x183a   : > { %4594 = vst [vmem:[%s991_s20] sm:$0xff] %v4592_v22 }
0x183b   : > { %v4581_v57 = vpop.f32.mrf.mxu0 }
0x183c   : > { %v4585_v9 = vmul.f32 2.0, %v4581_v57 }
0x183e   : > { %v4587_v29 = vsub.f32 %v4544_v28, %v4585_v9 }
0x1840   : > { %v4593_v31 = vadd.f32 %v6044_v16, %v4587_v29 }
0x1842   : > { %4595 = vst [vmem:[%s991_s20 + $0x8] sm:$0xff] %v4593_v31 }
0x1843   : > { %6664 = shalt.err (!%p6661_p8)
}
0x1844   : > { %s6764_s28 = smov 128   ;;  %s6765_s20 = smov 8  }
0x1845   : > { %5875 = dma.vmem_to_hbm [thread:$0]  (%p6934_p5), %s4610_s3, 256, %s4612_s2, %s4597_s30, %s6764_s28, %s6764_s28, %s6765_s20  }
0x1846 PF: > { %s7844_s25 = sld [smem:[#allocation42_spill]] }
0x1847   : > { %s7845_s29 = sld [smem:[#allocation39_spill]] }
0x184c   : > { %p5957_p9 = scmp.ge.s32.totalorder %s7844_s25, 2 }
0x184d   : > { %s4626_s5 = sand.u32 1, %s7845_s29  }
0x184e   : > { %p5924_p10 = pnand %p5957_p9, %p6938_p6  ;;  %s4627_s27 = scalar_lea.sflag [#allocation7], %s4626_s5 }
0x1850   : > { %p5925_p11 = pneg %p5924_p10 }
0x1852   : > { %6714 = dma.done.wait (%p5925_p11), %s4627_s27, 256  }
0x1853   : > { %6716 = vsyncadd (%p5925_p11), %s4627_s27, 4294967040  ;;  %s7847_s30 = sld [smem:[#allocation43_spill]] }
0x1854   : > { %s7848_s29 = sld [smem:[#allocation40_spill]] }
0x1855   : > { %s7849_s2 = sld [smem:[#allocation41_spill]] }
0x1856   : > { %s7850_s6 = sld [smem:[#allocation44_spill]] }
0x1859   : > { %p43_p12 = scmp.ge.s32.totalorder %s7847_s30, 4  }
0x185b   :  { %45 = sbr.rel (!%p43_p12) target bundleno = 27 (0x1b), region = 290 }
0x1860   :  { %4633 = vsyncpa [#allocation6], 1 }
0x1861   :  { %4635 = vsyncpa [#allocation6 + $0x1], 1 }
0x1862   :  { %4636 = vsyncpa [#allocation9], 1 }
0x1863   :  { %4637 = vsyncpa [#allocation12], 1 }
0x1864   :  { %4638 = vsyncpa [#allocation15], 1 }
0x1865   :  { %4639 = vsyncpa [#allocation18], 1 }
0x1866   :  { %4640 = vsyncpa [#allocation21], 1 }
0x1867   :  { %4641 = vsyncpa [#allocation24], 1 }
0x1868   :  { %4642 = vsyncpa [#allocation27], 1 }
0x1869   :  { %4643 = vsyncpa [#allocation7], 1 }
0x186a   :  { %4645 = vsyncpa [#allocation7 + $0x1], 1 }

</bundles_post_ra>
